<compile_context>
chip_gen: v5e
topology: v5e:2x2
jax: 0.10.0
libtpu: 0.0.40
codegen_flags: <defaults>
</compile_context>

<pallas_src>
import functools

import jax
import jax.numpy as jnp
import numpy as np
from jax.experimental import pallas as pl
from jax.experimental.pallas import tpu as pltpu


# --------------------------- Embedding gather kernel -------------------------

def _embed_gather_kernel(ids_ref, table_ref, out_ref, buf, sem):
    """Gather R embedding rows per grid step via overlapping manual DMAs."""
    R = buf.shape[0]
    i = pl.program_id(0)
    # Issue all R row DMAs, then wait: the copies overlap each other and the
    # fixed per-grid-step overhead is amortized over R tokens.
    for j in range(R):
        row = ids_ref[i * R + j]
        pltpu.make_async_copy(table_ref.at[pl.ds(row, 1), :],
                              buf.at[pl.ds(j, 1), :], sem.at[j]).start()
    for j in range(R):
        pltpu.make_async_copy(table_ref.at[pl.ds(0, 1), :],
                              buf.at[pl.ds(j, 1), :], sem.at[j]).wait()
    out_ref[...] = buf[...]


def embed_lookup_flat(ids_bt, table, rows_per_step=8):
    """Gather table[ids], time-major and flattened: returns [T*B, E]."""
    B, T = ids_bt.shape
    V, E = table.shape
    N = T * B
    ids_flat = jnp.transpose(ids_bt).reshape(N).astype(jnp.int32)
    R = min(rows_per_step, N)
    n_steps = (N + R - 1) // R
    Npad = n_steps * R
    if Npad != N:
        ids_flat = jnp.concatenate(
            [ids_flat, jnp.zeros((Npad - N,), jnp.int32)])
    out = pl.pallas_call(
        _embed_gather_kernel,
        out_shape=jax.ShapeDtypeStruct((Npad, E), table.dtype),
        grid_spec=pltpu.PrefetchScalarGridSpec(
            num_scalar_prefetch=1,
            grid=(n_steps,),
            in_specs=[pl.BlockSpec(memory_space=pl.ANY)],
            out_specs=pl.BlockSpec((R, E), lambda i, ids: (i, 0)),
            scratch_shapes=[pltpu.VMEM((R, E), table.dtype),
                            pltpu.SemaphoreType.DMA((R,))],
        ),
        compiler_params=pltpu.CompilerParams(
            dimension_semantics=("arbitrary",)),
    )(ids_flat, table)
    return out[:N] if Npad != N else out


# --------------------- Chunked bidirectional LSTM layer kernel ---------------

def _lstm_dir_kernel(x_ref, wih_ref, whh_ref, b_ref, out_ref, hN_ref, cN_ref,
                     gx_sc, h_sc, c_sc):
    B, H = h_sc.shape
    Tc = gx_sc.shape[0] // B
    d = pl.program_id(0)              # 0 = forward, 1 = backward direction
    c = pl.program_id(1)              # time-chunk index (serial per direction)
    nC = pl.num_programs(1)

    @pl.when(c == 0)
    def _():
        h_sc[...] = jnp.zeros_like(h_sc)
        c_sc[...] = jnp.zeros_like(c_sc)

    # (1) Hoisted, chunked input projection: one tall bf16 MXU matmul per
    #     chunk  [Tc*B, Din] @ [Din, 4H]  accumulated in f32 (+ bias).
    xc = x_ref[...].astype(wih_ref.dtype)
    gx = jnp.dot(xc, wih_ref[...], preferred_element_type=jnp.float32)
    gx_sc[...] = gx + b_ref[...]

    # (2) Serial recurrence over this chunk: only h @ W_hh stays in the loop.
    def step(s, carry):
        row = (1 - d) * s + d * (Tc - 1 - s)       # local time index in chunk
        off = pl.multiple_of(row * B, B)
        gx_s = gx_sc[pl.ds(off, B), :]                       # [B, 4H]
        gh = jnp.dot(h_sc[...].astype(whh_ref.dtype), whh_ref[...],
                     preferred_element_type=jnp.float32)     # [B, 4H]
        gates = gx_s + gh
        i = jax.nn.sigmoid(gates[:, 0:H])
        f = jax.nn.sigmoid(gates[:, H:2 * H])
        g = jnp.tanh(gates[:, 2 * H:3 * H])
        o = jax.nn.sigmoid(gates[:, 3 * H:4 * H])
        c_new = f * c_sc[...] + i * g
        h_new = o * jnp.tanh(c_new)
        h_sc[...] = h_new
        c_sc[...] = c_new
        out_ref[pl.ds(off, B), :] = h_new
        return carry

    jax.lax.fori_loop(0, Tc, step, 0, unroll=2)

    # (3) Final states written once, after the last chunk of this direction.
    @pl.when(c == nC - 1)
    def _():
        hN_ref[...] = h_sc[...]
        cN_ref[...] = c_sc[...]


def _pick_time_chunk(T, B, H, target_bytes=4 * 1024 * 1024):
    """Largest divisor Tc of T whose per-chunk gate scratch (Tc*B*4H f32) fits
    the budget, with (Tc*B) % 8 == 0 (or Tc == T) for aligned blocks."""
    best = None
    for Tc in range(1, T + 1):
        if T % Tc:
            continue
        if Tc != T and (Tc * B) % 8 != 0:
            continue
        if Tc * B * 4 * H * 4 <= target_bytes:
            best = Tc
    if best is None:
        for Tc in range(1, T + 1):
            if T % Tc == 0 and (Tc == T or (Tc * B) % 8 == 0):
                return Tc
    return best


def bilstm_layer(x_flat, wih2, whh2, b2, *, T, B, time_chunk=None):
    """One bidirectional LSTM layer (zero initial state).

    x_flat: time-major flattened activations [T*B, Din] (row = t*B + b).
    wih2:   [2, Din, 4H] (bf16), whh2: [2, H, 4H] (bf16), b2: [2, 1, 4H] (f32).
    Returns (out [T*B, 2H] f32, hN [2, B, H], cN [2, B, H]).
    """
    TB, Din = x_flat.shape
    assert TB == T * B
    H = whh2.shape[1]
    G = 4 * H

    Tc = time_chunk if time_chunk is not None else _pick_time_chunk(T, B, H)
    assert T % Tc == 0 and (Tc == T or (Tc * B) % 8 == 0), (T, B, Tc)
    nC = T // Tc

    def tb(d, c):                       # time-block index for direction d
        return (1 - d) * c + d * (nC - 1 - c)

    in_specs = [
        pl.BlockSpec((Tc * B, Din), lambda d, c: (tb(d, c), 0)),
        pl.BlockSpec((None, Din, G), lambda d, c: (d, 0, 0)),
        pl.BlockSpec((None, H, G), lambda d, c: (d, 0, 0)),
        pl.BlockSpec((None, 1, G), lambda d, c: (d, 0, 0)),
    ]
    state_spec = pl.BlockSpec((None, B, H), lambda d, c: (d, 0, 0))

    # Fused lane-dense output [T*B, 2H] (fwd cols 0:H, bwd cols H:2H) when H is
    # lane-aligned; otherwise per-direction slabs + one concat (generic path).
    fused = (H % 128) == 0
    if fused:
        out_shape0 = jax.ShapeDtypeStruct((T * B, 2 * H), jnp.float32)
        out_spec0 = pl.BlockSpec((Tc * B, H), lambda d, c: (tb(d, c), d))
    else:
        out_shape0 = jax.ShapeDtypeStruct((2, T * B, H), jnp.float32)
        out_spec0 = pl.BlockSpec((None, Tc * B, H),
                                 lambda d, c: (d, tb(d, c), 0))

    out0, hN, cN = pl.pallas_call(
        _lstm_dir_kernel,
        out_shape=(out_shape0,
                   jax.ShapeDtypeStruct((2, B, H), jnp.float32),
                   jax.ShapeDtypeStruct((2, B, H), jnp.float32)),
        grid=(2, nC),
        in_specs=in_specs,
        out_specs=(out_spec0, state_spec, state_spec),
        scratch_shapes=[pltpu.VMEM((Tc * B, G), jnp.float32),
                        pltpu.VMEM((B, H), jnp.float32),
                        pltpu.VMEM((B, H), jnp.float32)],
        compiler_params=pltpu.CompilerParams(
            dimension_semantics=("parallel", "arbitrary"),
            vmem_limit_bytes=32 * 1024 * 1024),
    )(x_flat, wih2, whh2, b2)

    out = out0 if fused else jnp.concatenate([out0[0], out0[1]], axis=-1)
    return out, hN, cN


# ----------------------- Weight packing + forward pass -----------------------

def prepare_params(params, matmul_dtype=jnp.bfloat16):
    """Pack weights once (transpose, stack directions, sum biases, cast matmul
    operands to bf16) so nothing is re-packed inside the forward pass."""
    layers = []
    for (wif, whf, bif, bhf), (wib, whb, bib, bhb) in params["lstm"]:
        wih2 = jnp.stack([wif.T, wib.T]).astype(matmul_dtype)      # [2,Din,4H]
        whh2 = jnp.stack([whf.T, whb.T]).astype(matmul_dtype)      # [2,H,4H]
        b2 = jnp.stack([(bif + bhf)[None, :],
                        (bib + bhb)[None, :]]).astype(jnp.float32)  # [2,1,4H]
        layers.append((wih2, whh2, b2))
    return {"embed": params["embed"], "layers": tuple(layers)}


def encoder_forward(prepared, data, *, time_chunk=None):
    """emb = embed(data); out, (h_n, c_n) = bidirectional multi-layer LSTM."""
    B, T = data.shape
    x = embed_lookup_flat(data, prepared["embed"])      # [T*B, E], time-major
    h_parts, c_parts = [], []
    for wih2, whh2, b2 in prepared["layers"]:
        x, hN, cN = bilstm_layer(x, wih2, whh2, b2, T=T, B=B,
                                 time_chunk=time_chunk)
        h_parts.append(hN)
        c_parts.append(cN)
    H2 = x.shape[-1]
    out = jnp.transpose(x.reshape(T, B, H2), (1, 0, 2))            # [B, T, 2H]
    h_n = jnp.concatenate(h_parts, axis=0)                         # [L*2, B, H]
    c_n = jnp.concatenate(c_parts, axis=0)
    return out, (h_n, c_n)


def init_params(key, vocab_size, pad_idx, n_embed, n_hidden, n_layers,
                bidirectional=True):
    num_dirs = 2 if bidirectional else 1
    k_embed = jax.random.fold_in(key, 0)
    embed = jax.random.normal(k_embed, (vocab_size, n_embed), jnp.float32)
    embed = embed.at[pad_idx].set(0.0)                  # padding_idx row zero

    scale = 1.0 / np.sqrt(n_hidden)
    lstm = []
    idx = 1
    for layer in range(n_layers):
        d_in = n_embed if layer == 0 else num_dirs * n_hidden
        dirs = []
        for _ in range(num_dirs):
            ks = [jax.random.fold_in(key, idx + j) for j in range(4)]
            idx += 4
            w_ih = jax.random.uniform(ks[0], (4 * n_hidden, d_in),
                                      jnp.float32, -scale, scale)
            w_hh = jax.random.uniform(ks[1], (4 * n_hidden, n_hidden),
                                      jnp.float32, -scale, scale)
            b_ih = jax.random.uniform(ks[2], (4 * n_hidden,),
                                      jnp.float32, -scale, scale)
            b_hh = jax.random.uniform(ks[3], (4 * n_hidden,),
                                      jnp.float32, -scale, scale)
            dirs.append((w_ih, w_hh, b_ih, b_hh))
        lstm.append(dirs)
    return {"embed": embed, "lstm": lstm}


# ------------------------ pure-JAX reference (check) -------------------------

def _ref_lstm_direction(x, w_ih, w_hh, b, reverse, mm_dtype):
    B, T, _ = x.shape
    H = w_hh.shape[1]
    xs = jnp.flip(x, 1) if reverse else x
    wih = w_ih.T.astype(mm_dtype)
    whh = w_hh.T.astype(mm_dtype)

    def step(carry, x_t):
        h, c = carry
        gates = (jnp.dot(x_t.astype(mm_dtype), wih,
                         preferred_element_type=jnp.float32)
                 + jnp.dot(h.astype(mm_dtype), whh,
                           preferred_element_type=jnp.float32) + b)
        i, f, g, o = jnp.split(gates, 4, axis=-1)
        c = jax.nn.sigmoid(f) * c + jax.nn.sigmoid(i) * jnp.tanh(g)
        h = jax.nn.sigmoid(o) * jnp.tanh(c)
        return (h, c), h

    init = (jnp.zeros((B, H), jnp.float32), jnp.zeros((B, H), jnp.float32))
    (hN, cN), outs = jax.lax.scan(step, init, jnp.swapaxes(xs, 0, 1))
    outs = jnp.swapaxes(outs, 0, 1)
    if reverse:
        outs = jnp.flip(outs, 1)
    return outs, hN, cN


def _ref_forward(params, data, mm_dtype=jnp.bfloat16):
    x = params["embed"][data]
    h_list, c_list = [], []
    for layer_params in params["lstm"]:
        outs = []
        for dd, (w_ih, w_hh, b_ih, b_hh) in enumerate(layer_params):
            o, h, c = _ref_lstm_direction(x, w_ih, w_hh, b_ih + b_hh,
                                          dd == 1, mm_dtype)
            outs.append(o)
            h_list.append(h)
            c_list.append(c)
        x = jnp.concatenate(outs, axis=-1)
    return x, (jnp.stack(h_list), jnp.stack(c_list))


# ----------------------------------- main ------------------------------------

if __name__ == "__main__":
    B, T = 8, 8
    vocab_size, pad_idx = 32, 0
    n_embed, n_hidden, n_layers = 32, 128, 2   # H = 128 -> lane-aligned

    key = jax.random.PRNGKey(0)
    params = init_params(key, vocab_size, pad_idx, n_embed, n_hidden, n_layers)
    prepared = prepare_params(params)
    data = jax.random.randint(jax.random.fold_in(key, 999), (B, T),
                              0, vocab_size, dtype=jnp.int32)

    # time_chunk=2 forces the chunked (nC=4) recurrence path to be exercised.
    fwd = jax.jit(functools.partial(encoder_forward, time_chunk=2))
    out, (h_n, c_n) = fwd(prepared, data)
    jax.block_until_ready((out, h_n, c_n))

    assert out.shape == (B, T, 2 * n_hidden)
    assert h_n.shape == (n_layers * 2, B, n_hidden)
    assert c_n.shape == (n_layers * 2, B, n_hidden)

    ref_out, (ref_h, ref_c) = _ref_forward(params, data)
    np.testing.assert_allclose(np.asarray(out), np.asarray(ref_out),
                               rtol=5e-3, atol=5e-3)
    np.testing.assert_allclose(np.asarray(h_n), np.asarray(ref_h),
                               rtol=5e-3, atol=5e-3)
    np.testing.assert_allclose(np.asarray(c_n), np.asarray(ref_c),
                               rtol=5e-3, atol=5e-3)

    print("KERNEL_OK")
</pallas_src>

<mosaic_0001>
module attributes {stable_mosaic.version = 11 : i64} {
  func.func @_embed_gather_kernel(%arg0: i32, %arg1: memref<64xi32, #tpu.memory_space<smem>>, %arg2: memref<32x32xf32, #tpu.memory_space<any>>, %arg3: memref<8x32xf32, #tpu.memory_space<vmem>>, %arg4: memref<8x32xf32, #tpu.memory_space<vmem>>, %arg5: memref<8x!tpu.dma_semaphore, #tpu.memory_space<semaphore_mem>>) attributes {dimension_semantics = [#tpu.dimension_semantics<arbitrary>], iteration_bounds = array<i64: 8>, scalar_prefetch = 1 : i64, scratch_operands = 2 : i64, tpu.core_type = #tpu.core_type<tc>, window_params = [{}, {transform_indices = @transform_1, window_bounds = array<i64: 8, 32>}]} {
    %c8_i32 = arith.constant 8 : i32
    %0 = arith.muli %arg0, %c8_i32 : i32
    %c0_i32 = arith.constant 0 : i32
    %1 = arith.addi %0, %c0_i32 : i32
    %2 = arith.index_cast %1 : i32 to index
    %3 = memref.load %arg1[%2] : memref<64xi32, #tpu.memory_space<smem>>
    %c0_i32_0 = arith.constant 0 : i32
    %c0_i32_1 = arith.constant 0 : i32
    %4 = tpu.memref_slice %arg2[%3, %c0_i32_1] : memref<32x32xf32, #tpu.memory_space<any>> -> memref<1x32xf32, #tpu.memory_space<any>>
    %c0_i32_2 = arith.constant 0 : i32
    %c0_i32_3 = arith.constant 0 : i32
    %5 = tpu.memref_slice %arg4[%c0_i32_2, %c0_i32_3] : memref<8x32xf32, #tpu.memory_space<vmem>> -> memref<1x32xf32, #tpu.memory_space<vmem>>
    %6 = tpu.memref_slice %arg5[%c0_i32_0] : memref<8x!tpu.dma_semaphore, #tpu.memory_space<semaphore_mem>> -> memref<1x!tpu.dma_semaphore, #tpu.memory_space<semaphore_mem>>
    %7 = tpu.memref_squeeze %6 : memref<1x!tpu.dma_semaphore, #tpu.memory_space<semaphore_mem>> -> memref<!tpu.dma_semaphore, #tpu.memory_space<semaphore_mem>>
    tpu.enqueue_dma source(%4 : memref<1x32xf32, #tpu.memory_space<any>>) target(%5 : memref<1x32xf32, #tpu.memory_space<vmem>>) target_semaphore(%7 : memref<!tpu.dma_semaphore, #tpu.memory_space<semaphore_mem>>)
    %c8_i32_4 = arith.constant 8 : i32
    %8 = arith.muli %arg0, %c8_i32_4 : i32
    %c1_i32 = arith.constant 1 : i32
    %9 = arith.addi %8, %c1_i32 : i32
    %10 = arith.index_cast %9 : i32 to index
    %11 = memref.load %arg1[%10] : memref<64xi32, #tpu.memory_space<smem>>
    %c1_i32_5 = arith.constant 1 : i32
    %c0_i32_6 = arith.constant 0 : i32
    %12 = tpu.memref_slice %arg2[%11, %c0_i32_6] : memref<32x32xf32, #tpu.memory_space<any>> -> memref<1x32xf32, #tpu.memory_space<any>>
    %c1_i32_7 = arith.constant 1 : i32
    %c0_i32_8 = arith.constant 0 : i32
    %13 = tpu.memref_slice %arg4[%c1_i32_7, %c0_i32_8] : memref<8x32xf32, #tpu.memory_space<vmem>> -> memref<1x32xf32, #tpu.memory_space<vmem>>
    %14 = tpu.memref_slice %arg5[%c1_i32_5] : memref<8x!tpu.dma_semaphore, #tpu.memory_space<semaphore_mem>> -> memref<1x!tpu.dma_semaphore, #tpu.memory_space<semaphore_mem>>
    %15 = tpu.memref_squeeze %14 : memref<1x!tpu.dma_semaphore, #tpu.memory_space<semaphore_mem>> -> memref<!tpu.dma_semaphore, #tpu.memory_space<semaphore_mem>>
    tpu.enqueue_dma source(%12 : memref<1x32xf32, #tpu.memory_space<any>>) target(%13 : memref<1x32xf32, #tpu.memory_space<vmem>>) target_semaphore(%15 : memref<!tpu.dma_semaphore, #tpu.memory_space<semaphore_mem>>)
    %c8_i32_9 = arith.constant 8 : i32
    %16 = arith.muli %arg0, %c8_i32_9 : i32
    %c2_i32 = arith.constant 2 : i32
    %17 = arith.addi %16, %c2_i32 : i32
    %18 = arith.index_cast %17 : i32 to index
    %19 = memref.load %arg1[%18] : memref<64xi32, #tpu.memory_space<smem>>
    %c2_i32_10 = arith.constant 2 : i32
    %c0_i32_11 = arith.constant 0 : i32
    %20 = tpu.memref_slice %arg2[%19, %c0_i32_11] : memref<32x32xf32, #tpu.memory_space<any>> -> memref<1x32xf32, #tpu.memory_space<any>>
    %c2_i32_12 = arith.constant 2 : i32
    %c0_i32_13 = arith.constant 0 : i32
    %21 = tpu.memref_slice %arg4[%c2_i32_12, %c0_i32_13] : memref<8x32xf32, #tpu.memory_space<vmem>> -> memref<1x32xf32, #tpu.memory_space<vmem>>
    %22 = tpu.memref_slice %arg5[%c2_i32_10] : memref<8x!tpu.dma_semaphore, #tpu.memory_space<semaphore_mem>> -> memref<1x!tpu.dma_semaphore, #tpu.memory_space<semaphore_mem>>
    %23 = tpu.memref_squeeze %22 : memref<1x!tpu.dma_semaphore, #tpu.memory_space<semaphore_mem>> -> memref<!tpu.dma_semaphore, #tpu.memory_space<semaphore_mem>>
    tpu.enqueue_dma source(%20 : memref<1x32xf32, #tpu.memory_space<any>>) target(%21 : memref<1x32xf32, #tpu.memory_space<vmem>>) target_semaphore(%23 : memref<!tpu.dma_semaphore, #tpu.memory_space<semaphore_mem>>)
    %c8_i32_14 = arith.constant 8 : i32
    %24 = arith.muli %arg0, %c8_i32_14 : i32
    %c3_i32 = arith.constant 3 : i32
    %25 = arith.addi %24, %c3_i32 : i32
    %26 = arith.index_cast %25 : i32 to index
    %27 = memref.load %arg1[%26] : memref<64xi32, #tpu.memory_space<smem>>
    %c3_i32_15 = arith.constant 3 : i32
    %c0_i32_16 = arith.constant 0 : i32
    %28 = tpu.memref_slice %arg2[%27, %c0_i32_16] : memref<32x32xf32, #tpu.memory_space<any>> -> memref<1x32xf32, #tpu.memory_space<any>>
    %c3_i32_17 = arith.constant 3 : i32
    %c0_i32_18 = arith.constant 0 : i32
    %29 = tpu.memref_slice %arg4[%c3_i32_17, %c0_i32_18] : memref<8x32xf32, #tpu.memory_space<vmem>> -> memref<1x32xf32, #tpu.memory_space<vmem>>
    %30 = tpu.memref_slice %arg5[%c3_i32_15] : memref<8x!tpu.dma_semaphore, #tpu.memory_space<semaphore_mem>> -> memref<1x!tpu.dma_semaphore, #tpu.memory_space<semaphore_mem>>
    %31 = tpu.memref_squeeze %30 : memref<1x!tpu.dma_semaphore, #tpu.memory_space<semaphore_mem>> -> memref<!tpu.dma_semaphore, #tpu.memory_space<semaphore_mem>>
    tpu.enqueue_dma source(%28 : memref<1x32xf32, #tpu.memory_space<any>>) target(%29 : memref<1x32xf32, #tpu.memory_space<vmem>>) target_semaphore(%31 : memref<!tpu.dma_semaphore, #tpu.memory_space<semaphore_mem>>)
    %c8_i32_19 = arith.constant 8 : i32
    %32 = arith.muli %arg0, %c8_i32_19 : i32
    %c4_i32 = arith.constant 4 : i32
    %33 = arith.addi %32, %c4_i32 : i32
    %34 = arith.index_cast %33 : i32 to index
    %35 = memref.load %arg1[%34] : memref<64xi32, #tpu.memory_space<smem>>
    %c4_i32_20 = arith.constant 4 : i32
    %c0_i32_21 = arith.constant 0 : i32
    %36 = tpu.memref_slice %arg2[%35, %c0_i32_21] : memref<32x32xf32, #tpu.memory_space<any>> -> memref<1x32xf32, #tpu.memory_space<any>>
    %c4_i32_22 = arith.constant 4 : i32
    %c0_i32_23 = arith.constant 0 : i32
    %37 = tpu.memref_slice %arg4[%c4_i32_22, %c0_i32_23] : memref<8x32xf32, #tpu.memory_space<vmem>> -> memref<1x32xf32, #tpu.memory_space<vmem>>
    %38 = tpu.memref_slice %arg5[%c4_i32_20] : memref<8x!tpu.dma_semaphore, #tpu.memory_space<semaphore_mem>> -> memref<1x!tpu.dma_semaphore, #tpu.memory_space<semaphore_mem>>
    %39 = tpu.memref_squeeze %38 : memref<1x!tpu.dma_semaphore, #tpu.memory_space<semaphore_mem>> -> memref<!tpu.dma_semaphore, #tpu.memory_space<semaphore_mem>>
    tpu.enqueue_dma source(%36 : memref<1x32xf32, #tpu.memory_space<any>>) target(%37 : memref<1x32xf32, #tpu.memory_space<vmem>>) target_semaphore(%39 : memref<!tpu.dma_semaphore, #tpu.memory_space<semaphore_mem>>)
    %c8_i32_24 = arith.constant 8 : i32
    %40 = arith.muli %arg0, %c8_i32_24 : i32
    %c5_i32 = arith.constant 5 : i32
    %41 = arith.addi %40, %c5_i32 : i32
    %42 = arith.index_cast %41 : i32 to index
    %43 = memref.load %arg1[%42] : memref<64xi32, #tpu.memory_space<smem>>
    %c5_i32_25 = arith.constant 5 : i32
    %c0_i32_26 = arith.constant 0 : i32
    %44 = tpu.memref_slice %arg2[%43, %c0_i32_26] : memref<32x32xf32, #tpu.memory_space<any>> -> memref<1x32xf32, #tpu.memory_space<any>>
    %c5_i32_27 = arith.constant 5 : i32
    %c0_i32_28 = arith.constant 0 : i32
    %45 = tpu.memref_slice %arg4[%c5_i32_27, %c0_i32_28] : memref<8x32xf32, #tpu.memory_space<vmem>> -> memref<1x32xf32, #tpu.memory_space<vmem>>
    %46 = tpu.memref_slice %arg5[%c5_i32_25] : memref<8x!tpu.dma_semaphore, #tpu.memory_space<semaphore_mem>> -> memref<1x!tpu.dma_semaphore, #tpu.memory_space<semaphore_mem>>
    %47 = tpu.memref_squeeze %46 : memref<1x!tpu.dma_semaphore, #tpu.memory_space<semaphore_mem>> -> memref<!tpu.dma_semaphore, #tpu.memory_space<semaphore_mem>>
    tpu.enqueue_dma source(%44 : memref<1x32xf32, #tpu.memory_space<any>>) target(%45 : memref<1x32xf32, #tpu.memory_space<vmem>>) target_semaphore(%47 : memref<!tpu.dma_semaphore, #tpu.memory_space<semaphore_mem>>)
    %c8_i32_29 = arith.constant 8 : i32
    %48 = arith.muli %arg0, %c8_i32_29 : i32
    %c6_i32 = arith.constant 6 : i32
    %49 = arith.addi %48, %c6_i32 : i32
    %50 = arith.index_cast %49 : i32 to index
    %51 = memref.load %arg1[%50] : memref<64xi32, #tpu.memory_space<smem>>
    %c6_i32_30 = arith.constant 6 : i32
    %c0_i32_31 = arith.constant 0 : i32
    %52 = tpu.memref_slice %arg2[%51, %c0_i32_31] : memref<32x32xf32, #tpu.memory_space<any>> -> memref<1x32xf32, #tpu.memory_space<any>>
    %c6_i32_32 = arith.constant 6 : i32
    %c0_i32_33 = arith.constant 0 : i32
    %53 = tpu.memref_slice %arg4[%c6_i32_32, %c0_i32_33] : memref<8x32xf32, #tpu.memory_space<vmem>> -> memref<1x32xf32, #tpu.memory_space<vmem>>
    %54 = tpu.memref_slice %arg5[%c6_i32_30] : memref<8x!tpu.dma_semaphore, #tpu.memory_space<semaphore_mem>> -> memref<1x!tpu.dma_semaphore, #tpu.memory_space<semaphore_mem>>
    %55 = tpu.memref_squeeze %54 : memref<1x!tpu.dma_semaphore, #tpu.memory_space<semaphore_mem>> -> memref<!tpu.dma_semaphore, #tpu.memory_space<semaphore_mem>>
    tpu.enqueue_dma source(%52 : memref<1x32xf32, #tpu.memory_space<any>>) target(%53 : memref<1x32xf32, #tpu.memory_space<vmem>>) target_semaphore(%55 : memref<!tpu.dma_semaphore, #tpu.memory_space<semaphore_mem>>)
    %c8_i32_34 = arith.constant 8 : i32
    %56 = arith.muli %arg0, %c8_i32_34 : i32
    %c7_i32 = arith.constant 7 : i32
    %57 = arith.addi %56, %c7_i32 : i32
    %58 = arith.index_cast %57 : i32 to index
    %59 = memref.load %arg1[%58] : memref<64xi32, #tpu.memory_space<smem>>
    %c7_i32_35 = arith.constant 7 : i32
    %c0_i32_36 = arith.constant 0 : i32
    %60 = tpu.memref_slice %arg2[%59, %c0_i32_36] : memref<32x32xf32, #tpu.memory_space<any>> -> memref<1x32xf32, #tpu.memory_space<any>>
    %c7_i32_37 = arith.constant 7 : i32
    %c0_i32_38 = arith.constant 0 : i32
    %61 = tpu.memref_slice %arg4[%c7_i32_37, %c0_i32_38] : memref<8x32xf32, #tpu.memory_space<vmem>> -> memref<1x32xf32, #tpu.memory_space<vmem>>
    %62 = tpu.memref_slice %arg5[%c7_i32_35] : memref<8x!tpu.dma_semaphore, #tpu.memory_space<semaphore_mem>> -> memref<1x!tpu.dma_semaphore, #tpu.memory_space<semaphore_mem>>
    %63 = tpu.memref_squeeze %62 : memref<1x!tpu.dma_semaphore, #tpu.memory_space<semaphore_mem>> -> memref<!tpu.dma_semaphore, #tpu.memory_space<semaphore_mem>>
    tpu.enqueue_dma source(%60 : memref<1x32xf32, #tpu.memory_space<any>>) target(%61 : memref<1x32xf32, #tpu.memory_space<vmem>>) target_semaphore(%63 : memref<!tpu.dma_semaphore, #tpu.memory_space<semaphore_mem>>)
    %c0_i32_39 = arith.constant 0 : i32
    %c0_i32_40 = arith.constant 0 : i32
    %c0_i32_41 = arith.constant 0 : i32
    %64 = tpu.memref_slice %arg2[%c0_i32_40, %c0_i32_41] : memref<32x32xf32, #tpu.memory_space<any>> -> memref<1x32xf32, #tpu.memory_space<any>>
    %c0_i32_42 = arith.constant 0 : i32
    %c0_i32_43 = arith.constant 0 : i32
    %65 = tpu.memref_slice %arg4[%c0_i32_42, %c0_i32_43] : memref<8x32xf32, #tpu.memory_space<vmem>> -> memref<1x32xf32, #tpu.memory_space<vmem>>
    %66 = tpu.memref_slice %arg5[%c0_i32_39] : memref<8x!tpu.dma_semaphore, #tpu.memory_space<semaphore_mem>> -> memref<1x!tpu.dma_semaphore, #tpu.memory_space<semaphore_mem>>
    %67 = tpu.memref_squeeze %66 : memref<1x!tpu.dma_semaphore, #tpu.memory_space<semaphore_mem>> -> memref<!tpu.dma_semaphore, #tpu.memory_space<semaphore_mem>>
    tpu.wait_dma2 semaphore(%67 : memref<!tpu.dma_semaphore, #tpu.memory_space<semaphore_mem>>) src(%64 : memref<1x32xf32, #tpu.memory_space<any>>) dst(%65 : memref<1x32xf32, #tpu.memory_space<vmem>>)
    %c1_i32_44 = arith.constant 1 : i32
    %c0_i32_45 = arith.constant 0 : i32
    %c0_i32_46 = arith.constant 0 : i32
    %68 = tpu.memref_slice %arg2[%c0_i32_45, %c0_i32_46] : memref<32x32xf32, #tpu.memory_space<any>> -> memref<1x32xf32, #tpu.memory_space<any>>
    %c1_i32_47 = arith.constant 1 : i32
    %c0_i32_48 = arith.constant 0 : i32
    %69 = tpu.memref_slice %arg4[%c1_i32_47, %c0_i32_48] : memref<8x32xf32, #tpu.memory_space<vmem>> -> memref<1x32xf32, #tpu.memory_space<vmem>>
    %70 = tpu.memref_slice %arg5[%c1_i32_44] : memref<8x!tpu.dma_semaphore, #tpu.memory_space<semaphore_mem>> -> memref<1x!tpu.dma_semaphore, #tpu.memory_space<semaphore_mem>>
    %71 = tpu.memref_squeeze %70 : memref<1x!tpu.dma_semaphore, #tpu.memory_space<semaphore_mem>> -> memref<!tpu.dma_semaphore, #tpu.memory_space<semaphore_mem>>
    tpu.wait_dma2 semaphore(%71 : memref<!tpu.dma_semaphore, #tpu.memory_space<semaphore_mem>>) src(%68 : memref<1x32xf32, #tpu.memory_space<any>>) dst(%69 : memref<1x32xf32, #tpu.memory_space<vmem>>)
    %c2_i32_49 = arith.constant 2 : i32
    %c0_i32_50 = arith.constant 0 : i32
    %c0_i32_51 = arith.constant 0 : i32
    %72 = tpu.memref_slice %arg2[%c0_i32_50, %c0_i32_51] : memref<32x32xf32, #tpu.memory_space<any>> -> memref<1x32xf32, #tpu.memory_space<any>>
    %c2_i32_52 = arith.constant 2 : i32
    %c0_i32_53 = arith.constant 0 : i32
    %73 = tpu.memref_slice %arg4[%c2_i32_52, %c0_i32_53] : memref<8x32xf32, #tpu.memory_space<vmem>> -> memref<1x32xf32, #tpu.memory_space<vmem>>
    %74 = tpu.memref_slice %arg5[%c2_i32_49] : memref<8x!tpu.dma_semaphore, #tpu.memory_space<semaphore_mem>> -> memref<1x!tpu.dma_semaphore, #tpu.memory_space<semaphore_mem>>
    %75 = tpu.memref_squeeze %74 : memref<1x!tpu.dma_semaphore, #tpu.memory_space<semaphore_mem>> -> memref<!tpu.dma_semaphore, #tpu.memory_space<semaphore_mem>>
    tpu.wait_dma2 semaphore(%75 : memref<!tpu.dma_semaphore, #tpu.memory_space<semaphore_mem>>) src(%72 : memref<1x32xf32, #tpu.memory_space<any>>) dst(%73 : memref<1x32xf32, #tpu.memory_space<vmem>>)
    %c3_i32_54 = arith.constant 3 : i32
    %c0_i32_55 = arith.constant 0 : i32
    %c0_i32_56 = arith.constant 0 : i32
    %76 = tpu.memref_slice %arg2[%c0_i32_55, %c0_i32_56] : memref<32x32xf32, #tpu.memory_space<any>> -> memref<1x32xf32, #tpu.memory_space<any>>
    %c3_i32_57 = arith.constant 3 : i32
    %c0_i32_58 = arith.constant 0 : i32
    %77 = tpu.memref_slice %arg4[%c3_i32_57, %c0_i32_58] : memref<8x32xf32, #tpu.memory_space<vmem>> -> memref<1x32xf32, #tpu.memory_space<vmem>>
    %78 = tpu.memref_slice %arg5[%c3_i32_54] : memref<8x!tpu.dma_semaphore, #tpu.memory_space<semaphore_mem>> -> memref<1x!tpu.dma_semaphore, #tpu.memory_space<semaphore_mem>>
    %79 = tpu.memref_squeeze %78 : memref<1x!tpu.dma_semaphore, #tpu.memory_space<semaphore_mem>> -> memref<!tpu.dma_semaphore, #tpu.memory_space<semaphore_mem>>
    tpu.wait_dma2 semaphore(%79 : memref<!tpu.dma_semaphore, #tpu.memory_space<semaphore_mem>>) src(%76 : memref<1x32xf32, #tpu.memory_space<any>>) dst(%77 : memref<1x32xf32, #tpu.memory_space<vmem>>)
    %c4_i32_59 = arith.constant 4 : i32
    %c0_i32_60 = arith.constant 0 : i32
    %c0_i32_61 = arith.constant 0 : i32
    %80 = tpu.memref_slice %arg2[%c0_i32_60, %c0_i32_61] : memref<32x32xf32, #tpu.memory_space<any>> -> memref<1x32xf32, #tpu.memory_space<any>>
    %c4_i32_62 = arith.constant 4 : i32
    %c0_i32_63 = arith.constant 0 : i32
    %81 = tpu.memref_slice %arg4[%c4_i32_62, %c0_i32_63] : memref<8x32xf32, #tpu.memory_space<vmem>> -> memref<1x32xf32, #tpu.memory_space<vmem>>
    %82 = tpu.memref_slice %arg5[%c4_i32_59] : memref<8x!tpu.dma_semaphore, #tpu.memory_space<semaphore_mem>> -> memref<1x!tpu.dma_semaphore, #tpu.memory_space<semaphore_mem>>
    %83 = tpu.memref_squeeze %82 : memref<1x!tpu.dma_semaphore, #tpu.memory_space<semaphore_mem>> -> memref<!tpu.dma_semaphore, #tpu.memory_space<semaphore_mem>>
    tpu.wait_dma2 semaphore(%83 : memref<!tpu.dma_semaphore, #tpu.memory_space<semaphore_mem>>) src(%80 : memref<1x32xf32, #tpu.memory_space<any>>) dst(%81 : memref<1x32xf32, #tpu.memory_space<vmem>>)
    %c5_i32_64 = arith.constant 5 : i32
    %c0_i32_65 = arith.constant 0 : i32
    %c0_i32_66 = arith.constant 0 : i32
    %84 = tpu.memref_slice %arg2[%c0_i32_65, %c0_i32_66] : memref<32x32xf32, #tpu.memory_space<any>> -> memref<1x32xf32, #tpu.memory_space<any>>
    %c5_i32_67 = arith.constant 5 : i32
    %c0_i32_68 = arith.constant 0 : i32
    %85 = tpu.memref_slice %arg4[%c5_i32_67, %c0_i32_68] : memref<8x32xf32, #tpu.memory_space<vmem>> -> memref<1x32xf32, #tpu.memory_space<vmem>>
    %86 = tpu.memref_slice %arg5[%c5_i32_64] : memref<8x!tpu.dma_semaphore, #tpu.memory_space<semaphore_mem>> -> memref<1x!tpu.dma_semaphore, #tpu.memory_space<semaphore_mem>>
    %87 = tpu.memref_squeeze %86 : memref<1x!tpu.dma_semaphore, #tpu.memory_space<semaphore_mem>> -> memref<!tpu.dma_semaphore, #tpu.memory_space<semaphore_mem>>
    tpu.wait_dma2 semaphore(%87 : memref<!tpu.dma_semaphore, #tpu.memory_space<semaphore_mem>>) src(%84 : memref<1x32xf32, #tpu.memory_space<any>>) dst(%85 : memref<1x32xf32, #tpu.memory_space<vmem>>)
    %c6_i32_69 = arith.constant 6 : i32
    %c0_i32_70 = arith.constant 0 : i32
    %c0_i32_71 = arith.constant 0 : i32
    %88 = tpu.memref_slice %arg2[%c0_i32_70, %c0_i32_71] : memref<32x32xf32, #tpu.memory_space<any>> -> memref<1x32xf32, #tpu.memory_space<any>>
    %c6_i32_72 = arith.constant 6 : i32
    %c0_i32_73 = arith.constant 0 : i32
    %89 = tpu.memref_slice %arg4[%c6_i32_72, %c0_i32_73] : memref<8x32xf32, #tpu.memory_space<vmem>> -> memref<1x32xf32, #tpu.memory_space<vmem>>
    %90 = tpu.memref_slice %arg5[%c6_i32_69] : memref<8x!tpu.dma_semaphore, #tpu.memory_space<semaphore_mem>> -> memref<1x!tpu.dma_semaphore, #tpu.memory_space<semaphore_mem>>
    %91 = tpu.memref_squeeze %90 : memref<1x!tpu.dma_semaphore, #tpu.memory_space<semaphore_mem>> -> memref<!tpu.dma_semaphore, #tpu.memory_space<semaphore_mem>>
    tpu.wait_dma2 semaphore(%91 : memref<!tpu.dma_semaphore, #tpu.memory_space<semaphore_mem>>) src(%88 : memref<1x32xf32, #tpu.memory_space<any>>) dst(%89 : memref<1x32xf32, #tpu.memory_space<vmem>>)
    %c7_i32_74 = arith.constant 7 : i32
    %c0_i32_75 = arith.constant 0 : i32
    %c0_i32_76 = arith.constant 0 : i32
    %92 = tpu.memref_slice %arg2[%c0_i32_75, %c0_i32_76] : memref<32x32xf32, #tpu.memory_space<any>> -> memref<1x32xf32, #tpu.memory_space<any>>
    %c7_i32_77 = arith.constant 7 : i32
    %c0_i32_78 = arith.constant 0 : i32
    %93 = tpu.memref_slice %arg4[%c7_i32_77, %c0_i32_78] : memref<8x32xf32, #tpu.memory_space<vmem>> -> memref<1x32xf32, #tpu.memory_space<vmem>>
    %94 = tpu.memref_slice %arg5[%c7_i32_74] : memref<8x!tpu.dma_semaphore, #tpu.memory_space<semaphore_mem>> -> memref<1x!tpu.dma_semaphore, #tpu.memory_space<semaphore_mem>>
    %95 = tpu.memref_squeeze %94 : memref<1x!tpu.dma_semaphore, #tpu.memory_space<semaphore_mem>> -> memref<!tpu.dma_semaphore, #tpu.memory_space<semaphore_mem>>
    tpu.wait_dma2 semaphore(%95 : memref<!tpu.dma_semaphore, #tpu.memory_space<semaphore_mem>>) src(%92 : memref<1x32xf32, #tpu.memory_space<any>>) dst(%93 : memref<1x32xf32, #tpu.memory_space<vmem>>)
    %c0 = arith.constant 0 : index
    %c0_79 = arith.constant 0 : index
    %96 = vector.load %arg4[%c0, %c0_79] : memref<8x32xf32, #tpu.memory_space<vmem>>, vector<8x32xf32>
    %c0_80 = arith.constant 0 : index
    %c0_81 = arith.constant 0 : index
    %97 = vector.load %arg3[%c0_80, %c0_81] : memref<8x32xf32, #tpu.memory_space<vmem>>, vector<8x32xf32>
    tpu.vector_store %arg3[%c0_80, %c0_81], %96 {strides = array<i32>} : memref<8x32xf32, #tpu.memory_space<vmem>>, vector<8x32xf32>,
    return
  }
  func.func @transform_1(%arg0: i32, %arg1: memref<64xi32, #tpu.memory_space<smem>>) -> (i32, i32) {
    %c0_i32 = arith.constant 0 : i32
    %c0_i32_0 = arith.constant 0 : i32
    return %arg0, %c0_i32 : i32, i32
  }
}

module attributes {stable_mosaic.version = 11 : i64} {
  func.func @_lstm_dir_kernel(%arg0: i32, %arg1: i32, %arg2: memref<16x32xf32, #tpu.memory_space<vmem>>, %arg3: memref<1x32x512xbf16, #tpu.memory_space<vmem>>, %arg4: memref<1x128x512xbf16, #tpu.memory_space<vmem>>, %arg5: memref<1x1x512xf32, #tpu.memory_space<vmem>>, %arg6: memref<16x128xf32, #tpu.memory_space<vmem>>, %arg7: memref<1x8x128xf32, #tpu.memory_space<vmem>>, %arg8: memref<1x8x128xf32, #tpu.memory_space<vmem>>, %arg9: memref<16x512xf32, #tpu.memory_space<vmem>>, %arg10: memref<8x128xf32, #tpu.memory_space<vmem>>, %arg11: memref<8x128xf32, #tpu.memory_space<vmem>>) attributes {dimension_semantics = [#tpu.dimension_semantics<parallel>, #tpu.dimension_semantics<arbitrary>], iteration_bounds = array<i64: 2, 4>, scalar_prefetch = 0 : i64, scratch_operands = 3 : i64, tpu.core_type = #tpu.core_type<tc>, window_params = [{transform_indices = @transform_0, window_bounds = array<i64: 16, 32>}, {transform_indices = @transform_1, window_bounds = array<i64: 1, 32, 512>}, {transform_indices = @transform_2, window_bounds = array<i64: 1, 128, 512>}, {transform_indices = @transform_3, window_bounds = array<i64: 1, 1, 512>}, {transform_indices = @transform_4, window_bounds = array<i64: 16, 128>}, {transform_indices = @transform_5, window_bounds = array<i64: 1, 8, 128>}, {transform_indices = @transform_6, window_bounds = array<i64: 1, 8, 128>}]} {
    %c0_i32 = arith.constant 0 : i32
    %0 = arith.cmpi eq, %arg1, %c0_i32 : i32
    %1 = arith.extui %0 : i1 to i32
    %c0_i32_0 = arith.constant 0 : i32
    %2 = arith.cmpi ne, %1, %c0_i32_0 : i32
    scf.if %2 {
      %cst_51 = arith.constant 0.000000e+00 : f32
      %106 = vector.broadcast %cst_51 : f32 to vector<8x128xf32>
      %c0_52 = arith.constant 0 : index
      %c0_53 = arith.constant 0 : index
      %107 = vector.load %arg10[%c0_52, %c0_53] : memref<8x128xf32, #tpu.memory_space<vmem>>, vector<8x128xf32>
      tpu.vector_store %arg10[%c0_52, %c0_53], %106 {strides = array<i32>} : memref<8x128xf32, #tpu.memory_space<vmem>>, vector<8x128xf32>,
      %cst_54 = arith.constant 0.000000e+00 : f32
      %108 = vector.broadcast %cst_54 : f32 to vector<8x128xf32>
      %c0_55 = arith.constant 0 : index
      %c0_56 = arith.constant 0 : index
      %109 = vector.load %arg11[%c0_55, %c0_56] : memref<8x128xf32, #tpu.memory_space<vmem>>, vector<8x128xf32>
      tpu.vector_store %arg11[%c0_55, %c0_56], %108 {strides = array<i32>} : memref<8x128xf32, #tpu.memory_space<vmem>>, vector<8x128xf32>,
    } else {
    }
    %c0 = arith.constant 0 : index
    %c0_1 = arith.constant 0 : index
    %3 = vector.load %arg2[%c0, %c0_1] : memref<16x32xf32, #tpu.memory_space<vmem>>, vector<16x32xf32>
    %4 = arith.truncf %3 : vector<16x32xf32> to vector<16x32xbf16>
    %c0_2 = arith.constant 0 : index
    %c0_3 = arith.constant 0 : index
    %c0_4 = arith.constant 0 : index
    %5 = vector.load %arg3[%c0_2, %c0_3, %c0_4] : memref<1x32x512xbf16, #tpu.memory_space<vmem>>, vector<1x32x512xbf16>
    %6 = vector.shape_cast %5 : vector<1x32x512xbf16> to vector<32x512xbf16>
    %cst = arith.constant dense<0.000000e+00> : vector<16x512xf32>
    %7 = tpu.matmul %4, %6, %cst {dimension_numbers = #tpu.dot_dimension_numbers<[1], [0], [0], [1], [0, 0, 1, 1], [], []>} : vector<16x32xbf16>, vector<32x512xbf16>, vector<16x512xf32> -> vector<16x512xf32>
    %c0_5 = arith.constant 0 : index
    %c0_6 = arith.constant 0 : index
    %c0_7 = arith.constant 0 : index
    %8 = vector.load %arg5[%c0_5, %c0_6, %c0_7] : memref<1x1x512xf32, #tpu.memory_space<vmem>>, vector<1x1x512xf32>
    %9 = vector.shape_cast %8 : vector<1x1x512xf32> to vector<1x512xf32>
    %10 = vector.broadcast %9 : vector<1x512xf32> to vector<16x512xf32>
    %11 = arith.addf %7, %10 : vector<16x512xf32>
    %c0_8 = arith.constant 0 : index
    %c0_9 = arith.constant 0 : index
    %12 = vector.load %arg9[%c0_8, %c0_9] : memref<16x512xf32, #tpu.memory_space<vmem>>, vector<16x512xf32>
    tpu.vector_store %arg9[%c0_8, %c0_9], %11 {strides = array<i32>} : memref<16x512xf32, #tpu.memory_space<vmem>>, vector<16x512xf32>,
    %c0_i32_10 = arith.constant 0 : i32
    %c1_i32 = arith.constant 1 : i32
    %13 = arith.subi %c1_i32, %arg0 : i32
    %14 = arith.muli %13, %c0_i32_10 : i32
    %c1_i32_11 = arith.constant 1 : i32
    %15 = arith.subi %c1_i32_11, %c0_i32_10 : i32
    %16 = arith.muli %arg0, %15 : i32
    %17 = arith.addi %14, %16 : i32
    %c8_i32 = arith.constant 8 : i32
    %18 = arith.muli %17, %c8_i32 : i32
    %19 = tpu.assume_multiple %18, 8 : i32
    %20 = arith.index_cast %19 : i32 to index
    %c0_12 = arith.constant 0 : index
    %21 = vector.load %arg9[%20, %c0_12] : memref<16x512xf32, #tpu.memory_space<vmem>>, vector<8x512xf32>
    %c0_13 = arith.constant 0 : index
    %c0_14 = arith.constant 0 : index
    %22 = vector.load %arg10[%c0_13, %c0_14] : memref<8x128xf32, #tpu.memory_space<vmem>>, vector<8x128xf32>
    %23 = arith.truncf %22 : vector<8x128xf32> to vector<8x128xbf16>
    %c0_15 = arith.constant 0 : index
    %c0_16 = arith.constant 0 : index
    %c0_17 = arith.constant 0 : index
    %24 = vector.load %arg4[%c0_15, %c0_16, %c0_17] : memref<1x128x512xbf16, #tpu.memory_space<vmem>>, vector<1x128x512xbf16>
    %25 = vector.shape_cast %24 : vector<1x128x512xbf16> to vector<128x512xbf16>
    %cst_18 = arith.constant dense<0.000000e+00> : vector<8x512xf32>
    %26 = tpu.matmul %23, %25, %cst_18 {dimension_numbers = #tpu.dot_dimension_numbers<[1], [0], [0], [1], [0, 0, 1, 1], [], []>} : vector<8x128xbf16>, vector<128x512xbf16>, vector<8x512xf32> -> vector<8x512xf32>
    %27 = arith.addf %21, %26 : vector<8x512xf32>
    %28 = vector.extract_strided_slice %27 {offsets = [0, 0], sizes = [8, 128], strides = [1, 1]} : vector<8x512xf32> to vector<8x128xf32>
    %29 = arith.negf %28 : vector<8x128xf32>
    %30 = math.exp %29 : vector<8x128xf32>
    %cst_19 = arith.constant 1.000000e+00 : f32
    %31 = vector.broadcast %cst_19 : f32 to vector<8x128xf32>
    %32 = arith.addf %31, %30 : vector<8x128xf32>
    %33 = arith.divf %31, %32 : vector<8x128xf32>
    %34 = vector.extract_strided_slice %27 {offsets = [0, 128], sizes = [8, 128], strides = [1, 1]} : vector<8x512xf32> to vector<8x128xf32>
    %35 = arith.negf %34 : vector<8x128xf32>
    %36 = math.exp %35 : vector<8x128xf32>
    %cst_20 = arith.constant 1.000000e+00 : f32
    %37 = vector.broadcast %cst_20 : f32 to vector<8x128xf32>
    %38 = arith.addf %37, %36 : vector<8x128xf32>
    %39 = arith.divf %37, %38 : vector<8x128xf32>
    %40 = vector.extract_strided_slice %27 {offsets = [0, 256], sizes = [8, 128], strides = [1, 1]} : vector<8x512xf32> to vector<8x128xf32>
    %41 = math.tanh %40 : vector<8x128xf32>
    %42 = vector.extract_strided_slice %27 {offsets = [0, 384], sizes = [8, 128], strides = [1, 1]} : vector<8x512xf32> to vector<8x128xf32>
    %43 = arith.negf %42 : vector<8x128xf32>
    %44 = math.exp %43 : vector<8x128xf32>
    %cst_21 = arith.constant 1.000000e+00 : f32
    %45 = vector.broadcast %cst_21 : f32 to vector<8x128xf32>
    %46 = arith.addf %45, %44 : vector<8x128xf32>
    %47 = arith.divf %45, %46 : vector<8x128xf32>
    %c0_22 = arith.constant 0 : index
    %c0_23 = arith.constant 0 : index
    %48 = vector.load %arg11[%c0_22, %c0_23] : memref<8x128xf32, #tpu.memory_space<vmem>>, vector<8x128xf32>
    %49 = arith.mulf %39, %48 : vector<8x128xf32>
    %50 = arith.mulf %33, %41 : vector<8x128xf32>
    %51 = arith.addf %49, %50 : vector<8x128xf32>
    %52 = math.tanh %51 : vector<8x128xf32>
    %53 = arith.mulf %47, %52 : vector<8x128xf32>
    %c0_24 = arith.constant 0 : index
    %c0_25 = arith.constant 0 : index
    %54 = vector.load %arg10[%c0_24, %c0_25] : memref<8x128xf32, #tpu.memory_space<vmem>>, vector<8x128xf32>
    tpu.vector_store %arg10[%c0_24, %c0_25], %53 {strides = array<i32>} : memref<8x128xf32, #tpu.memory_space<vmem>>, vector<8x128xf32>,
    %c0_26 = arith.constant 0 : index
    %c0_27 = arith.constant 0 : index
    %55 = vector.load %arg11[%c0_26, %c0_27] : memref<8x128xf32, #tpu.memory_space<vmem>>, vector<8x128xf32>
    tpu.vector_store %arg11[%c0_26, %c0_27], %51 {strides = array<i32>} : memref<8x128xf32, #tpu.memory_space<vmem>>, vector<8x128xf32>,
    %56 = arith.index_cast %19 : i32 to index
    %c0_28 = arith.constant 0 : index
    %57 = vector.load %arg6[%56, %c0_28] : memref<16x128xf32, #tpu.memory_space<vmem>>, vector<8x128xf32>
    tpu.vector_store %arg6[%56, %c0_28], %53 {strides = array<i32>} : memref<16x128xf32, #tpu.memory_space<vmem>>, vector<8x128xf32>,
    %c1_i32_29 = arith.constant 1 : i32
    %c1_i32_30 = arith.constant 1 : i32
    %58 = arith.subi %c1_i32_30, %arg0 : i32
    %59 = arith.muli %58, %c1_i32_29 : i32
    %c1_i32_31 = arith.constant 1 : i32
    %60 = arith.subi %c1_i32_31, %c1_i32_29 : i32
    %61 = arith.muli %arg0, %60 : i32
    %62 = arith.addi %59, %61 : i32
    %c8_i32_32 = arith.constant 8 : i32
    %63 = arith.muli %62, %c8_i32_32 : i32
    %64 = tpu.assume_multiple %63, 8 : i32
    %65 = arith.index_cast %64 : i32 to index
    %c0_33 = arith.constant 0 : index
    %66 = vector.load %arg9[%65, %c0_33] : memref<16x512xf32, #tpu.memory_space<vmem>>, vector<8x512xf32>
    %c0_34 = arith.constant 0 : index
    %c0_35 = arith.constant 0 : index
    %67 = vector.load %arg10[%c0_34, %c0_35] : memref<8x128xf32, #tpu.memory_space<vmem>>, vector<8x128xf32>
    %68 = arith.truncf %67 : vector<8x128xf32> to vector<8x128xbf16>
    %c0_36 = arith.constant 0 : index
    %c0_37 = arith.constant 0 : index
    %c0_38 = arith.constant 0 : index
    %69 = vector.load %arg4[%c0_36, %c0_37, %c0_38] : memref<1x128x512xbf16, #tpu.memory_space<vmem>>, vector<1x128x512xbf16>
    %70 = vector.shape_cast %69 : vector<1x128x512xbf16> to vector<128x512xbf16>
    %cst_39 = arith.constant dense<0.000000e+00> : vector<8x512xf32>
    %71 = tpu.matmul %68, %70, %cst_39 {dimension_numbers = #tpu.dot_dimension_numbers<[1], [0], [0], [1], [0, 0, 1, 1], [], []>} : vector<8x128xbf16>, vector<128x512xbf16>, vector<8x512xf32> -> vector<8x512xf32>
    %72 = arith.addf %66, %71 : vector<8x512xf32>
    %73 = vector.extract_strided_slice %72 {offsets = [0, 0], sizes = [8, 128], strides = [1, 1]} : vector<8x512xf32> to vector<8x128xf32>
    %74 = arith.negf %73 : vector<8x128xf32>
    %75 = math.exp %74 : vector<8x128xf32>
    %cst_40 = arith.constant 1.000000e+00 : f32
    %76 = vector.broadcast %cst_40 : f32 to vector<8x128xf32>
    %77 = arith.addf %76, %75 : vector<8x128xf32>
    %78 = arith.divf %76, %77 : vector<8x128xf32>
    %79 = vector.extract_strided_slice %72 {offsets = [0, 128], sizes = [8, 128], strides = [1, 1]} : vector<8x512xf32> to vector<8x128xf32>
    %80 = arith.negf %79 : vector<8x128xf32>
    %81 = math.exp %80 : vector<8x128xf32>
    %cst_41 = arith.constant 1.000000e+00 : f32
    %82 = vector.broadcast %cst_41 : f32 to vector<8x128xf32>
    %83 = arith.addf %82, %81 : vector<8x128xf32>
    %84 = arith.divf %82, %83 : vector<8x128xf32>
    %85 = vector.extract_strided_slice %72 {offsets = [0, 256], sizes = [8, 128], strides = [1, 1]} : vector<8x512xf32> to vector<8x128xf32>
    %86 = math.tanh %85 : vector<8x128xf32>
    %87 = vector.extract_strided_slice %72 {offsets = [0, 384], sizes = [8, 128], strides = [1, 1]} : vector<8x512xf32> to vector<8x128xf32>
    %88 = arith.negf %87 : vector<8x128xf32>
    %89 = math.exp %88 : vector<8x128xf32>
    %cst_42 = arith.constant 1.000000e+00 : f32
    %90 = vector.broadcast %cst_42 : f32 to vector<8x128xf32>
    %91 = arith.addf %90, %89 : vector<8x128xf32>
    %92 = arith.divf %90, %91 : vector<8x128xf32>
    %c0_43 = arith.constant 0 : index
    %c0_44 = arith.constant 0 : index
    %93 = vector.load %arg11[%c0_43, %c0_44] : memref<8x128xf32, #tpu.memory_space<vmem>>, vector<8x128xf32>
    %94 = arith.mulf %84, %93 : vector<8x128xf32>
    %95 = arith.mulf %78, %86 : vector<8x128xf32>
    %96 = arith.addf %94, %95 : vector<8x128xf32>
    %97 = math.tanh %96 : vector<8x128xf32>
    %98 = arith.mulf %92, %97 : vector<8x128xf32>
    %c0_45 = arith.constant 0 : index
    %c0_46 = arith.constant 0 : index
    %99 = vector.load %arg10[%c0_45, %c0_46] : memref<8x128xf32, #tpu.memory_space<vmem>>, vector<8x128xf32>
    tpu.vector_store %arg10[%c0_45, %c0_46], %98 {strides = array<i32>} : memref<8x128xf32, #tpu.memory_space<vmem>>, vector<8x128xf32>,
    %c0_47 = arith.constant 0 : index
    %c0_48 = arith.constant 0 : index
    %100 = vector.load %arg11[%c0_47, %c0_48] : memref<8x128xf32, #tpu.memory_space<vmem>>, vector<8x128xf32>
    tpu.vector_store %arg11[%c0_47, %c0_48], %96 {strides = array<i32>} : memref<8x128xf32, #tpu.memory_space<vmem>>, vector<8x128xf32>,
    %101 = arith.index_cast %64 : i32 to index
    %c0_49 = arith.constant 0 : index
    %102 = vector.load %arg6[%101, %c0_49] : memref<16x128xf32, #tpu.memory_space<vmem>>, vector<8x128xf32>
    tpu.vector_store %arg6[%101, %c0_49], %98 {strides = array<i32>} : memref<16x128xf32, #tpu.memory_space<vmem>>, vector<8x128xf32>,
    %c2_i32 = arith.constant 2 : i32
    %c3_i32 = arith.constant 3 : i32
    %103 = arith.cmpi eq, %arg1, %c3_i32 : i32
    %104 = arith.extui %103 : i1 to i32
    %c0_i32_50 = arith.constant 0 : i32
    %105 = arith.cmpi ne, %104, %c0_i32_50 : i32
    scf.if %105 {
      %c0_51 = arith.constant 0 : index
      %c0_52 = arith.constant 0 : index
      %106 = vector.load %arg10[%c0_51, %c0_52] : memref<8x128xf32, #tpu.memory_space<vmem>>, vector<8x128xf32>
      %c0_53 = arith.constant 0 : index
      %c0_54 = arith.constant 0 : index
      %c0_55 = arith.constant 0 : index
      %107 = vector.load %arg7[%c0_53, %c0_54, %c0_55] : memref<1x8x128xf32, #tpu.memory_space<vmem>>, vector<1x8x128xf32>
      %108 = vector.shape_cast %107 : vector<1x8x128xf32> to vector<8x128xf32>
      %109 = vector.shape_cast %106 : vector<8x128xf32> to vector<1x8x128xf32>
      tpu.vector_store %arg7[%c0_53, %c0_54, %c0_55], %109 {strides = array<i32>} : memref<1x8x128xf32, #tpu.memory_space<vmem>>, vector<1x8x128xf32>,
      %c0_56 = arith.constant 0 : index
      %c0_57 = arith.constant 0 : index
      %110 = vector.load %arg11[%c0_56, %c0_57] : memref<8x128xf32, #tpu.memory_space<vmem>>, vector<8x128xf32>
      %c0_58 = arith.constant 0 : index
      %c0_59 = arith.constant 0 : index
      %c0_60 = arith.constant 0 : index
      %111 = vector.load %arg8[%c0_58, %c0_59, %c0_60] : memref<1x8x128xf32, #tpu.memory_space<vmem>>, vector<1x8x128xf32>
      %112 = vector.shape_cast %111 : vector<1x8x128xf32> to vector<8x128xf32>
      %113 = vector.shape_cast %110 : vector<8x128xf32> to vector<1x8x128xf32>
      tpu.vector_store %arg8[%c0_58, %c0_59, %c0_60], %113 {strides = array<i32>} : memref<1x8x128xf32, #tpu.memory_space<vmem>>, vector<1x8x128xf32>,
    } else {
    }
    return
  }
  func.func @transform_0(%arg0: i32, %arg1: i32) -> (i32, i32) {
    %c1_i32 = arith.constant 1 : i32
    %0 = arith.subi %c1_i32, %arg0 : i32
    %1 = arith.muli %0, %arg1 : i32
    %c3_i32 = arith.constant 3 : i32
    %2 = arith.subi %c3_i32, %arg1 : i32
    %3 = arith.muli %arg0, %2 : i32
    %4 = arith.addi %1, %3 : i32
    %c0_i32 = arith.constant 0 : i32
    %c0_i32_0 = arith.constant 0 : i32
    return %4, %c0_i32 : i32, i32
  }
  func.func @transform_1(%arg0: i32, %arg1: i32) -> (i32, i32, i32) {
    %c0_i32 = arith.constant 0 : i32
    %c0_i32_0 = arith.constant 0 : i32
    %c0_i32_1 = arith.constant 0 : i32
    return %arg0, %c0_i32, %c0_i32_0 : i32, i32, i32
  }
  func.func @transform_2(%arg0: i32, %arg1: i32) -> (i32, i32, i32) {
    %c0_i32 = arith.constant 0 : i32
    %c0_i32_0 = arith.constant 0 : i32
    %c0_i32_1 = arith.constant 0 : i32
    return %arg0, %c0_i32, %c0_i32_0 : i32, i32, i32
  }
  func.func @transform_3(%arg0: i32, %arg1: i32) -> (i32, i32, i32) {
    %c0_i32 = arith.constant 0 : i32
    %c0_i32_0 = arith.constant 0 : i32
    %c0_i32_1 = arith.constant 0 : i32
    return %arg0, %c0_i32, %c0_i32_0 : i32, i32, i32
  }
  func.func @transform_4(%arg0: i32, %arg1: i32) -> (i32, i32) {
    %c1_i32 = arith.constant 1 : i32
    %0 = arith.subi %c1_i32, %arg0 : i32
    %1 = arith.muli %0, %arg1 : i32
    %c3_i32 = arith.constant 3 : i32
    %2 = arith.subi %c3_i32, %arg1 : i32
    %3 = arith.muli %arg0, %2 : i32
    %4 = arith.addi %1, %3 : i32
    %c0_i32 = arith.constant 0 : i32
    return %4, %arg0 : i32, i32
  }
  func.func @transform_5(%arg0: i32, %arg1: i32) -> (i32, i32, i32) {
    %c0_i32 = arith.constant 0 : i32
    %c0_i32_0 = arith.constant 0 : i32
    %c0_i32_1 = arith.constant 0 : i32
    return %arg0, %c0_i32, %c0_i32_0 : i32, i32, i32
  }
  func.func @transform_6(%arg0: i32, %arg1: i32) -> (i32, i32, i32) {
    %c0_i32 = arith.constant 0 : i32
    %c0_i32_0 = arith.constant 0 : i32
    %c0_i32_1 = arith.constant 0 : i32
    return %arg0, %c0_i32, %c0_i32_0 : i32, i32, i32
  }
}

module attributes {stable_mosaic.version = 11 : i64} {
  func.func @_lstm_dir_kernel(%arg0: i32, %arg1: i32, %arg2: memref<16x256xf32, #tpu.memory_space<vmem>>, %arg3: memref<1x256x512xbf16, #tpu.memory_space<vmem>>, %arg4: memref<1x128x512xbf16, #tpu.memory_space<vmem>>, %arg5: memref<1x1x512xf32, #tpu.memory_space<vmem>>, %arg6: memref<16x128xf32, #tpu.memory_space<vmem>>, %arg7: memref<1x8x128xf32, #tpu.memory_space<vmem>>, %arg8: memref<1x8x128xf32, #tpu.memory_space<vmem>>, %arg9: memref<16x512xf32, #tpu.memory_space<vmem>>, %arg10: memref<8x128xf32, #tpu.memory_space<vmem>>, %arg11: memref<8x128xf32, #tpu.memory_space<vmem>>) attributes {dimension_semantics = [#tpu.dimension_semantics<parallel>, #tpu.dimension_semantics<arbitrary>], iteration_bounds = array<i64: 2, 4>, scalar_prefetch = 0 : i64, scratch_operands = 3 : i64, tpu.core_type = #tpu.core_type<tc>, window_params = [{transform_indices = @transform_0, window_bounds = array<i64: 16, 256>}, {transform_indices = @transform_1, window_bounds = array<i64: 1, 256, 512>}, {transform_indices = @transform_2, window_bounds = array<i64: 1, 128, 512>}, {transform_indices = @transform_3, window_bounds = array<i64: 1, 1, 512>}, {transform_indices = @transform_4, window_bounds = array<i64: 16, 128>}, {transform_indices = @transform_5, window_bounds = array<i64: 1, 8, 128>}, {transform_indices = @transform_6, window_bounds = array<i64: 1, 8, 128>}]} {
    %c0_i32 = arith.constant 0 : i32
    %0 = arith.cmpi eq, %arg1, %c0_i32 : i32
    %1 = arith.extui %0 : i1 to i32
    %c0_i32_0 = arith.constant 0 : i32
    %2 = arith.cmpi ne, %1, %c0_i32_0 : i32
    scf.if %2 {
      %cst_51 = arith.constant 0.000000e+00 : f32
      %106 = vector.broadcast %cst_51 : f32 to vector<8x128xf32>
      %c0_52 = arith.constant 0 : index
      %c0_53 = arith.constant 0 : index
      %107 = vector.load %arg10[%c0_52, %c0_53] : memref<8x128xf32, #tpu.memory_space<vmem>>, vector<8x128xf32>
      tpu.vector_store %arg10[%c0_52, %c0_53], %106 {strides = array<i32>} : memref<8x128xf32, #tpu.memory_space<vmem>>, vector<8x128xf32>,
      %cst_54 = arith.constant 0.000000e+00 : f32
      %108 = vector.broadcast %cst_54 : f32 to vector<8x128xf32>
      %c0_55 = arith.constant 0 : index
      %c0_56 = arith.constant 0 : index
      %109 = vector.load %arg11[%c0_55, %c0_56] : memref<8x128xf32, #tpu.memory_space<vmem>>, vector<8x128xf32>
      tpu.vector_store %arg11[%c0_55, %c0_56], %108 {strides = array<i32>} : memref<8x128xf32, #tpu.memory_space<vmem>>, vector<8x128xf32>,
    } else {
    }
    %c0 = arith.constant 0 : index
    %c0_1 = arith.constant 0 : index
    %3 = vector.load %arg2[%c0, %c0_1] : memref<16x256xf32, #tpu.memory_space<vmem>>, vector<16x256xf32>
    %4 = arith.truncf %3 : vector<16x256xf32> to vector<16x256xbf16>
    %c0_2 = arith.constant 0 : index
    %c0_3 = arith.constant 0 : index
    %c0_4 = arith.constant 0 : index
    %5 = vector.load %arg3[%c0_2, %c0_3, %c0_4] : memref<1x256x512xbf16, #tpu.memory_space<vmem>>, vector<1x256x512xbf16>
    %6 = vector.shape_cast %5 : vector<1x256x512xbf16> to vector<256x512xbf16>
    %cst = arith.constant dense<0.000000e+00> : vector<16x512xf32>
    %7 = tpu.matmul %4, %6, %cst {dimension_numbers = #tpu.dot_dimension_numbers<[1], [0], [0], [1], [0, 0, 1, 1], [], []>} : vector<16x256xbf16>, vector<256x512xbf16>, vector<16x512xf32> -> vector<16x512xf32>
    %c0_5 = arith.constant 0 : index
    %c0_6 = arith.constant 0 : index
    %c0_7 = arith.constant 0 : index
    %8 = vector.load %arg5[%c0_5, %c0_6, %c0_7] : memref<1x1x512xf32, #tpu.memory_space<vmem>>, vector<1x1x512xf32>
    %9 = vector.shape_cast %8 : vector<1x1x512xf32> to vector<1x512xf32>
    %10 = vector.broadcast %9 : vector<1x512xf32> to vector<16x512xf32>
    %11 = arith.addf %7, %10 : vector<16x512xf32>
    %c0_8 = arith.constant 0 : index
    %c0_9 = arith.constant 0 : index
    %12 = vector.load %arg9[%c0_8, %c0_9] : memref<16x512xf32, #tpu.memory_space<vmem>>, vector<16x512xf32>
    tpu.vector_store %arg9[%c0_8, %c0_9], %11 {strides = array<i32>} : memref<16x512xf32, #tpu.memory_space<vmem>>, vector<16x512xf32>,
    %c0_i32_10 = arith.constant 0 : i32
    %c1_i32 = arith.constant 1 : i32
    %13 = arith.subi %c1_i32, %arg0 : i32
    %14 = arith.muli %13, %c0_i32_10 : i32
    %c1_i32_11 = arith.constant 1 : i32
    %15 = arith.subi %c1_i32_11, %c0_i32_10 : i32
    %16 = arith.muli %arg0, %15 : i32
    %17 = arith.addi %14, %16 : i32
    %c8_i32 = arith.constant 8 : i32
    %18 = arith.muli %17, %c8_i32 : i32
    %19 = tpu.assume_multiple %18, 8 : i32
    %20 = arith.index_cast %19 : i32 to index
    %c0_12 = arith.constant 0 : index
    %21 = vector.load %arg9[%20, %c0_12] : memref<16x512xf32, #tpu.memory_space<vmem>>, vector<8x512xf32>
    %c0_13 = arith.constant 0 : index
    %c0_14 = arith.constant 0 : index
    %22 = vector.load %arg10[%c0_13, %c0_14] : memref<8x128xf32, #tpu.memory_space<vmem>>, vector<8x128xf32>
    %23 = arith.truncf %22 : vector<8x128xf32> to vector<8x128xbf16>
    %c0_15 = arith.constant 0 : index
    %c0_16 = arith.constant 0 : index
    %c0_17 = arith.constant 0 : index
    %24 = vector.load %arg4[%c0_15, %c0_16, %c0_17] : memref<1x128x512xbf16, #tpu.memory_space<vmem>>, vector<1x128x512xbf16>
    %25 = vector.shape_cast %24 : vector<1x128x512xbf16> to vector<128x512xbf16>
    %cst_18 = arith.constant dense<0.000000e+00> : vector<8x512xf32>
    %26 = tpu.matmul %23, %25, %cst_18 {dimension_numbers = #tpu.dot_dimension_numbers<[1], [0], [0], [1], [0, 0, 1, 1], [], []>} : vector<8x128xbf16>, vector<128x512xbf16>, vector<8x512xf32> -> vector<8x512xf32>
    %27 = arith.addf %21, %26 : vector<8x512xf32>
    %28 = vector.extract_strided_slice %27 {offsets = [0, 0], sizes = [8, 128], strides = [1, 1]} : vector<8x512xf32> to vector<8x128xf32>
    %29 = arith.negf %28 : vector<8x128xf32>
    %30 = math.exp %29 : vector<8x128xf32>
    %cst_19 = arith.constant 1.000000e+00 : f32
    %31 = vector.broadcast %cst_19 : f32 to vector<8x128xf32>
    %32 = arith.addf %31, %30 : vector<8x128xf32>
    %33 = arith.divf %31, %32 : vector<8x128xf32>
    %34 = vector.extract_strided_slice %27 {offsets = [0, 128], sizes = [8, 128], strides = [1, 1]} : vector<8x512xf32> to vector<8x128xf32>
    %35 = arith.negf %34 : vector<8x128xf32>
    %36 = math.exp %35 : vector<8x128xf32>
    %cst_20 = arith.constant 1.000000e+00 : f32
    %37 = vector.broadcast %cst_20 : f32 to vector<8x128xf32>
    %38 = arith.addf %37, %36 : vector<8x128xf32>
    %39 = arith.divf %37, %38 : vector<8x128xf32>
    %40 = vector.extract_strided_slice %27 {offsets = [0, 256], sizes = [8, 128], strides = [1, 1]} : vector<8x512xf32> to vector<8x128xf32>
    %41 = math.tanh %40 : vector<8x128xf32>
    %42 = vector.extract_strided_slice %27 {offsets = [0, 384], sizes = [8, 128], strides = [1, 1]} : vector<8x512xf32> to vector<8x128xf32>
    %43 = arith.negf %42 : vector<8x128xf32>
    %44 = math.exp %43 : vector<8x128xf32>
    %cst_21 = arith.constant 1.000000e+00 : f32
    %45 = vector.broadcast %cst_21 : f32 to vector<8x128xf32>
    %46 = arith.addf %45, %44 : vector<8x128xf32>
    %47 = arith.divf %45, %46 : vector<8x128xf32>
    %c0_22 = arith.constant 0 : index
    %c0_23 = arith.constant 0 : index
    %48 = vector.load %arg11[%c0_22, %c0_23] : memref<8x128xf32, #tpu.memory_space<vmem>>, vector<8x128xf32>
    %49 = arith.mulf %39, %48 : vector<8x128xf32>
    %50 = arith.mulf %33, %41 : vector<8x128xf32>
    %51 = arith.addf %49, %50 : vector<8x128xf32>
    %52 = math.tanh %51 : vector<8x128xf32>
    %53 = arith.mulf %47, %52 : vector<8x128xf32>
    %c0_24 = arith.constant 0 : index
    %c0_25 = arith.constant 0 : index
    %54 = vector.load %arg10[%c0_24, %c0_25] : memref<8x128xf32, #tpu.memory_space<vmem>>, vector<8x128xf32>
    tpu.vector_store %arg10[%c0_24, %c0_25], %53 {strides = array<i32>} : memref<8x128xf32, #tpu.memory_space<vmem>>, vector<8x128xf32>,
    %c0_26 = arith.constant 0 : index
    %c0_27 = arith.constant 0 : index
    %55 = vector.load %arg11[%c0_26, %c0_27] : memref<8x128xf32, #tpu.memory_space<vmem>>, vector<8x128xf32>
    tpu.vector_store %arg11[%c0_26, %c0_27], %51 {strides = array<i32>} : memref<8x128xf32, #tpu.memory_space<vmem>>, vector<8x128xf32>,
    %56 = arith.index_cast %19 : i32 to index
    %c0_28 = arith.constant 0 : index
    %57 = vector.load %arg6[%56, %c0_28] : memref<16x128xf32, #tpu.memory_space<vmem>>, vector<8x128xf32>
    tpu.vector_store %arg6[%56, %c0_28], %53 {strides = array<i32>} : memref<16x128xf32, #tpu.memory_space<vmem>>, vector<8x128xf32>,
    %c1_i32_29 = arith.constant 1 : i32
    %c1_i32_30 = arith.constant 1 : i32
    %58 = arith.subi %c1_i32_30, %arg0 : i32
    %59 = arith.muli %58, %c1_i32_29 : i32
    %c1_i32_31 = arith.constant 1 : i32
    %60 = arith.subi %c1_i32_31, %c1_i32_29 : i32
    %61 = arith.muli %arg0, %60 : i32
    %62 = arith.addi %59, %61 : i32
    %c8_i32_32 = arith.constant 8 : i32
    %63 = arith.muli %62, %c8_i32_32 : i32
    %64 = tpu.assume_multiple %63, 8 : i32
    %65 = arith.index_cast %64 : i32 to index
    %c0_33 = arith.constant 0 : index
    %66 = vector.load %arg9[%65, %c0_33] : memref<16x512xf32, #tpu.memory_space<vmem>>, vector<8x512xf32>
    %c0_34 = arith.constant 0 : index
    %c0_35 = arith.constant 0 : index
    %67 = vector.load %arg10[%c0_34, %c0_35] : memref<8x128xf32, #tpu.memory_space<vmem>>, vector<8x128xf32>
    %68 = arith.truncf %67 : vector<8x128xf32> to vector<8x128xbf16>
    %c0_36 = arith.constant 0 : index
    %c0_37 = arith.constant 0 : index
    %c0_38 = arith.constant 0 : index
    %69 = vector.load %arg4[%c0_36, %c0_37, %c0_38] : memref<1x128x512xbf16, #tpu.memory_space<vmem>>, vector<1x128x512xbf16>
    %70 = vector.shape_cast %69 : vector<1x128x512xbf16> to vector<128x512xbf16>
    %cst_39 = arith.constant dense<0.000000e+00> : vector<8x512xf32>
    %71 = tpu.matmul %68, %70, %cst_39 {dimension_numbers = #tpu.dot_dimension_numbers<[1], [0], [0], [1], [0, 0, 1, 1], [], []>} : vector<8x128xbf16>, vector<128x512xbf16>, vector<8x512xf32> -> vector<8x512xf32>
    %72 = arith.addf %66, %71 : vector<8x512xf32>
    %73 = vector.extract_strided_slice %72 {offsets = [0, 0], sizes = [8, 128], strides = [1, 1]} : vector<8x512xf32> to vector<8x128xf32>
    %74 = arith.negf %73 : vector<8x128xf32>
    %75 = math.exp %74 : vector<8x128xf32>
    %cst_40 = arith.constant 1.000000e+00 : f32
    %76 = vector.broadcast %cst_40 : f32 to vector<8x128xf32>
    %77 = arith.addf %76, %75 : vector<8x128xf32>
    %78 = arith.divf %76, %77 : vector<8x128xf32>
    %79 = vector.extract_strided_slice %72 {offsets = [0, 128], sizes = [8, 128], strides = [1, 1]} : vector<8x512xf32> to vector<8x128xf32>
    %80 = arith.negf %79 : vector<8x128xf32>
    %81 = math.exp %80 : vector<8x128xf32>
    %cst_41 = arith.constant 1.000000e+00 : f32
    %82 = vector.broadcast %cst_41 : f32 to vector<8x128xf32>
    %83 = arith.addf %82, %81 : vector<8x128xf32>
    %84 = arith.divf %82, %83 : vector<8x128xf32>
    %85 = vector.extract_strided_slice %72 {offsets = [0, 256], sizes = [8, 128], strides = [1, 1]} : vector<8x512xf32> to vector<8x128xf32>
    %86 = math.tanh %85 : vector<8x128xf32>
    %87 = vector.extract_strided_slice %72 {offsets = [0, 384], sizes = [8, 128], strides = [1, 1]} : vector<8x512xf32> to vector<8x128xf32>
    %88 = arith.negf %87 : vector<8x128xf32>
    %89 = math.exp %88 : vector<8x128xf32>
    %cst_42 = arith.constant 1.000000e+00 : f32
    %90 = vector.broadcast %cst_42 : f32 to vector<8x128xf32>
    %91 = arith.addf %90, %89 : vector<8x128xf32>
    %92 = arith.divf %90, %91 : vector<8x128xf32>
    %c0_43 = arith.constant 0 : index
    %c0_44 = arith.constant 0 : index
    %93 = vector.load %arg11[%c0_43, %c0_44] : memref<8x128xf32, #tpu.memory_space<vmem>>, vector<8x128xf32>
    %94 = arith.mulf %84, %93 : vector<8x128xf32>
    %95 = arith.mulf %78, %86 : vector<8x128xf32>
    %96 = arith.addf %94, %95 : vector<8x128xf32>
    %97 = math.tanh %96 : vector<8x128xf32>
    %98 = arith.mulf %92, %97 : vector<8x128xf32>
    %c0_45 = arith.constant 0 : index
    %c0_46 = arith.constant 0 : index
    %99 = vector.load %arg10[%c0_45, %c0_46] : memref<8x128xf32, #tpu.memory_space<vmem>>, vector<8x128xf32>
    tpu.vector_store %arg10[%c0_45, %c0_46], %98 {strides = array<i32>} : memref<8x128xf32, #tpu.memory_space<vmem>>, vector<8x128xf32>,
    %c0_47 = arith.constant 0 : index
    %c0_48 = arith.constant 0 : index
    %100 = vector.load %arg11[%c0_47, %c0_48] : memref<8x128xf32, #tpu.memory_space<vmem>>, vector<8x128xf32>
    tpu.vector_store %arg11[%c0_47, %c0_48], %96 {strides = array<i32>} : memref<8x128xf32, #tpu.memory_space<vmem>>, vector<8x128xf32>,
    %101 = arith.index_cast %64 : i32 to index
    %c0_49 = arith.constant 0 : index
    %102 = vector.load %arg6[%101, %c0_49] : memref<16x128xf32, #tpu.memory_space<vmem>>, vector<8x128xf32>
    tpu.vector_store %arg6[%101, %c0_49], %98 {strides = array<i32>} : memref<16x128xf32, #tpu.memory_space<vmem>>, vector<8x128xf32>,
    %c2_i32 = arith.constant 2 : i32
    %c3_i32 = arith.constant 3 : i32
    %103 = arith.cmpi eq, %arg1, %c3_i32 : i32
    %104 = arith.extui %103 : i1 to i32
    %c0_i32_50 = arith.constant 0 : i32
    %105 = arith.cmpi ne, %104, %c0_i32_50 : i32
    scf.if %105 {
      %c0_51 = arith.constant 0 : index
      %c0_52 = arith.constant 0 : index
      %106 = vector.load %arg10[%c0_51, %c0_52] : memref<8x128xf32, #tpu.memory_space<vmem>>, vector<8x128xf32>
      %c0_53 = arith.constant 0 : index
      %c0_54 = arith.constant 0 : index
      %c0_55 = arith.constant 0 : index
      %107 = vector.load %arg7[%c0_53, %c0_54, %c0_55] : memref<1x8x128xf32, #tpu.memory_space<vmem>>, vector<1x8x128xf32>
      %108 = vector.shape_cast %107 : vector<1x8x128xf32> to vector<8x128xf32>
      %109 = vector.shape_cast %106 : vector<8x128xf32> to vector<1x8x128xf32>
      tpu.vector_store %arg7[%c0_53, %c0_54, %c0_55], %109 {strides = array<i32>} : memref<1x8x128xf32, #tpu.memory_space<vmem>>, vector<1x8x128xf32>,
      %c0_56 = arith.constant 0 : index
      %c0_57 = arith.constant 0 : index
      %110 = vector.load %arg11[%c0_56, %c0_57] : memref<8x128xf32, #tpu.memory_space<vmem>>, vector<8x128xf32>
      %c0_58 = arith.constant 0 : index
      %c0_59 = arith.constant 0 : index
      %c0_60 = arith.constant 0 : index
      %111 = vector.load %arg8[%c0_58, %c0_59, %c0_60] : memref<1x8x128xf32, #tpu.memory_space<vmem>>, vector<1x8x128xf32>
      %112 = vector.shape_cast %111 : vector<1x8x128xf32> to vector<8x128xf32>
      %113 = vector.shape_cast %110 : vector<8x128xf32> to vector<1x8x128xf32>
      tpu.vector_store %arg8[%c0_58, %c0_59, %c0_60], %113 {strides = array<i32>} : memref<1x8x128xf32, #tpu.memory_space<vmem>>, vector<1x8x128xf32>,
    } else {
    }
    return
  }
  func.func @transform_0(%arg0: i32, %arg1: i32) -> (i32, i32) {
    %c1_i32 = arith.constant 1 : i32
    %0 = arith.subi %c1_i32, %arg0 : i32
    %1 = arith.muli %0, %arg1 : i32
    %c3_i32 = arith.constant 3 : i32
    %2 = arith.subi %c3_i32, %arg1 : i32
    %3 = arith.muli %arg0, %2 : i32
    %4 = arith.addi %1, %3 : i32
    %c0_i32 = arith.constant 0 : i32
    %c0_i32_0 = arith.constant 0 : i32
    return %4, %c0_i32 : i32, i32
  }
  func.func @transform_1(%arg0: i32, %arg1: i32) -> (i32, i32, i32) {
    %c0_i32 = arith.constant 0 : i32
    %c0_i32_0 = arith.constant 0 : i32
    %c0_i32_1 = arith.constant 0 : i32
    return %arg0, %c0_i32, %c0_i32_0 : i32, i32, i32
  }
  func.func @transform_2(%arg0: i32, %arg1: i32) -> (i32, i32, i32) {
    %c0_i32 = arith.constant 0 : i32
    %c0_i32_0 = arith.constant 0 : i32
    %c0_i32_1 = arith.constant 0 : i32
    return %arg0, %c0_i32, %c0_i32_0 : i32, i32, i32
  }
  func.func @transform_3(%arg0: i32, %arg1: i32) -> (i32, i32, i32) {
    %c0_i32 = arith.constant 0 : i32
    %c0_i32_0 = arith.constant 0 : i32
    %c0_i32_1 = arith.constant 0 : i32
    return %arg0, %c0_i32, %c0_i32_0 : i32, i32, i32
  }
  func.func @transform_4(%arg0: i32, %arg1: i32) -> (i32, i32) {
    %c1_i32 = arith.constant 1 : i32
    %0 = arith.subi %c1_i32, %arg0 : i32
    %1 = arith.muli %0, %arg1 : i32
    %c3_i32 = arith.constant 3 : i32
    %2 = arith.subi %c3_i32, %arg1 : i32
    %3 = arith.muli %arg0, %2 : i32
    %4 = arith.addi %1, %3 : i32
    %c0_i32 = arith.constant 0 : i32
    return %4, %arg0 : i32, i32
  }
  func.func @transform_5(%arg0: i32, %arg1: i32) -> (i32, i32, i32) {
    %c0_i32 = arith.constant 0 : i32
    %c0_i32_0 = arith.constant 0 : i32
    %c0_i32_1 = arith.constant 0 : i32
    return %arg0, %c0_i32, %c0_i32_0 : i32, i32, i32
  }
  func.func @transform_6(%arg0: i32, %arg1: i32) -> (i32, i32, i32) {
    %c0_i32 = arith.constant 0 : i32
    %c0_i32_0 = arith.constant 0 : i32
    %c0_i32_1 = arith.constant 0 : i32
    return %arg0, %c0_i32, %c0_i32_0 : i32, i32, i32
  }
}

</mosaic_0001>

<bundles_post_ra>
// kernel: encoder_forward.3
= control target key start
LH: loop header
LB: loop body
LE: loop exit
PB: predicated region body
PF: predicated region fallthrough
CT: control target
= control target key end

     0   :  { %s580_s12 = smov [#allocation5]   ;;  %s710_s0 = inlined_call_operand.vmem [shape: s32[64], index: 0, kind: input, shape index: {}]   ;;  %s711_s1 = inlined_call_operand.hbm [shape: f32[32,32], index: 1, kind: input, shape index: {}]   ;;  %s712_s2 = inlined_call_operand.vmem [shape: f32[64,32], index: 2, kind: output, shape index: {}]  }
   0x1   :  { %s8_s11 = sshll.u32 %s710_s0, 4  ;;  %s9_s11 = int_to_ptr.vmem [resolvable:$true] %s8_s11 }
   0x2   :  { %11 = dma.vmem_to_smem %s9_s11, 16, %s580_s12, [#allocation4] }
   0x3   :  { %558 = dma.done.wait [#allocation4], 16 }
   0x4   :  { %559 = vsyncadd [#allocation4], 4294967280 }
   0x5   :  { %14 = sfence }
   0x6   :  { %s607_s13 = smov 0  }
   0x7 LB: > { %p320_p0 = scmp.ge.s32.totalorder %s578_s13, 8  ;;  %s578_s13 = sphi %s607_s13, %s20_s13  }
   0x8   : > { %p52_p1 = scmp.lt.s32.totalorder (!%p320_p0), %s578_s13, 7  ;;  %s615_s0 = sshll.u32 (!%p320_p0), %s578_s13, 3 }
   0x9   : > { %45 = sbr.rel (%p320_p0) target bundleno = 133 (0x85), region = 12  ;;  %s57_s14 = sld [smem:[#allocation5 + %s615_s0]] (!%p320_p0) }
   0xa   : > { %s581_s16 = smov (!%p320_p0), [#allocation2]   ;;  %s72_s18 = sadd.s32 (!%p320_p0), 1, %s615_s0 }
   0xb   : > { %s68_s17 = sshll.u32 (!%p320_p0), %s581_s16, 4  ;;  %s73_s23 = sld [smem:[#allocation5 + %s72_s18]] (!%p320_p0)  ;;  %s69_s17 = int_to_ptr.vmem [resolvable:$true] %s68_s17 }
   0xc   : > { %s90_s24 = sadd.s32 (!%p320_p0), 2, %s615_s0  ;;  %s582_s28 = smov (!%p320_p0), [#allocation2 + $0x1]  }
   0xd   : > { %s629_s29 = sshll.u32 (!%p320_p0), %s582_s28, 4  ;;  %s632_s3 = sld [smem:[#allocation5 + %s90_s24]] (!%p320_p0)  ;;  %s87_s29 = int_to_ptr.vmem [resolvable:$true] %s629_s29 }
   0xe   : > { %s53_s15 = scalar_select %p52_p1, %s578_s13, 7 }
   0xf   : > { %s58_s27 = scalar_lea.hbm %s711_s1, %s57_s14  ;;  %s637_s8 = scalar_lea.hbm %s711_s1, 32 }
  0x10   : > { %s321_s19 = sshll.u32 %s53_s15, 3  ;;  %s66_s30 = sshll.u32 %s58_s27, 4  ;;  %s67_s30 = int_to_ptr.hbm [resolvable:$true] %s66_s30 }
  0x11   : > { %s623_s22 = scalar_lea.vmem %s712_s2, %s321_s19  ;;  %s362_s4 = sshra.s32 %s67_s30, 4  ;;  %s363_s4 = int_to_ptr.hbm [resolvable:$true] %s362_s4 }
  0x12   : > { %s364_s5 = scalar_lea.hbm %s363_s4, 1  ;;  %p367_p3 = scmp.lt.s32.totalorder %s363_s4, %s711_s1 }
  0x13   : > { %p365_p2 = scmp.ne.s32.totalorder %s363_s4, %s364_s5  ;;  %p368_p4 = scmp.lt.s32.totalorder %s637_s8, %s364_s5 }
  0x15   : > { %p369_p5 = por %p368_p4, %p367_p3 }
  0x17   : > { %p370_p6 = pnand %p369_p5, %p365_p2 }
  0x19   : > { %373 = shalt.err (!%p370_p6)  }
  0x1a   : > { %71 = dma.hbm_to_vmem [thread:$0]  %s67_s30, 16, %s69_s17, [#allocation3] }
  0x1b   : > { %s74_s14 = scalar_lea.hbm %s711_s1, %s73_s23  ;;  %s583_s16 = smov [#allocation2 + $0x2]  }
  0x1c   : > { %s84_s15 = sshll.u32 %s74_s14, 4  ;;  %s104_s18 = sshll.u32 %s583_s16, 4  ;;  %s85_s15 = int_to_ptr.hbm [resolvable:$true] %s84_s15  ;;  %s105_s18 = int_to_ptr.vmem [resolvable:$true] %s104_s18 }
  0x1d   : > { %s386_s19 = sshra.s32 %s85_s15, 4  ;;  %s387_s19 = int_to_ptr.hbm [resolvable:$true] %s386_s19 }
  0x1e   : > { %s388_s20 = scalar_lea.hbm %s387_s19, 1  ;;  %p391_p8 = scmp.lt.s32.totalorder %s387_s19, %s711_s1 }
  0x1f   : > { %p389_p7 = scmp.ne.s32.totalorder %s387_s19, %s388_s20  ;;  %p392_p9 = scmp.lt.s32.totalorder %s637_s8, %s388_s20 }
  0x21   : > { %p393_p10 = por %p392_p9, %p391_p8 }
  0x23   : > { %p394_p11 = pnand %p393_p10, %p389_p7 }
  0x25   : > { %397 = shalt.err (!%p394_p11)  }
  0x26   : > { %89 = dma.hbm_to_vmem [thread:$0]  %s85_s15, 16, %s87_s29, [#allocation3 + $0x1] }
  0x27   : > { %s92_s25 = scalar_lea.hbm %s711_s1, %s632_s3  ;;  %s108_s26 = sadd.s32 3, %s615_s0 }
  0x28   : > { %s102_s27 = sshll.u32 %s92_s25, 4  ;;  %s109_s28 = sld [smem:[#allocation5 + %s108_s26]]  ;;  %s103_s27 = int_to_ptr.hbm [resolvable:$true] %s102_s27 }
  0x29   : > { %s410_s30 = sshra.s32 %s103_s27, 4  ;;  %s411_s30 = int_to_ptr.hbm [resolvable:$true] %s410_s30 }
  0x2a   : > { %s412_s4 = scalar_lea.hbm %s411_s30, 1  ;;  %p415_p13 = scmp.lt.s32.totalorder %s411_s30, %s711_s1 }
  0x2b   : > { %p413_p12 = scmp.ne.s32.totalorder %s411_s30, %s412_s4  ;;  %p416_p0 = scmp.lt.s32.totalorder %s637_s8, %s412_s4 }
  0x2d   : > { %p417_p1 = por %p416_p0, %p415_p13 }
  0x2f   : > { %p418_p2 = pnand %p417_p1, %p413_p12 }
  0x31   : > { %421 = shalt.err (!%p418_p2)  }
  0x32   : > { %107 = dma.hbm_to_vmem [thread:$0]  %s103_s27, 16, %s105_s18, [#allocation3 + $0x2] }
  0x33   : > { %s584_s29 = smov [#allocation2 + $0x3]   ;;  %s126_s7 = sadd.s32 4, %s615_s0 }
  0x34   : > { %s122_s3 = sshll.u32 %s584_s29, 4  ;;  %s127_s9 = sld [smem:[#allocation5 + %s126_s7]]  ;;  %s123_s3 = int_to_ptr.vmem [resolvable:$true] %s122_s3 }
  0x35   : > { %s144_s10 = sadd.s32 5, %s615_s0  ;;  %s110_s14 = scalar_lea.hbm %s711_s1, %s109_s28 }
  0x36   : > { %s585_s15 = smov [#allocation2 + $0x4]   ;;  %s120_s19 = sshll.u32 %s110_s14, 4  ;;  %s121_s19 = int_to_ptr.hbm [resolvable:$true] %s120_s19 }
  0x37   : > { %s666_s16 = sshll.u32 %s585_s15, 4  ;;  %s669_s18 = sld [smem:[#allocation5 + %s144_s10]]  ;;  %s141_s16 = int_to_ptr.vmem [resolvable:$true] %s666_s16 }
  0x38   : > { %s434_s20 = sshra.s32 %s121_s19, 4  ;;  %s435_s20 = int_to_ptr.hbm [resolvable:$true] %s434_s20 }
  0x39   : > { %s436_s21 = scalar_lea.hbm %s435_s20, 1  ;;  %p439_p4 = scmp.lt.s32.totalorder %s435_s20, %s711_s1 }
  0x3a   : > { %p437_p3 = scmp.ne.s32.totalorder %s435_s20, %s436_s21  ;;  %p440_p5 = scmp.lt.s32.totalorder %s637_s8, %s436_s21 }
  0x3c   : > { %p441_p6 = por %p440_p5, %p439_p4 }
  0x3e   : > { %p442_p7 = pnand %p441_p6, %p437_p3 }
  0x40   : > { %445 = shalt.err (!%p442_p7)  }
  0x41   : > { %125 = dma.hbm_to_vmem [thread:$0]  %s121_s19, 16, %s123_s3, [#allocation3 + $0x3] }
  0x42   : > { %s128_s26 = scalar_lea.hbm %s711_s1, %s127_s9  ;;  %s586_s28 = smov [#allocation2 + $0x5]  }
  0x43   : > { %s138_s27 = sshll.u32 %s128_s26, 4  ;;  %s158_s30 = sshll.u32 %s586_s28, 4  ;;  %s139_s27 = int_to_ptr.hbm [resolvable:$true] %s138_s27  ;;  %s159_s30 = int_to_ptr.vmem [resolvable:$true] %s158_s30 }
  0x44   : > { %s458_s4 = sshra.s32 %s139_s27, 4  ;;  %s459_s4 = int_to_ptr.hbm [resolvable:$true] %s458_s4 }
  0x45   : > { %s460_s5 = scalar_lea.hbm %s459_s4, 1  ;;  %p463_p9 = scmp.lt.s32.totalorder %s459_s4, %s711_s1 }
  0x46   : > { %p461_p8 = scmp.ne.s32.totalorder %s459_s4, %s460_s5  ;;  %p464_p10 = scmp.lt.s32.totalorder %s637_s8, %s460_s5 }
  0x48   : > { %p465_p11 = por %p464_p10, %p463_p9 }
  0x4a   : > { %p466_p12 = pnand %p465_p11, %p461_p8 }
  0x4c   : > { %469 = shalt.err (!%p466_p12)  }
  0x4d   : > { %143 = dma.hbm_to_vmem [thread:$0]  %s139_s27, 16, %s141_s16, [#allocation3 + $0x4] }
  0x4e   : > { %s146_s9 = scalar_lea.hbm %s711_s1, %s669_s18  ;;  %s162_s10 = sadd.s32 6, %s615_s0 }
  0x4f   : > { %s156_s11 = sshll.u32 %s146_s9, 4  ;;  %s163_s12 = sld [smem:[#allocation5 + %s162_s10]]  ;;  %s157_s11 = int_to_ptr.hbm [resolvable:$true] %s156_s11 }
  0x50   : > { %s482_s14 = sshra.s32 %s157_s11, 4  ;;  %s483_s14 = int_to_ptr.hbm [resolvable:$true] %s482_s14 }
  0x51   : > { %s484_s15 = scalar_lea.hbm %s483_s14, 1  ;;  %p487_p0 = scmp.lt.s32.totalorder %s483_s14, %s711_s1 }
  0x52   : > { %p485_p13 = scmp.ne.s32.totalorder %s483_s14, %s484_s15  ;;  %p488_p1 = scmp.lt.s32.totalorder %s637_s8, %s484_s15 }
  0x54   : > { %p489_p2 = por %p488_p1, %p487_p0 }
  0x56   : > { %p490_p3 = pnand %p489_p2, %p485_p13 }
  0x58   : > { %493 = shalt.err (!%p490_p3)  }
  0x59   : > { %161 = dma.hbm_to_vmem [thread:$0]  %s157_s11, 16, %s159_s30, [#allocation3 + $0x5] }
  0x5a   : > { %s587_s16 = smov [#allocation2 + $0x6]   ;;  %s180_s21 = sadd.s32 7, %s615_s0 }
  0x5b   : > { %s176_s18 = sshll.u32 %s587_s16, 4  ;;  %s181_s24 = sld [smem:[#allocation5 + %s180_s21]]  ;;  %s177_s18 = int_to_ptr.vmem [resolvable:$true] %s176_s18 }
  0x5c   : > { %s164_s25 = scalar_lea.hbm %s711_s1, %s163_s12  ;;  %s588_s27 = smov [#allocation2 + $0x7]  }
  0x5d   : > { %s174_s26 = sshll.u32 %s164_s25, 4  ;;  %s194_s28 = sshll.u32 %s588_s27, 4  ;;  %s175_s26 = int_to_ptr.hbm [resolvable:$true] %s174_s26  ;;  %s195_s28 = int_to_ptr.vmem [resolvable:$true] %s194_s28 }
  0x5e   : > { %s506_s4 = sshra.s32 %s175_s26, 4  ;;  %s507_s4 = int_to_ptr.hbm [resolvable:$true] %s506_s4 }
  0x5f   : > { %s508_s5 = scalar_lea.hbm %s507_s4, 1  ;;  %p511_p5 = scmp.lt.s32.totalorder %s507_s4, %s711_s1 }
  0x60   : > { %p509_p4 = scmp.ne.s32.totalorder %s507_s4, %s508_s5  ;;  %p512_p6 = scmp.lt.s32.totalorder %s637_s8, %s508_s5 }
  0x62   : > { %p513_p7 = por %p512_p6, %p511_p5 }
  0x64   : > { %p514_p8 = pnand %p513_p7, %p509_p4 }
  0x66   : > { %517 = shalt.err (!%p514_p8)  }
  0x67   : > { %179 = dma.hbm_to_vmem [thread:$0]  %s175_s26, 16, %s177_s18, [#allocation3 + $0x6] }
  0x68   : > { %s182_s3 = scalar_lea.hbm %s711_s1, %s181_s24 }
  0x69   : > { %s192_s7 = sshll.u32 %s182_s3, 4  ;;  %s193_s7 = int_to_ptr.hbm [resolvable:$true] %s192_s7 }
  0x6a   : > { %s530_s9 = sshra.s32 %s193_s7, 4  ;;  %s531_s9 = int_to_ptr.hbm [resolvable:$true] %s530_s9 }
  0x6b   : > { %s532_s10 = scalar_lea.hbm %s531_s9, 1  ;;  %p535_p10 = scmp.lt.s32.totalorder %s531_s9, %s711_s1 }
  0x6c   : > { %p533_p9 = scmp.ne.s32.totalorder %s531_s9, %s532_s10  ;;  %p536_p11 = scmp.lt.s32.totalorder %s637_s8, %s532_s10 }
  0x6e   : > { %p537_p12 = por %p536_p11, %p535_p10 }
  0x70   : > { %p538_p13 = pnand %p537_p12, %p533_p9 }
  0x72   : > { %541 = shalt.err (!%p538_p13)  }
  0x73   : > { %197 = dma.hbm_to_vmem [thread:$0]  %s193_s7, 16, %s195_s28, [#allocation3 + $0x7] }
  0x74   : > { %560 = dma.done.wait [#allocation3], 16 }
  0x75   : > { %561 = vsyncadd [#allocation3], 4294967280 }
  0x76   : > { %562 = dma.done.wait [#allocation3 + $0x1], 16 }
  0x77   : > { %563 = vsyncadd [#allocation3 + $0x1], 4294967280 }
  0x78   : > { %564 = dma.done.wait [#allocation3 + $0x2], 16 }
  0x79   : > { %565 = vsyncadd [#allocation3 + $0x2], 4294967280 }
  0x7a   : > { %566 = dma.done.wait [#allocation3 + $0x3], 16 }
  0x7b   : > { %567 = vsyncadd [#allocation3 + $0x3], 4294967280 }
  0x7c   : > { %568 = dma.done.wait [#allocation3 + $0x4], 16 }
  0x7d   : > { %569 = vsyncadd [#allocation3 + $0x4], 4294967280 }
  0x7e   : > { %570 = dma.done.wait [#allocation3 + $0x5], 16 }
  0x7f   : > { %571 = vsyncadd [#allocation3 + $0x5], 4294967280 }
  0x80   : > { %572 = dma.done.wait [#allocation3 + $0x6], 16 }
  0x81   : > { %573 = vsyncadd [#allocation3 + $0x6], 4294967280 }
  0x82   : > { %574 = dma.done.wait [#allocation3 + $0x7], 16 }
  0x83   : > { %575 = vsyncadd [#allocation3 + $0x7], 4294967280  ;;  %vm216_vm0 = vcmask 261120   ;;  %v215_v0 = vld [vmem:[#allocation2] sm:$0xff] }
  0x84   : > { %217 = vst.msk [vmem:[%s623_s22] sm:$0xff] %vm216_vm0, %v215_v0 }
  0x85 PF: > { %s20_s13 = sadd.s32 1, %s578_s13  }
  0x86   : > { %p17_p0 = scmp.ge.s32.totalorder %s20_s13, 9  }
  0x88   :  { %19 = sbr.rel (!%p17_p0) target bundleno = 7 (0x7), region = 100 }
  0x8d   :  { %237 = vsyncmov [#allocation3] }
  0x90   :  { %s238_s8 = vpop.sfrf %237 }
  0x91   :  { %p325_p1 = scmp.ne.s32.totalorder %s238_s8, 0 }
  0x93   :  { %242 = shalt.err (%p325_p1)  }
  0x94   :  { %244 = vsyncmov [#allocation3 + $0x1] }
  0x97   :  { %s245_s14 = vpop.sfrf %244 }
  0x98   :  { %p326_p2 = scmp.ne.s32.totalorder %s245_s14, 0 }
  0x9a   :  { %249 = shalt.err (%p326_p2)  }
  0x9b   :  { %251 = vsyncmov [#allocation3 + $0x2] }
  0x9e   :  { %s252_s15 = vpop.sfrf %251 }
  0x9f   :  { %p327_p3 = scmp.ne.s32.totalorder %s252_s15, 0 }
  0xa1   :  { %256 = shalt.err (%p327_p3)  }
  0xa2   :  { %258 = vsyncmov [#allocation3 + $0x3] }
  0xa5   :  { %s259_s22 = vpop.sfrf %258 }
  0xa6   :  { %p328_p4 = scmp.ne.s32.totalorder %s259_s22, 0 }
  0xa8   :  { %263 = shalt.err (%p328_p4)  }
  0xa9   :  { %265 = vsyncmov [#allocation3 + $0x4] }
  0xac   :  { %s266_s19 = vpop.sfrf %265 }
  0xad   :  { %p329_p5 = scmp.ne.s32.totalorder %s266_s19, 0 }
  0xaf   :  { %270 = shalt.err (%p329_p5)  }
  0xb0   :  { %272 = vsyncmov [#allocation3 + $0x5] }
  0xb3   :  { %s273_s1 = vpop.sfrf %272 }
  0xb4   :  { %p330_p6 = scmp.ne.s32.totalorder %s273_s1, 0 }
  0xb6   :  { %277 = shalt.err (%p330_p6)  }
  0xb7   :  { %279 = vsyncmov [#allocation3 + $0x6] }
  0xba   :  { %s280_s2 = vpop.sfrf %279 }
  0xbb   :  { %p331_p7 = scmp.ne.s32.totalorder %s280_s2, 0 }
  0xbd   :  { %284 = shalt.err (%p331_p7)  }
  0xbe   :  { %286 = vsyncmov [#allocation3 + $0x7] }
  0xc1   :  { %s287_s13 = vpop.sfrf %286 }
  0xc2   :  { %p332_p8 = scmp.ne.s32.totalorder %s287_s13, 0 }
  0xc4   :  { %291 = shalt.err (%p332_p8)  }

// kernel: encoder_forward.4
= control target key start
LH: loop header
LB: loop body
LE: loop exit
PB: predicated region body
PF: predicated region fallthrough
CT: control target
= control target key end

     0   :  { %s2597_s0 = inlined_call_operand.vmem [shape: f32[64,32], index: 0, kind: input, shape index: {}]   ;;  %s2598_s1 = inlined_call_operand.hbm [shape: bf16[2,32,512], index: 1, kind: input, shape index: {}]   ;;  %s2599_s2 = inlined_call_operand.hbm [shape: bf16[2,128,512], index: 2, kind: input, shape index: {}]   ;;  %s2600_s3 = inlined_call_operand.vmem [shape: f32[2,1,512], index: 3, kind: input, shape index: {}]   ;;  %s2601_s4 = inlined_call_operand.vmem [shape: f32[64,256], index: 4, kind: output, shape index: {0}]   ;;  %s2602_s5 = inlined_call_operand.vmem [shape: f32[2,8,128], index: 5, kind: output, shape index: {1}]   ;;  %s2603_s6 = inlined_call_operand.vmem [shape: f32[2,8,128], index: 6, kind: output, shape index: {2}]  }
   0x1   :  { %2611 = sst [smem:[#allocation18_spill]] %s2597_s0 }
   0x2   :  { %2612 = sst [smem:[#allocation19_spill]] %s2598_s1 }
   0x3   :  { %2613 = sst [smem:[#allocation20_spill]] %s2599_s2 }
   0x4   :  { %2614 = sst [smem:[#allocation21_spill]] %s2601_s4 }
   0x5   :  { %2615 = sst [smem:[#allocation22_spill]] %s2602_s5 }
   0x6   :  { %2616 = sst [smem:[#allocation23_spill]] %s2603_s6 }
   0x7   :  { %12 = vsyncpa [#allocation6], 0 }
   0x8   :  { %14 = vsyncpa [#allocation6 + $0x1], 0 }
   0x9   :  { %15 = vsyncpa [#allocation8], 0 }
   0xa   :  { %17 = vsyncpa [#allocation8 + $0x1], 0  ;;  %s2204_s21 = smov 0   ;;  %s2206_s22 = smov 0  }
   0xb   :  { %s2208_s23 = smov 0   ;;  %s2210_s24 = smov 0  }
   0xc   :  { %s2212_s25 = smov 0   ;;  %s2214_s26 = smov 0  }
   0xd   :  { %s2216_s27 = smov 0   ;;  %s2218_s28 = smov 0  }
   0xe   :  { %s2220_s29 = smov 0   ;;  %s2222_s30 = smov 0  }
   0xf LB: > { %2617 = sst [smem:[#allocation12_spill]] %s2144_s25  ;;  %s2604_s7 = sadd.s32 4294967295, %s2164_s30   ;;  %s2164_s30 = sphi %s2222_s30, %s23_s30   ;;  %s2160_s29 = sphi %s2220_s29, %s2640_s29   ;;  %s2156_s28 = sphi %s2218_s28, %s2639_s28   ;;  %s2152_s27 = sphi %s2216_s27, %s2638_s27   ;;  %s2148_s26 = sphi %s2214_s26, %s2637_s26   ;;  %s2144_s25 = sphi %s2212_s25, %s2636_s25   ;;  %s2140_s24 = sphi %s2210_s24, %s2644_s24   ;;  %s2136_s23 = sphi %s2208_s23, %s2643_s23   ;;  %s2132_s22 = sphi %s2206_s22, %s2642_s22   ;;  %s2128_s21 = sphi %s2204_s21, %s2641_s21  }
  0x10   : > { %2618 = sst [smem:[#allocation13_spill]] %s2156_s28  ;;  %s32_s8 = sadd.s32 1, %s2156_s28 }
  0x11   : > { %2619 = sst [smem:[#allocation14_spill]] %s2160_s29  ;;  %p33_p0 = scmp.ge.s32.totalorder %s32_s8, 4 }
  0x12   : > { %s35_s9 = sadd.s32 1, %s2160_s29  ;;  %s78_s10 = sadd.s32 1, %s2144_s25 }
  0x13   : > { %p85_p1 = scmp.ne.s32.totalorder %s2144_s25, %s2140_s24  ;;  %s2646_s8 = smov (%p33_p0, %s32_s8), 0 }
  0x14   : > { %2620 = sst [smem:[#allocation15_spill]] %s2646_s8  ;;  %s2648_s9 = smov (!%p33_p0, %s35_s9), %s2160_s29 }
  0x15   : > { %p86_p2 = scmp.eq.s32.totalorder %s2164_s30, 0  ;;  %p91_p3 = scmp.ne.s32.totalorder %s2140_s24, %s2136_s23 }
  0x16   : > { %p37_p4 = scmp.ge.s32.totalorder %s2648_s9, 2  ;;  %p92_p5 = scmp.eq.s32.totalorder %s2604_s7, 0 }
  0x17   : > { %p2265_p6 = por %p86_p2, %p85_p1  ;;  %s153_s12 = ssub.s32 1, %s2160_s29 }
  0x18   : > { %s2650_s9 = smov (%p37_p4, %s2648_s9), 0  ;;  %p2272_p7 = por %p92_p5, %p91_p3 }
  0x19   : > { %2622 = sst [smem:[#allocation16_spill]] %s2650_s9  ;;  %s154_s14 = smul.u32 %s2156_s28, %s153_s12 }
  0x1a   : > { %s75_s15 = ssub.s32 %s2160_s29, %s2650_s9  ;;  %s155_s16 = ssub.s32 3, %s2156_s28 }
  0x1b   : > { %p76_p8 = scmp.eq.s32.totalorder %s75_s15, 0  ;;  %s156_s17 = smul.u32 %s2160_s29, %s155_s16 }
  0x1c   : > { %s158_s18 = ssub.s32 1, %s2650_s9  ;;  %s160_s19 = ssub.s32 3, %s2646_s8 }
  0x1d   : > { %s2284_s20 = scalar_select %p76_p8, %s2144_s25, %s78_s10  }
  0x1e   : > { %s157_s23 = sadd.s32 %s156_s17, %s154_s14  ;;  %s159_s7 = smul.u32 %s158_s18, %s2646_s8 }
  0x1f   : > { %2624 = sst [smem:[#allocation17_spill]] %s2284_s20  ;;  %s161_s4 = smul.u32 %s160_s19, %s2650_s9 }
  0x20   : > { %s168_s6 = sadd.s32 1, %s2132_s22  ;;  %p178_p9 = scmp.ne.s32.totalorder %s2132_s22, %s2128_s21 }
  0x21   : > { %s2625_s5 = sadd.s32 4294967295, %s2164_s30   ;;  %s162_s12 = sadd.s32 %s161_s4, %s159_s7 }
  0x22   : > { %p179_p10 = scmp.eq.s32.totalorder %s2625_s5, 7  ;;  %s163_s28 = ssub.s32 %s157_s23, %s162_s12 }
  0x23   : > { %s165_s0 = sor.u32 %s163_s28, %s75_s15  ;;  %p1902_p12 = scmp.lt.s32.totalorder %s2164_s30, 8 }
  0x24   : > { %p2293_p11 = por %p179_p10, %p178_p9  ;;  %p166_p13 = scmp.eq.s32.totalorder %s165_s0, 0 }
  0x25   : > { %s2299_s10 = sand.u32 1, %s2144_s25   ;;  %s1814_s4 = sshll.u32 %s2160_s29, 6 }
  0x26   : > { %s1487_s14 = sshll.u32 %s2299_s10, 6  ;;  %s2627_s1 = sld [smem:[#allocation19_spill]] }
  0x27   : > { %s2303_s17 = scalar_select %p166_p13, %s2132_s22, %s168_s6  }
  0x28   : > { %s280_s19 = scalar_lea.vmem [#allocation5], %s1487_s14  ;;  %p2311_p0 = pnand %p1902_p12, %p2265_p6 }
  0x29   : > { %s288_s23 = sshll.u32 %s280_s19, 4  ;;  %p1493_p1 = scmp.ge.s32.totalorder %s2164_s30, 1  ;;  %s289_s23 = int_to_ptr.vmem [resolvable:$true] %s288_s23 }
  0x2a   : > { %s277_s6 = scalar_lea.sflag [#allocation6], %s2299_s10  ;;  %s2166_s15 = smov 256  }
  0x2b   : > { %s2167_s12 = smov 16   ;;  %p325_p2 = scmp.lt.s32.totalorder %s2164_s30, 9 }
  0x2c   : > { %s285_s18 = scalar_lea.hbm %s2627_s1, %s1814_s4  ;;  %s1490_s14 = sshll.u32 %s2299_s10, 8 }
  0x2d   : > { %s286_s28 = sshll.u32 %s285_s18, 4  ;;  %s1815_s4 = sshll.u32 %s2160_s29, 8  ;;  %s287_s28 = int_to_ptr.hbm [resolvable:$true] %s286_s28 }
  0x2e   : > { %1898 = dma.hbm_to_vmem [thread:$0]  (!%p2311_p0), %s287_s28, 1024, %s289_s23, %s277_s6, %s2166_s15, %s2166_s15, %s2167_s12  }
  0x2f   : > { %p326_p3 = pnand %p1493_p1, %p325_p2  ;;  %s2629_s2 = sld [smem:[#allocation20_spill]] }
  0x30   : > { %s302_s18 = scalar_lea.vmem [#allocation7], %s1490_s14  ;;  %s299_s9 = scalar_lea.sflag [#allocation8], %s2299_s10 }
  0x31   : > { %s310_s19 = sshll.u32 %s302_s18, 4  ;;  %s331_s23 = sand.u32 (!%p326_p3), 1, %s2140_s24   ;;  %s311_s19 = int_to_ptr.vmem [resolvable:$true] %s310_s19 }
  0x32   : > { %s1494_s28 = sshll.u32 (!%p326_p3), %s331_s23, 6  ;;  %s332_s6 = scalar_lea.sflag (!%p326_p3), [#allocation6], %s331_s23 }
  0x33   : > { %329 = sbr.rel (%p326_p3) target bundleno = 483 (0x1e3), region = 36  ;;  %s2329_s8 = scalar_lea.vmem (!%p326_p3), [#allocation5], %s1494_s28 }
  0x35   : > { %s307_s11 = scalar_lea.hbm %s2629_s2, %s1815_s4 }
  0x36   : > { %s308_s1 = sshll.u32 %s307_s11, 4  ;;  %s309_s1 = int_to_ptr.hbm [resolvable:$true] %s308_s1 }
  0x37   : > { %1901 = dma.hbm_to_vmem [thread:$0]  (!%p2311_p0), %s309_s1, 4096, %s311_s19, %s299_s9, %s2166_s15, %s2166_s15, %s2167_s12  }
  0x38   : > { %2119 = dma.done.wait (%p2272_p7), %s332_s6, 1024  }
  0x39   : > { %2121 = vsyncadd (%p2272_p7), %s332_s6, 4294966272  ;;  %s1495_s14 = sshll.u32 %s331_s23, 8  ;;  %s342_s4 = scalar_lea.sflag [#allocation8], %s331_s23 }
  0x3a   : > { %s2335_s5 = scalar_lea.vmem [#allocation7], %s1495_s14 }
  0x3b   : > { %2123 = dma.done.wait (%p2272_p7), %s342_s4, 4096  }
  0x3c   : > { %2125 = vsyncadd (%p2272_p7), %s342_s4, 4294963200  ;;  %s386_s1 = sand.u32 1, %s2128_s21   ;;  %s2608_s9 = ssub.s32 1, %s2152_s27 }
  0x3d   : > { %s1496_s10 = sshll.u32 %s386_s1, 4  ;;  %s402_s0 = smul.u32 %s2148_s26, %s2608_s9 }
  0x3e   : > { %s403_s15 = ssub.s32 3, %s2148_s26  ;;  %p417_p4 = scmp.lt.s32.totalorder %s2152_s27, 1 }
  0x3f   : > { %s404_s12 = smul.u32 %s2152_s27, %s403_s15  ;;  %s2630_s1 = sld [smem:[#allocation18_spill]] }
  0x40   : > { %s418_s11 = scalar_select %p417_p4, %s2152_s27, 1 }
  0x41   : > { %s2349_s7 = sadd.s32 %s404_s12, %s402_s0  ;;  %s2631_s9 = sld [smem:[#allocation22_spill]] }
  0x42   : > { %s1497_s13 = sshll.u32 %s2349_s7, 1  ;;  %s1499_s18 = sshll.u32 %s418_s11, 2 }
  0x43   : > { %p407_p5 = scmp.lt.s32.totalorder %s1497_s13, 7  ;;  %s1500_s19 = sshll.u32 %s418_s11, 3 }
  0x44   : > { %s2356_s21 = scalar_lea.vmem %s2600_s3, %s1499_s18  ;;  %s2632_s25 = sld [smem:[#allocation23_spill]] }
  0x45   : > { %s2652_s13 = smov (!%p407_p5, %s1497_s13), 7  ;;  %p1502_p6 = scmp.ne.s32.totalorder %s2148_s26, 0 }
  0x46   : > { %s1498_s23 = sshll.u32 %s2652_s13, 3  ;;  %s2373_s13 = scalar_lea.vmem [#allocation9], %s1496_s10 }
  0x47   : > { %s2361_s15 = scalar_lea.vmem %s2630_s1, %s1498_s23  ;;  %s2366_s2 = scalar_lea.vmem %s2631_s9, %s1500_s19 }
  0x48   : > { %439 = sbr.rel (%p1502_p6) target bundleno = 80 (0x50), region = 48 }
  0x4a   : > { %s2371_s11 = scalar_lea.vmem %s2632_s25, %s1500_s19 }
  0x4d   : > { %v2168_v0 = vmov 0.0  }
  0x4e   : > { %440 = vst [vmem:[#allocation3] sm:$0xff] %v2168_v0 }
  0x4f   : > { %441 = vst [vmem:[#allocation4] sm:$0xff] %v2168_v0 }
  0x50 PF: > { %v1521_v1 = vld [vmem:[%s2329_s8 + $0x20] sm:$0xf]  ;;  %v1822_v2 = vld [vmem:[%s2329_s8 + $0x2c] sm:$0xf0]  ;;  %v1820_v3 = vld [vmem:[%s2329_s8 + $0x24] sm:$0xf] }
  0x51   : > { %v1522_v4 = vor.u32 %v1822_v2, %v1521_v1  ;;  %v1523_v5 = vld [vmem:[%s2329_s8 + $0x30] sm:$0xf0]  ;;  %v1529_v6 = vld [vmem:[%s2329_s8 + $0x28] sm:$0xf]  ;;  %v1823_v7 = vld [vmem:[%s2329_s8 + $0x34] sm:$0xf0] }
  0x52   : > { %v1526_v8 = vor.u32 %v1820_v3, %v1523_v5  ;;  %v1530_v9 = vor.u32 %v1823_v7, %v1529_v6  ;;  %v1821_v10 = vld [vmem:[%s2329_s8 + $0x2c] sm:$0xf]  ;;  %v1531_v11 = vld [vmem:[%s2329_s8 + $0x38] sm:$0xf0]  ;;  %v1505_v12 = vld [vmem:[%s2329_s8] sm:$0xf] }
  0x53   : > { %513 = vmatpush.bf16.msra.mxu0 %v1522_v4  ;;  %v1534_v13 = vor.u32 %v1821_v10, %v1531_v11  ;;  %v1818_v14 = vld [vmem:[%s2329_s8 + $0xc] sm:$0xf0]  ;;  %v1816_v15 = vld [vmem:[%s2329_s8 + $0x4] sm:$0xf]  ;;  %v1507_v16 = vld [vmem:[%s2329_s8 + $0x10] sm:$0xf0] }
  0x54   : > { %527 = vmatpush.bf16.msra.mxu1 %v1526_v8  ;;  %541 = vmatpush.bf16.msra.mxu2 %v1530_v9  ;;  %v1506_v17 = vor.u32 %v1818_v14, %v1505_v12  ;;  %v1510_v18 = vor.u32 %v1816_v15, %v1507_v16  ;;  %v1513_v19 = vld [vmem:[%s2329_s8 + $0x8] sm:$0xf]  ;;  %v1819_v20 = vld [vmem:[%s2329_s8 + $0x14] sm:$0xf0]  ;;  %v1817_v21 = vld [vmem:[%s2329_s8 + $0xc] sm:$0xf] }
  0x55   : > { %555 = vmatpush.bf16.msra.mxu3 %v1534_v13  ;;  %v1514_v22 = vor.u32 %v1819_v20, %v1513_v19  ;;  %v1515_v23 = vld [vmem:[%s2329_s8 + $0x18] sm:$0xf0]  ;;  %v1656_v24 = vld [vmem:[%s2335_s5 + $0xe0] sm:$0xf]  ;;  %v1855_v25 = vld [vmem:[%s2335_s5 + $0xec] sm:$0xf0] }
  0x56   : > { %v1518_v26 = vor.u32 %v1817_v21, %v1515_v23  ;;  %v1657_v27 = vor.u32 %v1855_v25, %v1656_v24  ;;  %v1853_v28 = vld [vmem:[%s2335_s5 + $0xe4] sm:$0xf]  ;;  %v1658_v29 = vld [vmem:[%s2335_s5 + $0xf0] sm:$0xf0]  ;;  %v1664_v30 = vld [vmem:[%s2335_s5 + $0xe8] sm:$0xf] }
  0x57   : > { %514 = vmatpush.bf16.msra.mxu0 %v1506_v17  ;;  %v1661_v31 = vor.u32 %v1853_v28, %v1658_v29  ;;  %v1856_v32 = vld [vmem:[%s2335_s5 + $0xf4] sm:$0xf0]  ;;  %v1854_v33 = vld [vmem:[%s2335_s5 + $0xec] sm:$0xf]  ;;  %v1666_v34 = vld [vmem:[%s2335_s5 + $0xf8] sm:$0xf0] }
  0x58   : > { %528 = vmatpush.bf16.msra.mxu1 %v1510_v18  ;;  %542 = vmatpush.bf16.msra.mxu2 %v1514_v22  ;;  %v1665_v35 = vor.u32 %v1856_v32, %v1664_v30  ;;  %v1669_v36 = vor.u32 %v1854_v33, %v1666_v34  ;;  %v442_v37 = vld [vmem:[%s2361_s15] sm:$0xff]  ;;  %v443_v38 = vld [vmem:[%s2361_s15 + $0x8] sm:$0xff]  ;;  %vm503_vm0 = vcmask 261120   ;;  %v1640_v39 = vld [vmem:[%s2335_s5 + $0xc0] sm:$0xf]  ;;  %s1539_s25 = sshll.u32 %s2152_s27, 3 }
  0x59   : > { %556 = vmatpush.bf16.msra.mxu3 %v1518_v26  ;;  %v444_v40 = vpack.c.bf16 %v443_v38, %v442_v37  ;;  %v1851_v41 = vld [vmem:[%s2335_s5 + $0xcc] sm:$0xf0]  ;;  %v1849_v42 = vld [vmem:[%s2335_s5 + $0xc4] sm:$0xf]  ;;  %v1642_v43 = vld [vmem:[%s2335_s5 + $0xd0] sm:$0xf0] }
  0x5a   : > { %v1641_v44 = vor.u32 %v1851_v41, %v1640_v39  ;;  %v1645_v45 = vor.u32 %v1849_v42, %v1642_v43  ;;  %v1648_v46 = vld [vmem:[%s2335_s5 + $0xc8] sm:$0xf]  ;;  %v1852_v47 = vld [vmem:[%s2335_s5 + $0xd4] sm:$0xf0]  ;;  %v1850_v48 = vld [vmem:[%s2335_s5 + $0xcc] sm:$0xf] }
  0x5b   : > { %775 = vmatpush.bf16.msrb.mxu0 %v1657_v27  ;;  %1537 = vmatmul.msk.bf16.vlgmr.msra.gmra.mxu2 %vm503_vm0, %v444_v40  ;;  %v1649_v49 = vor.u32 %v1852_v47, %v1648_v46  ;;  %v1650_v50 = vld [vmem:[%s2335_s5 + $0xd8] sm:$0xf0]  ;;  %v1624_v51 = vld [vmem:[%s2335_s5 + $0xa0] sm:$0xf]  ;;  %v1847_v52 = vld [vmem:[%s2335_s5 + $0xac] sm:$0xf0] }
  0x5c   : > { %788 = vmatpush.bf16.msrb.mxu1 %v1661_v31  ;;  %801 = vmatpush.bf16.msrb.mxu2 %v1665_v35  ;;  %v1653_v53 = vor.u32 %v1850_v48, %v1650_v50  ;;  %v1845_v54 = vld [vmem:[%s2335_s5 + $0xa4] sm:$0xf]  ;;  %v1626_v55 = vld [vmem:[%s2335_s5 + $0xb0] sm:$0xf0]  ;;  %v1632_v56 = vld [vmem:[%s2335_s5 + $0xa8] sm:$0xf]  ;;  %v1625_v57 = vor.u32 %v1847_v52, %v1624_v51 }
  0x5d   : > { %814 = vmatpush.bf16.msrb.mxu3 %v1669_v36  ;;  %1535 = vmatmul.msk.bf16.vlgmr.msra.gmra.mxu0 %vm503_vm0, %v444_v40  ;;  %v1848_v58 = vld [vmem:[%s2335_s5 + $0xb4] sm:$0xf0]  ;;  %v1846_v59 = vld [vmem:[%s2335_s5 + $0xac] sm:$0xf]  ;;  %v1634_v60 = vld [vmem:[%s2335_s5 + $0xb8] sm:$0xf0]  ;;  %v1629_v61 = vor.u32 %v1845_v54, %v1626_v55 }
  0x5e   : > { %1538 = vmatmul.msk.bf16.vlgmr.msra.gmra.mxu3 %vm503_vm0, %v444_v40  ;;  %1536 = vmatmul.msk.bf16.vlgmr.msra.gmra.mxu1 %vm503_vm0, %v444_v40  ;;  %v1633_v62 = vor.u32 %v1848_v58, %v1632_v56  ;;  %v1608_v63 = vld [vmem:[%s2335_s5 + $0x80] sm:$0xf]  ;;  %v1843_v0 = vld [vmem:[%s2335_s5 + $0x8c] sm:$0xf0]  ;;  %v1841_v1 = vld [vmem:[%s2335_s5 + $0x84] sm:$0xf]  ;;  %v1637_v2 = vor.u32 %v1846_v59, %v1634_v60 }
  0x5f   : > { %776 = vmatpush.bf16.msrb.mxu0 %v1641_v44  ;;  %v1610_v3 = vld [vmem:[%s2335_s5 + $0x90] sm:$0xf0]  ;;  %v1616_v4 = vld [vmem:[%s2335_s5 + $0x88] sm:$0xf]  ;;  %v1844_v5 = vld [vmem:[%s2335_s5 + $0x94] sm:$0xf0]  ;;  %v1609_v8 = vor.u32 %v1843_v0, %v1608_v63 }
  0x60   : > { %789 = vmatpush.bf16.msrb.mxu1 %v1645_v45  ;;  %802 = vmatpush.bf16.msrb.mxu2 %v1649_v49  ;;  %v1842_v6 = vld [vmem:[%s2335_s5 + $0x8c] sm:$0xf]  ;;  %v1618_v7 = vld [vmem:[%s2335_s5 + $0x98] sm:$0xf0]  ;;  %v1613_v9 = vor.u32 %v1841_v1, %v1610_v3  ;;  %v1617_v10 = vor.u32 %v1844_v5, %v1616_v4  ;;  %v1592_v11 = vld [vmem:[%s2335_s5 + $0x60] sm:$0xf] }
  0x61   : > { %815 = vmatpush.bf16.msrb.mxu3 %v1653_v53  ;;  %v1839_v12 = vld [vmem:[%s2335_s5 + $0x6c] sm:$0xf0]  ;;  %v1837_v13 = vld [vmem:[%s2335_s5 + $0x64] sm:$0xf]  ;;  %v1621_v14 = vor.u32 %v1842_v6, %v1618_v7  ;;  %v1594_v15 = vld [vmem:[%s2335_s5 + $0x70] sm:$0xf0] }
  0x62   : > { %v1600_v16 = vld [vmem:[%s2335_s5 + $0x68] sm:$0xf]  ;;  %v1840_v17 = vld [vmem:[%s2335_s5 + $0x74] sm:$0xf0]  ;;  %v1838_v18 = vld [vmem:[%s2335_s5 + $0x6c] sm:$0xf]  ;;  %v1593_v20 = vor.u32 %v1839_v12, %v1592_v11  ;;  %v1597_v21 = vor.u32 %v1837_v13, %v1594_v15 }
  0x63   : > { %777 = vmatpush.bf16.msrb.mxu0 %v1625_v57  ;;  %v1602_v19 = vld [vmem:[%s2335_s5 + $0x78] sm:$0xf0]  ;;  %v1601_v22 = vor.u32 %v1840_v17, %v1600_v16  ;;  %v1576_v23 = vld [vmem:[%s2335_s5 + $0x40] sm:$0xf]  ;;  %v1835_v24 = vld [vmem:[%s2335_s5 + $0x4c] sm:$0xf0] }
  0x64   : > { %790 = vmatpush.bf16.msrb.mxu1 %v1629_v61  ;;  %803 = vmatpush.bf16.msrb.mxu2 %v1633_v62  ;;  %v1833_v25 = vld [vmem:[%s2335_s5 + $0x44] sm:$0xf]  ;;  %v1605_v26 = vor.u32 %v1838_v18, %v1602_v19  ;;  %v1578_v27 = vld [vmem:[%s2335_s5 + $0x50] sm:$0xf0]  ;;  %v1584_v28 = vld [vmem:[%s2335_s5 + $0x48] sm:$0xf]  ;;  %v1577_v32 = vor.u32 %v1835_v24, %v1576_v23 }
  0x65   : > { %816 = vmatpush.bf16.msrb.mxu3 %v1637_v2  ;;  %v1836_v29 = vld [vmem:[%s2335_s5 + $0x54] sm:$0xf0]  ;;  %v1834_v30 = vld [vmem:[%s2335_s5 + $0x4c] sm:$0xf]  ;;  %v1586_v31 = vld [vmem:[%s2335_s5 + $0x58] sm:$0xf0]  ;;  %v1581_v33 = vor.u32 %v1833_v25, %v1578_v27 }
  0x66   : > { %v1585_v34 = vor.u32 %v1836_v29, %v1584_v28  ;;  %v1560_v35 = vld [vmem:[%s2335_s5 + $0x20] sm:$0xf]  ;;  %v1831_v36 = vld [vmem:[%s2335_s5 + $0x2c] sm:$0xf0]  ;;  %v1829_v37 = vld [vmem:[%s2335_s5 + $0x24] sm:$0xf]  ;;  %v1589_v38 = vor.u32 %v1834_v30, %v1586_v31 }
  0x67   : > { %778 = vmatpush.bf16.msrb.mxu0 %v1609_v8  ;;  %v1562_v39 = vld [vmem:[%s2335_s5 + $0x30] sm:$0xf0]  ;;  %v1568_v40 = vld [vmem:[%s2335_s5 + $0x28] sm:$0xf]  ;;  %v1832_v41 = vld [vmem:[%s2335_s5 + $0x34] sm:$0xf0]  ;;  %v1561_v44 = vor.u32 %v1831_v36, %v1560_v35 }
  0x68   : > { %791 = vmatpush.bf16.msrb.mxu1 %v1613_v9  ;;  %804 = vmatpush.bf16.msrb.mxu2 %v1617_v10  ;;  %v1830_v42 = vld [vmem:[%s2335_s5 + $0x2c] sm:$0xf]  ;;  %v1570_v43 = vld [vmem:[%s2335_s5 + $0x38] sm:$0xf0]  ;;  %v1565_v45 = vor.u32 %v1829_v37, %v1562_v39  ;;  %v1569_v46 = vor.u32 %v1832_v41, %v1568_v40  ;;  %v1544_v47 = vld [vmem:[%s2335_s5] sm:$0xf] }
  0x69   : > { %817 = vmatpush.bf16.msrb.mxu3 %v1621_v14  ;;  %v1827_v48 = vld [vmem:[%s2335_s5 + $0xc] sm:$0xf0]  ;;  %v1825_v49 = vld [vmem:[%s2335_s5 + $0x4] sm:$0xf]  ;;  %v1573_v50 = vor.u32 %v1830_v42, %v1570_v43  ;;  %v1546_v51 = vld [vmem:[%s2335_s5 + $0x10] sm:$0xf0] }
  0x6a   : > { %v1552_v52 = vld [vmem:[%s2335_s5 + $0x8] sm:$0xf]  ;;  %v1828_v53 = vld [vmem:[%s2335_s5 + $0x14] sm:$0xf0]  ;;  %v1826_v54 = vld [vmem:[%s2335_s5 + $0xc] sm:$0xf]  ;;  %v1545_v56 = vor.u32 %v1827_v48, %v1544_v47  ;;  %v1549_v58 = vor.u32 %v1825_v49, %v1546_v51 }
  0x6b   : > { %779 = vmatpush.bf16.msrb.mxu0 %v1593_v20  ;;  %v1554_v55 = vld [vmem:[%s2335_s5 + $0x18] sm:$0xf0]  ;;  %v581_v57 = vld [vmem:[#allocation3] sm:$0xff]  ;;  %v1553_v59 = vor.u32 %v1828_v53, %v1552_v52  ;;  %v1790_v15 = vld [vmem:[%s2335_s5 + $0xe0] sm:$0xf]  ;;  %s2473_s29 = sshra.s32 %s1539_s25, 3 }
  0x6c   : > { %792 = vmatpush.bf16.msrb.mxu1 %v1597_v21  ;;  %805 = vmatpush.bf16.msrb.mxu2 %v1601_v22  ;;  %v1557_v60 = vor.u32 %v1826_v54, %v1554_v55  ;;  %v582_v61 = vpack.c.bf16 %v581_v57, %v581_v57  ;;  %v453_v62 = vld [vmem:[%s2356_s21] sm:$0xf]  ;;  %v1886_v18 = vld [vmem:[%s2335_s5 + $0xe4] sm:$0xf]  ;;  %v1792_v19 = vld [vmem:[%s2335_s5 + $0xf0] sm:$0xf0] }
  0x6d   : > { %818 = vmatpush.bf16.msrb.mxu3 %v1605_v26  ;;  %v455_v63 = vperm.slane %v453_v62, 0  ;;  %v456_v0 = vperm.slane %v453_v62, 1  ;;  %v457_v5 = vperm.slane %v453_v62, 2  ;;  %v458_v6 = vperm.slane %v453_v62, 3  ;;  %v1888_v16 = vld [vmem:[%s2335_s5 + $0xec] sm:$0xf0] }
  0x6e   : > { %v1791_v17 = vor.u32 %v1888_v16, %v1790_v15  ;;  %v1795_v21 = vor.u32 %v1886_v18, %v1792_v19  ;;  %v1798_v22 = vld [vmem:[%s2335_s5 + $0xe8] sm:$0xf]  ;;  %v1889_v23 = vld [vmem:[%s2335_s5 + $0xf4] sm:$0xf0]  ;;  %v1887_v24 = vld [vmem:[%s2335_s5 + $0xec] sm:$0xf] }
  0x6f   : > { %780 = vmatpush.bf16.msrb.mxu0 %v1577_v32  ;;  %v1799_v27 = vor.u32 %v1889_v23, %v1798_v22  ;;  %v1800_v28 = vld [vmem:[%s2335_s5 + $0xf8] sm:$0xf0]  ;;  %v1774_v31 = vld [vmem:[%s2335_s5 + $0xc0] sm:$0xf]  ;;  %v1884_v32 = vld [vmem:[%s2335_s5 + $0xcc] sm:$0xf0] }
  0x70   : > { %793 = vmatpush.bf16.msrb.mxu1 %v1581_v33  ;;  %806 = vmatpush.bf16.msrb.mxu2 %v1585_v34  ;;  %v1803_v30 = vor.u32 %v1887_v24, %v1800_v28  ;;  %v1882_v33 = vld [vmem:[%s2335_s5 + $0xc4] sm:$0xf]  ;;  %v1775_v34 = vor.u32 %v1884_v32, %v1774_v31  ;;  %v1776_v35 = vld [vmem:[%s2335_s5 + $0xd0] sm:$0xf0]  ;;  %v1782_v36 = vld [vmem:[%s2335_s5 + $0xc8] sm:$0xf] }
  0x71   : > { %819 = vmatpush.bf16.msrb.mxu3 %v1589_v38  ;;  %v1779_v37 = vor.u32 %v1882_v33, %v1776_v35  ;;  %v1885_v38 = vld [vmem:[%s2335_s5 + $0xd4] sm:$0xf0]  ;;  %v1883_v39 = vld [vmem:[%s2335_s5 + $0xcc] sm:$0xf]  ;;  %s1824_s8 = sshll.u32 %s2473_s29, 5  ;;  %s2633_s9 = ssub.s32 1, %s2152_s27 }
  0x72   : > { %v1783_v40 = vor.u32 %v1885_v38, %v1782_v36  ;;  %v1784_v41 = vld [vmem:[%s2335_s5 + $0xd8] sm:$0xf0]  ;;  %v1758_v43 = vld [vmem:[%s2335_s5 + $0xa0] sm:$0xf]  ;;  %v1760_v47 = vld [vmem:[%s2335_s5 + $0xb0] sm:$0xf0] }
  0x73   : > { %781 = vmatpush.bf16.msrb.mxu0 %v1561_v44  ;;  %v1787_v42 = vor.u32 %v1883_v39, %v1784_v41  ;;  %v1880_v44 = vld [vmem:[%s2335_s5 + $0xac] sm:$0xf0]  ;;  %v1766_v48 = vld [vmem:[%s2335_s5 + $0xa8] sm:$0xf]  ;;  %v1881_v49 = vld [vmem:[%s2335_s5 + $0xb4] sm:$0xf0] }
  0x74   : > { %794 = vmatpush.bf16.msrb.mxu1 %v1565_v45  ;;  %807 = vmatpush.bf16.msrb.mxu2 %v1569_v46  ;;  %v1878_v45 = vld [vmem:[%s2335_s5 + $0xa4] sm:$0xf]  ;;  %v1759_v46 = vor.u32 %v1880_v44, %v1758_v43  ;;  %v1767_v51 = vor.u32 %v1881_v49, %v1766_v48  ;;  %v1879_v52 = vld [vmem:[%s2335_s5 + $0xac] sm:$0xf]  ;;  %v1768_v53 = vld [vmem:[%s2335_s5 + $0xb8] sm:$0xf0] }
  0x75   : > { %820 = vmatpush.bf16.msrb.mxu3 %v1573_v50  ;;  %v1763_v50 = vor.u32 %v1878_v45, %v1760_v47  ;;  %v1771_v54 = vor.u32 %v1879_v52, %v1768_v53  ;;  %v1742_v55 = vld [vmem:[%s2335_s5 + $0x80] sm:$0xf]  ;;  %v1874_v57 = vld [vmem:[%s2335_s5 + $0x84] sm:$0xf]  ;;  %s2500_s20 = scalar_lea.vmem [#allocation2], %s1824_s8  ;;  %s2549_s10 = sshll.u32 %s2633_s9, 3 }
  0x76   : > { %v1873_v15 = vld [vmem:[%s2335_s5 + $0x74] sm:$0xf0]  ;;  %v1871_v16 = vld [vmem:[%s2335_s5 + $0x6c] sm:$0xf]  ;;  %v1710_v22 = vld [vmem:[%s2335_s5 + $0x40] sm:$0xf]  ;;  %s1226_s28 = scalar_lea.vmem %s2373_s13, %s2549_s10 [#allocation9] }
  0x77   : > { %782 = vmatpush.bf16.msrb.mxu0 %v1545_v56  ;;  %v1876_v56 = vld [vmem:[%s2335_s5 + $0x8c] sm:$0xf0]  ;;  %v1867_v31 = vld [vmem:[%s2335_s5 + $0x4c] sm:$0xf]  ;;  %v1862_v39 = vld [vmem:[%s2335_s5 + $0x24] sm:$0xf] }
  0x78   : > { %795 = vmatpush.bf16.msrb.mxu1 %v1549_v58  ;;  %808 = vmatpush.bf16.msrb.mxu2 %v1553_v59  ;;  %v1743_v58 = vor.u32 %v1876_v56, %v1742_v55  ;;  %v1744_v59 = vld [vmem:[%s2335_s5 + $0x90] sm:$0xf0]  ;;  %v1868_v23 = vld [vmem:[%s2335_s5 + $0x4c] sm:$0xf0]  ;;  %v1702_v44 = vld [vmem:[%s2335_s5 + $0x28] sm:$0xf] }
  0x79   : > { %821 = vmatpush.bf16.msrb.mxu3 %v1557_v60  ;;  %v1750_v60 = vld [vmem:[%s2335_s5 + $0x88] sm:$0xf]  ;;  %v1747_v62 = vor.u32 %v1874_v57, %v1744_v59  ;;  %v1864_v38 = vld [vmem:[%s2335_s5 + $0x2c] sm:$0xf0]  ;;  %v1696_v43 = vld [vmem:[%s2335_s5 + $0x30] sm:$0xf0] }
  0x7a   : > { %783 = vmatmul.bf16.vlgmr.msrb.gmra.mxu0 %v582_v61  ;;  %v1865_v45 = vld [vmem:[%s2335_s5 + $0x34] sm:$0xf0]  ;;  %v1699_v48 = vor.u32 %v1862_v39, %v1696_v43  ;;  %v1678_v55 = vld [vmem:[%s2335_s5] sm:$0xf]  ;;  %v1860_v56 = vld [vmem:[%s2335_s5 + $0xc] sm:$0xf0] }
  0x7b   : > { %796 = vmatmul.bf16.vlgmr.msrb.gmra.mxu1 %v582_v61  ;;  %809 = vmatmul.bf16.vlgmr.msrb.gmra.mxu2 %v582_v61  ;;  %v1703_v49 = vor.u32 %v1865_v45, %v1702_v44  ;;  %v1679_v59 = vor.u32 %v1860_v56, %v1678_v55  ;;  %s901_s18 = sshra.s32 %s2549_s10, 3  ;;  %p1807_p7 = scmp.ne.s32.totalorder %s2148_s26, 3 }
  0x7c   : > { %822 = vmatmul.bf16.vlgmr.msrb.gmra.mxu3 %v582_v61  ;;  %1104 = vmatpush.bf16.msra.mxu0 %v1791_v17  ;;  %v1736_v17 = vld [vmem:[%s2335_s5 + $0x78] sm:$0xf0]  ;;  %s1857_s19 = sshll.u32 %s901_s18, 5 }
  0x7d   : > { %1117 = vmatpush.bf16.msra.mxu1 %v1795_v21  ;;  %1130 = vmatpush.bf16.msra.mxu2 %v1799_v27  ;;  %v1712_v27 = vld [vmem:[%s2335_s5 + $0x50] sm:$0xf0]  ;;  %s905_s23 = scalar_lea.vmem [#allocation2], %s1857_s19 }
  0x7e   : > { %1143 = vmatpush.bf16.msra.mxu3 %v1803_v30  ;;  %v1869_v30 = vld [vmem:[%s2335_s5 + $0x54] sm:$0xf0] }
  0x80   : > { %1105 = vmatpush.bf16.msra.mxu0 %v1775_v34  ;;  %v1720_v34 = vld [vmem:[%s2335_s5 + $0x58] sm:$0xf0] }
  0x81   : > { %1118 = vmatpush.bf16.msra.mxu1 %v1779_v37  ;;  %1131 = vmatpush.bf16.msra.mxu2 %v1783_v40  ;;  %v1723_v36 = vor.u32 %v1867_v31, %v1720_v34  ;;  %v1694_v37 = vld [vmem:[%s2335_s5 + $0x20] sm:$0xf] }
  0x82   : > { %1144 = vmatpush.bf16.msra.mxu3 %v1787_v42  ;;  %v1695_v42 = vor.u32 %v1864_v38, %v1694_v37 }
  0x84   : > { %1106 = vmatpush.bf16.msra.mxu0 %v1759_v46 }
  0x85   : > { %1119 = vmatpush.bf16.msra.mxu1 %v1763_v50  ;;  %1132 = vmatpush.bf16.msra.mxu2 %v1767_v51  ;;  %v1863_v50 = vld [vmem:[%s2335_s5 + $0x2c] sm:$0xf]  ;;  %v1704_v51 = vld [vmem:[%s2335_s5 + $0x38] sm:$0xf0] }
  0x86   : > { %1145 = vmatpush.bf16.msra.mxu3 %v1771_v54  ;;  %v1707_v52 = vor.u32 %v1863_v50, %v1704_v51 }
  0x88   : > { %1107 = vmatpush.bf16.msra.mxu0 %v1743_v58 }
  0x89   : > { %1120 = vmatpush.bf16.msra.mxu1 %v1747_v62 }
  0xda   : > { %v516_v1 = vpop.f32.mrf.mxu0 }
  0xdb   : > { %v517_v2 = vadd.f32 %v516_v1, %v455_v63  ;;  %v530_v3 = vpop.f32.mrf.mxu1  ;;  %v1752_v1 = vld [vmem:[%s2335_s5 + $0x98] sm:$0xf0] }
  0xdc   : > { %v531_v4 = vadd.f32 %v530_v3, %v456_v0 }
  0xdd   : > { %563 = vst [vmem:[#allocation2] sm:$0xff] %v517_v2 }
  0xde   : > { %564 = vst [vmem:[#allocation2 + $0x8] sm:$0xff] %v531_v4  ;;  %v544_v7 = vpop.f32.mrf.mxu2 }
  0xdf   : > { %v545_v8 = vadd.f32 %v544_v7, %v457_v5 }
  0xe1   : > { %v558_v9 = vpop.f32.mrf.mxu3  ;;  %565 = vst [vmem:[#allocation2 + $0x10] sm:$0xff] %v545_v8 }
  0xe2   : > { %v559_v10 = vadd.f32 %v558_v9, %v458_v6  ;;  %v518_v11 = vpop.f32.mrf.mxu0  ;;  %v1870_v9 = vld [vmem:[%s2335_s5 + $0x64] sm:$0xf] }
  0xe3   : > { %v519_v12 = vadd.f32 %v518_v11, %v455_v63  ;;  %v532_v13 = vpop.f32.mrf.mxu1  ;;  %v1877_v63 = vld [vmem:[%s2335_s5 + $0x94] sm:$0xf0]  ;;  %v1734_v11 = vld [vmem:[%s2335_s5 + $0x68] sm:$0xf] }
  0xe4   : > { %566 = vst [vmem:[#allocation2 + $0x18] sm:$0xff] %v559_v10  ;;  %v533_v14 = vadd.f32 %v532_v13, %v456_v0  ;;  %v1875_v0 = vld [vmem:[%s2335_s5 + $0x8c] sm:$0xf]  ;;  %v1751_v3 = vor.u32 %v1877_v63, %v1750_v60  ;;  %v1728_v10 = vld [vmem:[%s2335_s5 + $0x70] sm:$0xf0]  ;;  %v1735_v19 = vor.u32 %v1873_v15, %v1734_v11 }
  0xe5   : > { %567 = vst [vmem:[#allocation2 + $0x20] sm:$0xff] %v519_v12  ;;  %v1755_v4 = vor.u32 %v1875_v0, %v1752_v1  ;;  %v1858_v60 = vld [vmem:[%s2335_s5 + $0x4] sm:$0xf]  ;;  %v1686_v0 = vld [vmem:[%s2335_s5 + $0x8] sm:$0xf] }
  0xe6   : > { %568 = vst [vmem:[#allocation2 + $0x28] sm:$0xff] %v533_v14  ;;  %v546_v20 = vpop.f32.mrf.mxu2  ;;  %1133 = vmatpush.bf16.msra.mxu2 %v1751_v3  ;;  %v1731_v14 = vor.u32 %v1870_v9, %v1728_v10  ;;  %v1861_v1 = vld [vmem:[%s2335_s5 + $0x14] sm:$0xf0] }
  0xe7   : > { %v547_v25 = vadd.f32 %v546_v20, %v457_v5  ;;  %v1726_v5 = vld [vmem:[%s2335_s5 + $0x60] sm:$0xf]  ;;  %1146 = vmatpush.bf16.msra.mxu3 %v1755_v4  ;;  %v1739_v20 = vor.u32 %v1871_v16, %v1736_v17  ;;  %v1688_v4 = vld [vmem:[%s2335_s5 + $0x18] sm:$0xf0] }
  0xe8   : > { %1121 = vmatpush.bf16.msra.mxu1 %v1731_v14 }
  0xe9   : > { %v560_v26 = vpop.f32.mrf.mxu3  ;;  %569 = vst [vmem:[#allocation2 + $0x30] sm:$0xff] %v547_v25  ;;  %v1711_v25 = vor.u32 %v1868_v23, %v1710_v22 }
  0xea   : > { %v561_v29 = vadd.f32 %v560_v26, %v458_v6  ;;  %v1872_v6 = vld [vmem:[%s2335_s5 + $0x6c] sm:$0xf0]  ;;  %v1866_v26 = vld [vmem:[%s2335_s5 + $0x44] sm:$0xf]  ;;  %1134 = vmatpush.bf16.msra.mxu2 %v1735_v19 }
  0xeb   : > { %v1727_v8 = vor.u32 %v1872_v6, %v1726_v5  ;;  %1147 = vmatpush.bf16.msra.mxu3 %v1739_v20  ;;  %v1715_v28 = vor.u32 %v1866_v26, %v1712_v27  ;;  %v1687_v6 = vor.u32 %v1861_v1, %v1686_v0 }
  0xec   : > { %570 = vst [vmem:[#allocation2 + $0x38] sm:$0xff] %v561_v29  ;;  %v1718_v29 = vld [vmem:[%s2335_s5 + $0x48] sm:$0xf] }
  0xed   : > { %1108 = vmatpush.bf16.msra.mxu0 %v1727_v8  ;;  %v1719_v33 = vor.u32 %v1869_v30, %v1718_v29  ;;  %1122 = vmatpush.bf16.msra.mxu1 %v1715_v28  ;;  %v889_v30 = vld [vmem:[#allocation4] sm:$0xff] }
  0xef   : > { %1135 = vmatpush.bf16.msra.mxu2 %v1719_v33  ;;  %1148 = vmatpush.bf16.msra.mxu3 %v1723_v36 }
  0xf1   : > { %1109 = vmatpush.bf16.msra.mxu0 %v1711_v25  ;;  %1123 = vmatpush.bf16.msra.mxu1 %v1699_v48 }
  0xf3   : > { %v577_v61 = vld [vmem:[%s2500_s20] sm:$0xff]  ;;  %v578_v2 = vld [vmem:[%s2500_s20 + $0x8] sm:$0xff]  ;;  %v580_v32 = vld [vmem:[%s2500_s20 + $0x18] sm:$0xff]  ;;  %1136 = vmatpush.bf16.msra.mxu2 %v1703_v49  ;;  %1149 = vmatpush.bf16.msra.mxu3 %v1707_v52 }
  0xf4   : > { %v579_v9 = vld [vmem:[%s2500_s20 + $0x10] sm:$0xff]  ;;  %v906_v50 = vld [vmem:[%s905_s23] sm:$0xff]  ;;  %v907_v52 = vld [vmem:[%s905_s23 + $0x8] sm:$0xff] }
  0xf5   : > { %1110 = vmatpush.bf16.msra.mxu0 %v1695_v42 }
  0xf7   : > { %v784_v7 = vpop.f32.mrf.mxu0  ;;  %1137 = vmatpush.bf16.msra.mxu2 %v1687_v6 }
  0xf8   : > { %v827_v12 = vadd.f32 %v784_v7, %v577_v61  ;;  %v797_v13 = vpop.f32.mrf.mxu1  ;;  %v1680_v61 = vld [vmem:[%s2335_s5 + $0x10] sm:$0xf0] }
  0xf9   : > { %v828_v18 = vadd.f32 %v797_v13, %v578_v2  ;;  %v1683_v63 = vor.u32 %v1858_v60, %v1680_v61  ;;  %1111 = vmatpush.bf16.msra.mxu0 %v1679_v59  ;;  %v1859_v2 = vld [vmem:[%s2335_s5 + $0xc] sm:$0xf]  ;;  %s897_s5 = scalar_lea.vmem %s2373_s13, %s1539_s25 [#allocation9] }
  0xfa   : > { %v1670_v21 = vmul.f32 -1.442695, %v827_v12  ;;  %v1691_v7 = vor.u32 %v1859_v2, %v1688_v4  ;;  %v909_v59 = vld [vmem:[%s905_s23 + $0x18] sm:$0xff] }
  0xfb   : > { %v1671_v24 = vmul.f32 -1.442695, %v828_v18  ;;  %1124 = vmatpush.bf16.msra.mxu1 %v1683_v63 }
  0xfc   : > { %1986 = vpow2.f32 %v1670_v21  ;;  %1150 = vmatpush.bf16.msra.mxu3 %v1691_v7 }
  0xfd   : > { %1988 = vpow2.f32 %v1671_v24 }
  0xfe   : > { %v810_v35 = vpop.f32.mrf.mxu2 }
  0xff   : > { %v823_v40 = vpop.f32.mrf.mxu3  ;;  %v786_v41 = vpop.f32.mrf.mxu0  ;;  %v829_v11 = vadd.f32 %v810_v35, %v579_v9 }
 0x100   : > { %v830_v46 = vadd.f32 %v823_v40, %v580_v32  ;;  %v799_v47 = vpop.f32.mrf.mxu1 }
 0x102   : > { %v1987_v53 = vpop.eup %1986  ;;  %v1672_v54 = vmul.f32 -1.442695, %v830_v46 }
 0x103   : > { %v1989_v57 = vpop.eup %1988  ;;  %v834_v58 = vadd.f32 1.0, %v1987_v53 }
 0x104   : > { %v853_v62 = vadd.f32 1.0, %v1989_v57  ;;  %1990 = vpow2.f32 %v1672_v54 }
 0x105   : > { %1992 = vrcp.f32 %v834_v58  ;;  %v846_v18 = vand.u32 2147483648, %v834_v58  ;;  %v844_v21 = vand.u32 2147483647, %v834_v58  ;;  %vm840_vm3 = vweird.f32 %v834_v58 }
 0x106   : > { %1994 = vrcp.f32 %v853_v62  ;;  %v812_v3 = vpop.f32.mrf.mxu2  ;;  %v865_v19 = vand.u32 2147483648, %v853_v62  ;;  %v863_v23 = vand.u32 2147483647, %v853_v62  ;;  %vm859_vm4 = vweird.f32 %v853_v62 }
 0x107   : > { %v825_v5 = vpop.f32.mrf.mxu3  ;;  %v847_v26 = vor.u32 1.1754944e-38, %v846_v18  ;;  %vm845_vm7 = vcmp.eq.f32.partialorder %v844_v21, 8.507059e+37 }
 0x108   : > { %v866_v28 = vor.u32 1.1754944e-38, %v865_v19  ;;  %vm864_vm8 = vcmp.eq.f32.partialorder %v863_v23, 8.507059e+37 }
 0x10a   : > { %v1991_v8 = vpop.eup %1990 }
 0x10b   : > { %v1993_v10 = vpop.eup %1992  ;;  %v873_v12 = vadd.f32 1.0, %v1991_v8  ;;  %v908_v8 = vld [vmem:[%s905_s23 + $0x10] sm:$0xff] }
 0x10c   : > { %v1995_v13 = vpop.eup %1994  ;;  %v836_v14 = vmul.f32 %v1993_v10, %v834_v58  ;;  %vm841_vm1 = vweird.f32 %v1993_v10 }
 0x10d   : > { %v855_v15 = vmul.f32 %v1995_v13, %v853_v62  ;;  %1996 = vrcp.f32 %v873_v12  ;;  %vm860_vm2 = vweird.f32 %v1995_v13  ;;  %vm842_vm5 = vmor %vm840_vm3, %vm841_vm1  ;;  %v885_v42 = vand.u32 2147483648, %v873_v12 }
 0x10e   : > { %v837_v16 = vsub.f32 1.0, %v836_v14  ;;  %1998 = vtanh.f32 %v829_v11  ;;  %vm861_vm6 = vmor %vm859_vm4, %vm860_vm2  ;;  %vm879_vm10 = vweird.f32 %v873_v12  ;;  %v883_v43 = vand.u32 2147483647, %v873_v12 }
 0x10f   : > { %v856_v17 = vsub.f32 1.0, %v855_v15  ;;  %v886_v45 = vor.u32 1.1754944e-38, %v885_v42 }
 0x110   : > { %v838_v20 = vmul.f32 %v1993_v10, %v837_v16  ;;  %vm884_vm12 = vcmp.eq.f32.partialorder %v883_v43, 8.507059e+37 }
 0x111   : > { %v857_v22 = vmul.f32 %v1995_v13, %v856_v17 }
 0x112   : > { %v839_v24 = vadd.f32 %v1993_v10, %v838_v20 }
 0x113   : > { %v1997_v25 = vpop.eup %1996  ;;  %v858_v27 = vadd.f32 %v1995_v13, %v857_v22 }
 0x114   : > { %v843_v29 = vsel %vm842_vm5, %v1993_v10, %v839_v24  ;;  %v875_v31 = vmul.f32 %v1997_v25, %v873_v12  ;;  %v1999_v32 = vpop.eup %1998  ;;  %vm880_vm9 = vweird.f32 %v1997_v25 }
 0x115   : > { %v848_v33 = vsel %vm845_vm7, %v847_v26, %v843_v29  ;;  %v862_v34 = vsel %vm861_vm6, %v1995_v13, %v858_v27  ;;  %vm881_vm11 = vmor %vm879_vm10, %vm880_vm9 }
 0x116   : > { %v867_v35 = vsel %vm864_vm8, %v866_v28, %v862_v34  ;;  %v891_v36 = vmul.f32 %v1999_v32, %v848_v33  ;;  %v876_v37 = vsub.f32 1.0, %v875_v31 }
 0x117   : > { %v890_v38 = vmul.f32 %v889_v30, %v867_v35 }
 0x118   : > { %v877_v39 = vmul.f32 %v1997_v25, %v876_v37 }
 0x119   : > { %v2541_v40 = vadd.f32 %v891_v36, %v890_v38 }
 0x11a   : > { %v878_v41 = vadd.f32 %v1997_v25, %v877_v39 }
 0x11b   : > { %2000 = vtanh.f32 %v2541_v40 }
 0x11c   : > { %v882_v44 = vsel %vm881_vm11, %v1997_v25, %v878_v41 }
 0x11d   : > { %v887_v47 = vsel %vm884_vm12, %v886_v45, %v882_v44 }
 0x121   : > { %v2001_v46 = vpop.eup %2000 }
 0x122   : > { %v894_v48 = vmul.f32 %v2001_v46, %v887_v47 }
 0x124   : > { %898 = vst [vmem:[%s897_s5] sm:$0xff] %v894_v48  ;;  %v911_v49 = vpack.c.bf16 %v894_v48, %v894_v48 }
 0x126   : > { %1112 = vmatmul.bf16.vlgmr.msra.gmra.mxu0 %v911_v49  ;;  %1125 = vmatmul.bf16.vlgmr.msra.gmra.mxu1 %v911_v49 }
 0x127   : > { %1138 = vmatmul.bf16.vlgmr.msra.gmra.mxu2 %v911_v49  ;;  %1151 = vmatmul.bf16.vlgmr.msra.gmra.mxu3 %v911_v49 }
 0x1a3   : > { %v1113_v51 = vpop.f32.mrf.mxu0  ;;  %v1126_v53 = vpop.f32.mrf.mxu1 }
 0x1a4   : > { %v1156_v54 = vadd.f32 %v1113_v51, %v906_v50  ;;  %v1157_v55 = vadd.f32 %v1126_v53, %v907_v52 }
 0x1a6   : > { %v1804_v56 = vmul.f32 -1.442695, %v1156_v54  ;;  %v1805_v57 = vmul.f32 -1.442695, %v1157_v55 }
 0x1a8   : > { %2002 = vpow2.f32 %v1804_v56 }
 0x1a9   : > { %2004 = vpow2.f32 %v1805_v57 }
 0x1aa   : > { %v1139_v58 = vpop.f32.mrf.mxu2  ;;  %v1152_v60 = vpop.f32.mrf.mxu3 }
 0x1ab   : > { %v1159_v61 = vadd.f32 %v1152_v60, %v909_v59  ;;  %v1115_v62 = vpop.f32.mrf.mxu0  ;;  %v1128_v63 = vpop.f32.mrf.mxu1  ;;  %v1158_v11 = vadd.f32 %v1139_v58, %v908_v8 }
 0x1ad   : > { %v1806_v0 = vmul.f32 -1.442695, %v1159_v61 }
 0x1ae   : > { %v2003_v1 = vpop.eup %2002 }
 0x1af   : > { %v2005_v2 = vpop.eup %2004  ;;  %v1163_v3 = vadd.f32 1.0, %v2003_v1  ;;  %2006 = vpow2.f32 %v1806_v0 }
 0x1b0   : > { %v1182_v4 = vadd.f32 1.0, %v2005_v2 }
 0x1b1   : > { %2008 = vrcp.f32 %v1163_v3  ;;  %v1175_v17 = vand.u32 2147483648, %v1163_v3  ;;  %v1173_v20 = vand.u32 2147483647, %v1163_v3  ;;  %vm1169_vm15 = vweird.f32 %v1163_v3 }
 0x1b2   : > { %2010 = vrcp.f32 %v1182_v4  ;;  %v1141_v5 = vpop.f32.mrf.mxu2  ;;  %v1154_v6 = vpop.f32.mrf.mxu3  ;;  %v1194_v18 = vand.u32 2147483648, %v1182_v4  ;;  %v1192_v22 = vand.u32 2147483647, %v1182_v4  ;;  %vm1188_vm0 = vweird.f32 %v1182_v4 }
 0x1b3   : > { %v1176_v25 = vor.u32 1.1754944e-38, %v1175_v17  ;;  %vm1174_vm3 = vcmp.eq.f32.partialorder %v1173_v20, 8.507059e+37 }
 0x1b4   : > { %v1195_v28 = vor.u32 1.1754944e-38, %v1194_v18  ;;  %vm1193_vm4 = vcmp.eq.f32.partialorder %v1192_v22, 8.507059e+37 }
 0x1b5   : > { %v2007_v7 = vpop.eup %2006 }
 0x1b6   : > { %v1202_v9 = vadd.f32 1.0, %v2007_v7 }
 0x1b7   : > { %v2009_v10 = vpop.eup %2008 }
 0x1b8   : > { %v2011_v12 = vpop.eup %2010  ;;  %v1165_v13 = vmul.f32 %v2009_v10, %v1163_v3  ;;  %2012 = vrcp.f32 %v1202_v9  ;;  %vm1170_vm13 = vweird.f32 %v2009_v10  ;;  %v1214_v41 = vand.u32 2147483648, %v1202_v9 }
 0x1b9   : > { %v1184_v14 = vmul.f32 %v2011_v12, %v1182_v4  ;;  %2014 = vtanh.f32 %v1158_v11  ;;  %vm1189_vm14 = vweird.f32 %v2011_v12  ;;  %vm1171_vm1 = vmor %vm1169_vm15, %vm1170_vm13  ;;  %vm1208_vm6 = vweird.f32 %v1202_v9 }
 0x1ba   : > { %v1166_v15 = vsub.f32 1.0, %v1165_v13  ;;  %vm1190_vm2 = vmor %vm1188_vm0, %vm1189_vm14  ;;  %v1212_v42 = vand.u32 2147483647, %v1202_v9  ;;  %v1215_v44 = vor.u32 1.1754944e-38, %v1214_v41 }
 0x1bb   : > { %v1185_v16 = vsub.f32 1.0, %v1184_v14 }
 0x1bc   : > { %v1167_v19 = vmul.f32 %v2009_v10, %v1166_v15  ;;  %vm1213_vm8 = vcmp.eq.f32.partialorder %v1212_v42, 8.507059e+37 }
 0x1bd   : > { %v1186_v21 = vmul.f32 %v2011_v12, %v1185_v16 }
 0x1be   : > { %v2013_v23 = vpop.eup %2012  ;;  %v1168_v24 = vadd.f32 %v2009_v10, %v1167_v19 }
 0x1bf   : > { %v1187_v26 = vadd.f32 %v2011_v12, %v1186_v21  ;;  %v1204_v27 = vmul.f32 %v2013_v23, %v1202_v9  ;;  %v2015_v30 = vpop.eup %2014  ;;  %vm1209_vm5 = vweird.f32 %v2013_v23 }
 0x1c0   : > { %v1172_v29 = vsel %vm1171_vm1, %v2009_v10, %v1168_v24  ;;  %vm1210_vm7 = vmor %vm1208_vm6, %vm1209_vm5 }
 0x1c1   : > { %v1177_v31 = vsel %vm1174_vm3, %v1176_v25, %v1172_v29  ;;  %v1191_v32 = vsel %vm1190_vm2, %v2011_v12, %v1187_v26  ;;  %v1205_v33 = vsub.f32 1.0, %v1204_v27 }
 0x1c2   : > { %v1196_v34 = vsel %vm1193_vm4, %v1195_v28, %v1191_v32  ;;  %v1220_v35 = vmul.f32 %v2015_v30, %v1177_v31 }
 0x1c3   : > { %v1219_v36 = vmul.f32 %v1196_v34, %v2541_v40  ;;  %v1206_v37 = vmul.f32 %v2013_v23, %v1205_v33 }
 0x1c5   : > { %v1221_v38 = vadd.f32 %v1220_v35, %v1219_v36  ;;  %v1207_v39 = vadd.f32 %v2013_v23, %v1206_v37 }
 0x1c7   : > { %2016 = vtanh.f32 %v1221_v38  ;;  %1225 = vst [vmem:[#allocation4] sm:$0xff] %v1221_v38  ;;  %v1211_v43 = vsel %vm1210_vm7, %v2013_v23, %v1207_v39 }
 0x1c8   : > { %v1216_v46 = vsel %vm1213_vm8, %v1215_v44, %v1211_v43 }
 0x1cd   : > { %v2017_v45 = vpop.eup %2016  ;;  %1231 = sbr.rel (%p1807_p7) target bundleno = 473 (0x1d9), region = 52 }
 0x1ce   : > { %v1223_v47 = vmul.f32 %v2017_v45, %v1216_v46 }
 0x1d0   : > { %1224 = vst [vmem:[#allocation3] sm:$0xff] %v1223_v47 }
 0x1d1   : > { %1227 = vst [vmem:[%s1226_s28] sm:$0xff] %v1223_v47 }
 0x1d2   : > { %v1234_v48 = vld [vmem:[#allocation4] sm:$0xff] }
 0x1d3   : > { %1235 = vst [vmem:[%s2371_s11] sm:$0xff] %v1234_v48 }
 0x1d7   : > { %v1232_v40 = vld [vmem:[#allocation3] sm:$0xff] }
 0x1d8   : > { %1233 = vst [vmem:[%s2366_s2] sm:$0xff] %v1232_v40 }
 0x1d9 PF: > { %1250 = sbr.rel (!%p2293_p11) target bundleno = 483 (0x1e3), region = 56  ;;  %s1890_s6 = sshll.u32 (%p2293_p11), %s2349_s7, 2 }
 0x1da   : > { %s1258_s21 = sadd.s32 (%p2293_p11), %s2152_s27, %s1890_s6  ;;  %s2634_s1 = sld [smem:[#allocation21_spill]] (%p2293_p11) }
 0x1db   : > { %s1811_s14 = sshll.u32 (%p2293_p11), %s1258_s21, 3 }
 0x1df   : > { %v1291_v49 = vld [vmem:[%s2373_s13] sm:$0xff]  ;;  %v1293_v50 = vld [vmem:[%s2373_s13 + $0x8] sm:$0xff] }
 0x1e0   : > { %s1260_s15 = scalar_lea.vmem %s2634_s1, %s1811_s14 }
 0x1e1   : > { %1292 = vst [vmem:[%s1260_s15] sm:$0xff] %v1291_v49 }
 0x1e2   : > { %1294 = vst [vmem:[%s1260_s15 + $0x10] sm:$0xff] %v1293_v50 }
 0x1e3 PF: > { %s23_s30 = sadd.s32 1, %s2164_s30   ;;  %s2635_s2 = sld [smem:[#allocation12_spill]] }
 0x1e4   : > { %p20_p8 = scmp.ge.s32.totalorder %s23_s30, 10   ;;  %s2636_s25 = sld [smem:[#allocation17_spill]] }
 0x1e5   : > { %s2637_s26 = sld [smem:[#allocation13_spill]]  ;;  %s2641_s21 = smov %s2132_s22 }
 0x1e6   : > { %s2638_s27 = sld [smem:[#allocation14_spill]]  ;;  %s2642_s22 = smov %s2303_s17 }
 0x1e7   : > { %s2639_s28 = sld [smem:[#allocation15_spill]]  ;;  %s2643_s23 = smov %s2140_s24 }
 0x1e8   : > { %s2640_s29 = sld [smem:[#allocation16_spill]]  ;;  %22 = sbr.rel (!%p20_p8) target bundleno = 15 (0xf), region = 169 }
 0x1e9   : > { %s2644_s24 = smov %s2635_s2 }
 0x1ed   :  { %1330 = vsyncpa [#allocation6], 1 }
 0x1ee   :  { %1332 = vsyncpa [#allocation6 + $0x1], 1 }
 0x1ef   :  { %1333 = vsyncpa [#allocation8], 1 }
 0x1f0   :  { %1335 = vsyncpa [#allocation8 + $0x1], 1 }

// kernel: encoder_forward.5
= control target key start
LH: loop header
LB: loop body
LE: loop exit
PB: predicated region body
PF: predicated region fallthrough
CT: control target
= control target key end

     0   :  { %s3390_s0 = inlined_call_operand.vmem [shape: f32[64,256], index: 0, kind: input, shape index: {}]   ;;  %s3391_s1 = inlined_call_operand.hbm [shape: bf16[2,256,512], index: 1, kind: input, shape index: {}]   ;;  %s3392_s2 = inlined_call_operand.hbm [shape: bf16[2,128,512], index: 2, kind: input, shape index: {}]   ;;  %s3393_s3 = inlined_call_operand.vmem [shape: f32[2,1,512], index: 3, kind: input, shape index: {}]   ;;  %s3394_s4 = inlined_call_operand.vmem [shape: f32[64,256], index: 4, kind: output, shape index: {0}]   ;;  %s3395_s5 = inlined_call_operand.vmem [shape: f32[2,8,128], index: 5, kind: output, shape index: {1}]   ;;  %s3396_s6 = inlined_call_operand.vmem [shape: f32[2,8,128], index: 6, kind: output, shape index: {2}]  }
   0x1   :  { %3404 = sst [smem:[#allocation18_spill]] %s3390_s0 }
   0x2   :  { %3405 = sst [smem:[#allocation19_spill]] %s3391_s1 }
   0x3   :  { %3406 = sst [smem:[#allocation20_spill]] %s3392_s2 }
   0x4   :  { %3407 = sst [smem:[#allocation21_spill]] %s3394_s4 }
   0x5   :  { %3408 = sst [smem:[#allocation22_spill]] %s3395_s5 }
   0x6   :  { %3409 = sst [smem:[#allocation23_spill]] %s3396_s6 }
   0x7   :  { %12 = vsyncpa [#allocation6], 0 }
   0x8   :  { %14 = vsyncpa [#allocation6 + $0x1], 0 }
   0x9   :  { %15 = vsyncpa [#allocation8], 0 }
   0xa   :  { %17 = vsyncpa [#allocation8 + $0x1], 0  ;;  %s2875_s21 = smov 0   ;;  %s2877_s22 = smov 0  }
   0xb   :  { %s2879_s23 = smov 0   ;;  %s2881_s24 = smov 0  }
   0xc   :  { %s2883_s25 = smov 0   ;;  %s2885_s26 = smov 0  }
   0xd   :  { %s2887_s27 = smov 0   ;;  %s2889_s28 = smov 0  }
   0xe   :  { %s2891_s29 = smov 0   ;;  %s2893_s30 = smov 0  }
   0xf LB: > { %3410 = sst [smem:[#allocation12_spill]] %s2815_s25  ;;  %s3397_s7 = sadd.s32 4294967295, %s2835_s30   ;;  %s2835_s30 = sphi %s2893_s30, %s23_s30   ;;  %s2831_s29 = sphi %s2891_s29, %s3433_s29   ;;  %s2827_s28 = sphi %s2889_s28, %s3432_s28   ;;  %s2823_s27 = sphi %s2887_s27, %s3431_s27   ;;  %s2819_s26 = sphi %s2885_s26, %s3430_s26   ;;  %s2815_s25 = sphi %s2883_s25, %s3429_s25   ;;  %s2811_s24 = sphi %s2881_s24, %s3437_s24   ;;  %s2807_s23 = sphi %s2879_s23, %s3436_s23   ;;  %s2803_s22 = sphi %s2877_s22, %s3435_s22   ;;  %s2799_s21 = sphi %s2875_s21, %s3434_s21  }
  0x10   : > { %3411 = sst [smem:[#allocation13_spill]] %s2827_s28  ;;  %s32_s8 = sadd.s32 1, %s2827_s28 }
  0x11   : > { %3412 = sst [smem:[#allocation14_spill]] %s2831_s29  ;;  %p33_p0 = scmp.ge.s32.totalorder %s32_s8, 4 }
  0x12   : > { %s35_s9 = sadd.s32 1, %s2831_s29  ;;  %s78_s10 = sadd.s32 1, %s2815_s25 }
  0x13   : > { %p85_p1 = scmp.ne.s32.totalorder %s2815_s25, %s2811_s24  ;;  %s3439_s8 = smov (%p33_p0, %s32_s8), 0 }
  0x14   : > { %3413 = sst [smem:[#allocation15_spill]] %s3439_s8  ;;  %s3441_s9 = smov (!%p33_p0, %s35_s9), %s2831_s29 }
  0x15   : > { %p86_p2 = scmp.eq.s32.totalorder %s2835_s30, 0  ;;  %p91_p3 = scmp.ne.s32.totalorder %s2811_s24, %s2807_s23 }
  0x16   : > { %p37_p4 = scmp.ge.s32.totalorder %s3441_s9, 2  ;;  %p92_p5 = scmp.eq.s32.totalorder %s3397_s7, 0 }
  0x17   : > { %p2936_p6 = por %p86_p2, %p85_p1  ;;  %s153_s12 = ssub.s32 1, %s2831_s29 }
  0x18   : > { %s3443_s9 = smov (%p37_p4, %s3441_s9), 0  ;;  %p2943_p7 = por %p92_p5, %p91_p3 }
  0x19   : > { %3415 = sst [smem:[#allocation16_spill]] %s3443_s9  ;;  %s154_s14 = smul.u32 %s2827_s28, %s153_s12 }
  0x1a   : > { %s75_s15 = ssub.s32 %s2831_s29, %s3443_s9  ;;  %s155_s16 = ssub.s32 3, %s2827_s28 }
  0x1b   : > { %p76_p8 = scmp.eq.s32.totalorder %s75_s15, 0  ;;  %s156_s17 = smul.u32 %s2831_s29, %s155_s16 }
  0x1c   : > { %s158_s18 = ssub.s32 1, %s3443_s9  ;;  %s160_s19 = ssub.s32 3, %s3439_s8 }
  0x1d   : > { %s2955_s20 = scalar_select %p76_p8, %s2815_s25, %s78_s10  }
  0x1e   : > { %s157_s23 = sadd.s32 %s156_s17, %s154_s14  ;;  %s159_s7 = smul.u32 %s158_s18, %s3439_s8 }
  0x1f   : > { %3417 = sst [smem:[#allocation17_spill]] %s2955_s20  ;;  %s161_s4 = smul.u32 %s160_s19, %s3443_s9 }
  0x20   : > { %s168_s6 = sadd.s32 1, %s2803_s22  ;;  %p178_p9 = scmp.ne.s32.totalorder %s2803_s22, %s2799_s21 }
  0x21   : > { %s3418_s5 = sadd.s32 4294967295, %s2835_s30   ;;  %s162_s12 = sadd.s32 %s161_s4, %s159_s7 }
  0x22   : > { %p179_p10 = scmp.eq.s32.totalorder %s3418_s5, 7  ;;  %s163_s28 = ssub.s32 %s157_s23, %s162_s12 }
  0x23   : > { %s165_s0 = sor.u32 %s163_s28, %s75_s15  ;;  %p2573_p12 = scmp.lt.s32.totalorder %s2835_s30, 8 }
  0x24   : > { %p2964_p11 = por %p179_p10, %p178_p9  ;;  %p166_p13 = scmp.eq.s32.totalorder %s165_s0, 0 }
  0x25   : > { %s2970_s10 = sand.u32 1, %s2815_s25   ;;  %s2428_s4 = sshll.u32 %s2831_s29, 9 }
  0x26   : > { %s1880_s14 = sshll.u32 %s2970_s10, 9  ;;  %s3420_s1 = sld [smem:[#allocation19_spill]] }
  0x27   : > { %s2974_s17 = scalar_select %p166_p13, %s2803_s22, %s168_s6  }
  0x28   : > { %s281_s19 = scalar_lea.vmem [#allocation5], %s1880_s14  ;;  %p2982_p0 = pnand %p2573_p12, %p2936_p6 }
  0x29   : > { %s289_s23 = sshll.u32 %s281_s19, 4  ;;  %p1886_p1 = scmp.ge.s32.totalorder %s2835_s30, 1  ;;  %s290_s23 = int_to_ptr.vmem [resolvable:$true] %s289_s23 }
  0x2a   : > { %s278_s6 = scalar_lea.sflag [#allocation6], %s2970_s10  ;;  %s2837_s15 = smov 256  }
  0x2b   : > { %s2838_s12 = smov 16   ;;  %p326_p2 = scmp.lt.s32.totalorder %s2835_s30, 9 }
  0x2c   : > { %s286_s18 = scalar_lea.hbm %s3420_s1, %s2428_s4  ;;  %s1883_s14 = sshll.u32 %s2970_s10, 8 }
  0x2d   : > { %s287_s28 = sshll.u32 %s286_s18, 4  ;;  %s2429_s4 = sshll.u32 %s2831_s29, 8  ;;  %s288_s28 = int_to_ptr.hbm [resolvable:$true] %s287_s28 }
  0x2e   : > { %2569 = dma.hbm_to_vmem [thread:$0]  (!%p2982_p0), %s288_s28, 8192, %s290_s23, %s278_s6, %s2837_s15, %s2837_s15, %s2838_s12  }
  0x2f   : > { %p327_p3 = pnand %p1886_p1, %p326_p2  ;;  %s3422_s2 = sld [smem:[#allocation20_spill]] }
  0x30   : > { %s303_s18 = scalar_lea.vmem [#allocation7], %s1883_s14  ;;  %s300_s9 = scalar_lea.sflag [#allocation8], %s2970_s10 }
  0x31   : > { %s311_s19 = sshll.u32 %s303_s18, 4  ;;  %s332_s23 = sand.u32 (!%p327_p3), 1, %s2811_s24   ;;  %s312_s19 = int_to_ptr.vmem [resolvable:$true] %s311_s19 }
  0x32   : > { %s1887_s28 = sshll.u32 (!%p327_p3), %s332_s23, 9  ;;  %s333_s6 = scalar_lea.sflag (!%p327_p3), [#allocation6], %s332_s23 }
  0x33   : > { %330 = sbr.rel (%p327_p3) target bundleno = 539 (0x21b), region = 36  ;;  %s3000_s8 = scalar_lea.vmem (!%p327_p3), [#allocation5], %s1887_s28 }
  0x35   : > { %s308_s11 = scalar_lea.hbm %s3422_s2, %s2429_s4 }
  0x36   : > { %s309_s1 = sshll.u32 %s308_s11, 4  ;;  %s310_s1 = int_to_ptr.hbm [resolvable:$true] %s309_s1 }
  0x37   : > { %2572 = dma.hbm_to_vmem [thread:$0]  (!%p2982_p0), %s310_s1, 4096, %s312_s19, %s300_s9, %s2837_s15, %s2837_s15, %s2838_s12  }
  0x38   : > { %2790 = dma.done.wait (%p2943_p7), %s333_s6, 8192  }
  0x39   : > { %2792 = vsyncadd (%p2943_p7), %s333_s6, 4294959104  ;;  %s1888_s14 = sshll.u32 %s332_s23, 8  ;;  %s343_s4 = scalar_lea.sflag [#allocation8], %s332_s23 }
  0x3a   : > { %s3006_s5 = scalar_lea.vmem [#allocation7], %s1888_s14 }
  0x3b   : > { %2794 = dma.done.wait (%p2943_p7), %s343_s4, 4096  }
  0x3c   : > { %2796 = vsyncadd (%p2943_p7), %s343_s4, 4294963200  ;;  %s388_s1 = sand.u32 1, %s2799_s21   ;;  %s3401_s9 = ssub.s32 1, %s2823_s27 }
  0x3d   : > { %s1889_s10 = sshll.u32 %s388_s1, 4  ;;  %s404_s0 = smul.u32 %s2819_s26, %s3401_s9 }
  0x3e   : > { %s405_s15 = ssub.s32 3, %s2819_s26  ;;  %p420_p4 = scmp.lt.s32.totalorder %s2823_s27, 1 }
  0x3f   : > { %s406_s12 = smul.u32 %s2823_s27, %s405_s15  ;;  %s3423_s1 = sld [smem:[#allocation18_spill]] }
  0x40   : > { %s421_s11 = scalar_select %p420_p4, %s2823_s27, 1 }
  0x41   : > { %s3020_s7 = sadd.s32 %s406_s12, %s404_s0  ;;  %s3424_s9 = sld [smem:[#allocation22_spill]] }
  0x42   : > { %s1890_s13 = sshll.u32 %s3020_s7, 1  ;;  %s1893_s18 = sshll.u32 %s421_s11, 2 }
  0x43   : > { %p409_p5 = scmp.lt.s32.totalorder %s1890_s13, 7  ;;  %s1894_s19 = sshll.u32 %s421_s11, 3 }
  0x44   : > { %s3027_s21 = scalar_lea.vmem %s3393_s3, %s1893_s18  ;;  %s3425_s25 = sld [smem:[#allocation23_spill]] }
  0x45   : > { %s3445_s13 = smov (!%p409_p5, %s1890_s13), 7  ;;  %p1896_p6 = scmp.ne.s32.totalorder %s2819_s26, 0 }
  0x46   : > { %s2430_s23 = sshll.u32 %s3445_s13, 4  ;;  %s3044_s13 = scalar_lea.vmem [#allocation9], %s1889_s10 }
  0x47   : > { %s3032_s15 = scalar_lea.vmem %s3423_s1, %s2430_s23  ;;  %s3037_s2 = scalar_lea.vmem %s3424_s9, %s1894_s19 }
  0x48   : > { %441 = sbr.rel (%p1896_p6) target bundleno = 80 (0x50), region = 48 }
  0x4a   : > { %s3042_s11 = scalar_lea.vmem %s3425_s25, %s1894_s19 }
  0x4d   : > { %v2839_v0 = vmov 0.0  }
  0x4e   : > { %442 = vst [vmem:[#allocation3] sm:$0xff] %v2839_v0 }
  0x4f   : > { %443 = vst [vmem:[#allocation4] sm:$0xff] %v2839_v0 }
  0x50 PF: > { %v2011_v1 = vld [vmem:[%s3000_s8 + $0xe0] sm:$0xf]  ;;  %v2461_v2 = vld [vmem:[%s3000_s8 + $0xec] sm:$0xf0]  ;;  %v2459_v6 = vld [vmem:[%s3000_s8 + $0xe4] sm:$0xf] }
  0x51   : > { %v2139_v3 = vld [vmem:[%s3000_s8 + $0x1e0] sm:$0xf]  ;;  %v2012_v4 = vor.u32 %v2461_v2, %v2011_v1  ;;  %v2493_v5 = vld [vmem:[%s3000_s8 + $0x1ec] sm:$0xf0]  ;;  %v2013_v7 = vld [vmem:[%s3000_s8 + $0xf0] sm:$0xf0] }
  0x52   : > { %v2140_v8 = vor.u32 %v2493_v5, %v2139_v3  ;;  %v2016_v9 = vor.u32 %v2459_v6, %v2013_v7  ;;  %v2491_v10 = vld [vmem:[%s3000_s8 + $0x1e4] sm:$0xf]  ;;  %v2141_v11 = vld [vmem:[%s3000_s8 + $0x1f0] sm:$0xf0]  ;;  %v1995_v12 = vld [vmem:[%s3000_s8 + $0xc0] sm:$0xf] }
  0x53   : > { %844 = vmatpush.bf16.msra.mxu0 %v2012_v4  ;;  %v2144_v13 = vor.u32 %v2491_v10, %v2141_v11  ;;  %v2457_v14 = vld [vmem:[%s3000_s8 + $0xcc] sm:$0xf0]  ;;  %v2123_v15 = vld [vmem:[%s3000_s8 + $0x1c0] sm:$0xf]  ;;  %v2455_v19 = vld [vmem:[%s3000_s8 + $0xc4] sm:$0xf] }
  0x54   : > { %v2489_v16 = vld [vmem:[%s3000_s8 + $0x1cc] sm:$0xf0]  ;;  %858 = vmatpush.bf16.msra.mxu1 %v2140_v8  ;;  %872 = vmatpush.bf16.msra.mxu2 %v2016_v9  ;;  %v1996_v17 = vor.u32 %v2457_v14, %v1995_v12  ;;  %v1997_v20 = vld [vmem:[%s3000_s8 + $0xd0] sm:$0xf0]  ;;  %v2487_v21 = vld [vmem:[%s3000_s8 + $0x1c4] sm:$0xf] }
  0x55   : > { %v2124_v18 = vor.u32 %v2489_v16, %v2123_v15  ;;  %886 = vmatpush.bf16.msra.mxu3 %v2144_v13  ;;  %v2000_v22 = vor.u32 %v2455_v19, %v1997_v20  ;;  %v2125_v23 = vld [vmem:[%s3000_s8 + $0x1d0] sm:$0xf0]  ;;  %v1979_v24 = vld [vmem:[%s3000_s8 + $0xa0] sm:$0xf]  ;;  %v2453_v25 = vld [vmem:[%s3000_s8 + $0xac] sm:$0xf0] }
  0x56   : > { %v2128_v26 = vor.u32 %v2487_v21, %v2125_v23  ;;  %v2107_v27 = vld [vmem:[%s3000_s8 + $0x1a0] sm:$0xf]  ;;  %v2485_v28 = vld [vmem:[%s3000_s8 + $0x1ac] sm:$0xf0]  ;;  %v2451_v29 = vld [vmem:[%s3000_s8 + $0xa4] sm:$0xf]  ;;  %v1980_v30 = vor.u32 %v2453_v25, %v1979_v24 }
  0x57   : > { %845 = vmatpush.bf16.msra.mxu0 %v1996_v17  ;;  %v1981_v31 = vld [vmem:[%s3000_s8 + $0xb0] sm:$0xf0]  ;;  %v2483_v32 = vld [vmem:[%s3000_s8 + $0x1a4] sm:$0xf]  ;;  %v2108_v34 = vor.u32 %v2485_v28, %v2107_v27  ;;  %v1963_v36 = vld [vmem:[%s3000_s8 + $0x80] sm:$0xf] }
  0x58   : > { %v2109_v33 = vld [vmem:[%s3000_s8 + $0x1b0] sm:$0xf0]  ;;  %859 = vmatpush.bf16.msra.mxu1 %v2124_v18  ;;  %873 = vmatpush.bf16.msra.mxu2 %v2000_v22  ;;  %v1984_v35 = vor.u32 %v2451_v29, %v1981_v31  ;;  %v2449_v37 = vld [vmem:[%s3000_s8 + $0x8c] sm:$0xf0]  ;;  %v2091_v38 = vld [vmem:[%s3000_s8 + $0x180] sm:$0xf] }
  0x59   : > { %887 = vmatpush.bf16.msra.mxu3 %v2128_v26  ;;  %v2112_v39 = vor.u32 %v2483_v32, %v2109_v33  ;;  %v2481_v40 = vld [vmem:[%s3000_s8 + $0x18c] sm:$0xf0]  ;;  %v2447_v41 = vld [vmem:[%s3000_s8 + $0x84] sm:$0xf]  ;;  %v1965_v42 = vld [vmem:[%s3000_s8 + $0x90] sm:$0xf0]  ;;  %v1964_v45 = vor.u32 %v2449_v37, %v1963_v36 }
  0x5a   : > { %v2479_v43 = vld [vmem:[%s3000_s8 + $0x184] sm:$0xf]  ;;  %v2093_v44 = vld [vmem:[%s3000_s8 + $0x190] sm:$0xf0]  ;;  %v2092_v46 = vor.u32 %v2481_v40, %v2091_v38  ;;  %v1968_v47 = vor.u32 %v2447_v41, %v1965_v42  ;;  %v1947_v48 = vld [vmem:[%s3000_s8 + $0x60] sm:$0xf] }
  0x5b   : > { %846 = vmatpush.bf16.msra.mxu0 %v1980_v30  ;;  %v2445_v49 = vld [vmem:[%s3000_s8 + $0x6c] sm:$0xf0]  ;;  %v2075_v50 = vld [vmem:[%s3000_s8 + $0x160] sm:$0xf]  ;;  %v2096_v51 = vor.u32 %v2479_v43, %v2093_v44  ;;  %v2443_v53 = vld [vmem:[%s3000_s8 + $0x64] sm:$0xf] }
  0x5c   : > { %860 = vmatpush.bf16.msra.mxu1 %v2108_v34  ;;  %874 = vmatpush.bf16.msra.mxu2 %v1984_v35  ;;  %v2477_v52 = vld [vmem:[%s3000_s8 + $0x16c] sm:$0xf0]  ;;  %v1949_v54 = vld [vmem:[%s3000_s8 + $0x70] sm:$0xf0]  ;;  %v2475_v55 = vld [vmem:[%s3000_s8 + $0x164] sm:$0xf]  ;;  %v1948_v57 = vor.u32 %v2445_v49, %v1947_v48 }
  0x5d   : > { %888 = vmatpush.bf16.msra.mxu3 %v2112_v39  ;;  %v2077_v56 = vld [vmem:[%s3000_s8 + $0x170] sm:$0xf0]  ;;  %v2076_v58 = vor.u32 %v2477_v52, %v2075_v50  ;;  %v1952_v59 = vor.u32 %v2443_v53, %v1949_v54  ;;  %v1931_v60 = vld [vmem:[%s3000_s8 + $0x40] sm:$0xf]  ;;  %v2441_v61 = vld [vmem:[%s3000_s8 + $0x4c] sm:$0xf0] }
  0x5e   : > { %v2059_v62 = vld [vmem:[%s3000_s8 + $0x140] sm:$0xf]  ;;  %v2080_v63 = vor.u32 %v2475_v55, %v2077_v56  ;;  %v2473_v0 = vld [vmem:[%s3000_s8 + $0x14c] sm:$0xf0]  ;;  %v2439_v1 = vld [vmem:[%s3000_s8 + $0x44] sm:$0xf]  ;;  %v1932_v5 = vor.u32 %v2441_v61, %v1931_v60 }
  0x5f   : > { %847 = vmatpush.bf16.msra.mxu0 %v1964_v45  ;;  %v1933_v2 = vld [vmem:[%s3000_s8 + $0x50] sm:$0xf0]  ;;  %v2471_v3 = vld [vmem:[%s3000_s8 + $0x144] sm:$0xf]  ;;  %v2060_v6 = vor.u32 %v2473_v0, %v2059_v62  ;;  %v1915_v8 = vld [vmem:[%s3000_s8 + $0x20] sm:$0xf] }
  0x60   : > { %861 = vmatpush.bf16.msra.mxu1 %v2092_v46  ;;  %875 = vmatpush.bf16.msra.mxu2 %v1968_v47  ;;  %v2061_v4 = vld [vmem:[%s3000_s8 + $0x150] sm:$0xf0]  ;;  %v1936_v7 = vor.u32 %v2439_v1, %v1933_v2  ;;  %v2437_v9 = vld [vmem:[%s3000_s8 + $0x2c] sm:$0xf0]  ;;  %v2043_v10 = vld [vmem:[%s3000_s8 + $0x120] sm:$0xf] }
  0x61   : > { %889 = vmatpush.bf16.msra.mxu3 %v2096_v51  ;;  %v2064_v11 = vor.u32 %v2471_v3, %v2061_v4  ;;  %v2469_v12 = vld [vmem:[%s3000_s8 + $0x12c] sm:$0xf0]  ;;  %v2435_v13 = vld [vmem:[%s3000_s8 + $0x24] sm:$0xf]  ;;  %v1917_v14 = vld [vmem:[%s3000_s8 + $0x30] sm:$0xf0]  ;;  %v1916_v17 = vor.u32 %v2437_v9, %v1915_v8 }
  0x62   : > { %v2467_v15 = vld [vmem:[%s3000_s8 + $0x124] sm:$0xf]  ;;  %v2045_v16 = vld [vmem:[%s3000_s8 + $0x130] sm:$0xf0]  ;;  %v1899_v18 = vld [vmem:[%s3000_s8] sm:$0xf]  ;;  %v2044_v20 = vor.u32 %v2469_v12, %v2043_v10  ;;  %v1920_v21 = vor.u32 %v2435_v13, %v1917_v14 }
  0x63   : > { %848 = vmatpush.bf16.msra.mxu0 %v1948_v57  ;;  %v2433_v19 = vld [vmem:[%s3000_s8 + $0xc] sm:$0xf0]  ;;  %v2027_v22 = vld [vmem:[%s3000_s8 + $0x100] sm:$0xf]  ;;  %v2431_v24 = vld [vmem:[%s3000_s8 + $0x4] sm:$0xf]  ;;  %v2048_v25 = vor.u32 %v2467_v15, %v2045_v16 }
  0x64   : > { %862 = vmatpush.bf16.msra.mxu1 %v2076_v58  ;;  %876 = vmatpush.bf16.msra.mxu2 %v1952_v59  ;;  %v2465_v23 = vld [vmem:[%s3000_s8 + $0x10c] sm:$0xf0]  ;;  %v1901_v26 = vld [vmem:[%s3000_s8 + $0x10] sm:$0xf0]  ;;  %v2463_v27 = vld [vmem:[%s3000_s8 + $0x104] sm:$0xf]  ;;  %v1900_v32 = vor.u32 %v2433_v19, %v1899_v18 }
  0x65   : > { %890 = vmatpush.bf16.msra.mxu3 %v2080_v63  ;;  %v2029_v28 = vld [vmem:[%s3000_s8 + $0x110] sm:$0xf0]  ;;  %v2019_v29 = vld [vmem:[%s3000_s8 + $0xe8] sm:$0xf]  ;;  %v2462_v30 = vld [vmem:[%s3000_s8 + $0xf4] sm:$0xf0]  ;;  %v2028_v36 = vor.u32 %v2465_v23, %v2027_v22  ;;  %v1904_v37 = vor.u32 %v2431_v24, %v1901_v26 }
  0x66   : > { %v2147_v31 = vld [vmem:[%s3000_s8 + $0x1e8] sm:$0xf]  ;;  %v2494_v33 = vld [vmem:[%s3000_s8 + $0x1f4] sm:$0xf0]  ;;  %v2460_v34 = vld [vmem:[%s3000_s8 + $0xec] sm:$0xf]  ;;  %v2032_v41 = vor.u32 %v2463_v27, %v2029_v28  ;;  %v2020_v42 = vor.u32 %v2462_v30, %v2019_v29 }
  0x67   : > { %849 = vmatpush.bf16.msra.mxu0 %v1932_v5  ;;  %v2021_v35 = vld [vmem:[%s3000_s8 + $0xf8] sm:$0xf0]  ;;  %v2492_v38 = vld [vmem:[%s3000_s8 + $0x1ec] sm:$0xf]  ;;  %v2003_v40 = vld [vmem:[%s3000_s8 + $0xc8] sm:$0xf]  ;;  %v2148_v46 = vor.u32 %v2494_v33, %v2147_v31 }
  0x68   : > { %863 = vmatpush.bf16.msra.mxu1 %v2060_v6  ;;  %877 = vmatpush.bf16.msra.mxu2 %v1936_v7  ;;  %v2149_v39 = vld [vmem:[%s3000_s8 + $0x1f8] sm:$0xf0]  ;;  %v2458_v43 = vld [vmem:[%s3000_s8 + $0xd4] sm:$0xf0]  ;;  %v444_v44 = vld [vmem:[%s3032_s15] sm:$0xff]  ;;  %v2024_v47 = vor.u32 %v2460_v34, %v2021_v35  ;;  %s2153_s25 = sshll.u32 %s2823_s27, 3 }
  0x69   : > { %891 = vmatpush.bf16.msra.mxu3 %v2064_v11  ;;  %v446_v45 = vld [vmem:[%s3032_s15 + $0x10] sm:$0xff]  ;;  %v2131_v48 = vld [vmem:[%s3000_s8 + $0x1c8] sm:$0xf]  ;;  %v445_v49 = vld [vmem:[%s3032_s15 + $0x8] sm:$0xff]  ;;  %v2152_v51 = vor.u32 %v2492_v38, %v2149_v39  ;;  %v2004_v59 = vor.u32 %v2458_v43, %v2003_v40  ;;  %s3267_s29 = sshra.s32 %s2153_s25, 3  ;;  %s3426_s9 = ssub.s32 1, %s2823_s27 }
  0x6a   : > { %v447_v50 = vld [vmem:[%s3032_s15 + $0x18] sm:$0xff]  ;;  %v2490_v52 = vld [vmem:[%s3000_s8 + $0x1d4] sm:$0xf0]  ;;  %v2005_v54 = vld [vmem:[%s3000_s8 + $0xd8] sm:$0xf0]  ;;  %v3129_v55 = vpack.c.bf16 %v446_v45, %v444_v44  ;;  %s3342_s10 = sshll.u32 %s3426_s9, 3 }
  0x6b   : > { %850 = vmatpush.bf16.msra.mxu0 %v1916_v17  ;;  %v2456_v53 = vld [vmem:[%s3000_s8 + $0xcc] sm:$0xf]  ;;  %v2133_v57 = vld [vmem:[%s3000_s8 + $0x1d8] sm:$0xf0]  ;;  %v3133_v58 = vpack.c.bf16 %v447_v50, %v445_v49  ;;  %v2132_v60 = vor.u32 %v2490_v52, %v2131_v48  ;;  %v1987_v62 = vld [vmem:[%s3000_s8 + $0xa8] sm:$0xf]  ;;  %s1619_s28 = scalar_lea.vmem %s3044_s13, %s3342_s10 [#allocation9] }
  0x6c   : > { %864 = vmatpush.bf16.msra.mxu1 %v2044_v20  ;;  %878 = vmatpush.bf16.msra.mxu2 %v1920_v21  ;;  %v2488_v56 = vld [vmem:[%s3000_s8 + $0x1cc] sm:$0xf]  ;;  %v2008_v61 = vor.u32 %v2456_v53, %v2005_v54  ;;  %v2454_v63 = vld [vmem:[%s3000_s8 + $0xb4] sm:$0xf0]  ;;  %v2115_v0 = vld [vmem:[%s3000_s8 + $0x1a8] sm:$0xf] }
  0x6d   : > { %892 = vmatpush.bf16.msra.mxu3 %v2048_v25  ;;  %v2136_v1 = vor.u32 %v2488_v56, %v2133_v57  ;;  %v2486_v2 = vld [vmem:[%s3000_s8 + $0x1b4] sm:$0xf0]  ;;  %v2452_v3 = vld [vmem:[%s3000_s8 + $0xac] sm:$0xf]  ;;  %v1989_v4 = vld [vmem:[%s3000_s8 + $0xb8] sm:$0xf0]  ;;  %v1988_v7 = vor.u32 %v2454_v63, %v1987_v62 }
  0x6e   : > { %v2484_v5 = vld [vmem:[%s3000_s8 + $0x1ac] sm:$0xf]  ;;  %v2117_v6 = vld [vmem:[%s3000_s8 + $0x1b8] sm:$0xf0]  ;;  %v2116_v8 = vor.u32 %v2486_v2, %v2115_v0  ;;  %v1992_v9 = vor.u32 %v2452_v3, %v1989_v4  ;;  %v1971_v10 = vld [vmem:[%s3000_s8 + $0x88] sm:$0xf] }
  0x6f   : > { %851 = vmatpush.bf16.msra.mxu0 %v1900_v32  ;;  %v2450_v11 = vld [vmem:[%s3000_s8 + $0x94] sm:$0xf0]  ;;  %v2099_v12 = vld [vmem:[%s3000_s8 + $0x188] sm:$0xf]  ;;  %v2120_v13 = vor.u32 %v2484_v5, %v2117_v6  ;;  %v2448_v15 = vld [vmem:[%s3000_s8 + $0x8c] sm:$0xf] }
  0x70   : > { %865 = vmatpush.bf16.msra.mxu1 %v2028_v36  ;;  %879 = vmatpush.bf16.msra.mxu2 %v1904_v37  ;;  %v2482_v14 = vld [vmem:[%s3000_s8 + $0x194] sm:$0xf0]  ;;  %v1973_v16 = vld [vmem:[%s3000_s8 + $0x98] sm:$0xf0]  ;;  %v2480_v17 = vld [vmem:[%s3000_s8 + $0x18c] sm:$0xf]  ;;  %v1972_v19 = vor.u32 %v2450_v11, %v1971_v10 }
  0x71   : > { %893 = vmatpush.bf16.msra.mxu3 %v2032_v41  ;;  %v2101_v18 = vld [vmem:[%s3000_s8 + $0x198] sm:$0xf0]  ;;  %v2100_v20 = vor.u32 %v2482_v14, %v2099_v12  ;;  %v1976_v21 = vor.u32 %v2448_v15, %v1973_v16  ;;  %v1955_v22 = vld [vmem:[%s3000_s8 + $0x68] sm:$0xf]  ;;  %v2446_v23 = vld [vmem:[%s3000_s8 + $0x74] sm:$0xf0] }
  0x72   : > { %852 = vmatmul.bf16.vlgmr.msra.gmra.mxu0 %v3129_v55  ;;  %v2083_v24 = vld [vmem:[%s3000_s8 + $0x168] sm:$0xf]  ;;  %v2104_v25 = vor.u32 %v2480_v17, %v2101_v18  ;;  %v2478_v26 = vld [vmem:[%s3000_s8 + $0x174] sm:$0xf0]  ;;  %v2444_v27 = vld [vmem:[%s3000_s8 + $0x6c] sm:$0xf]  ;;  %v1956_v31 = vor.u32 %v2446_v23, %v1955_v22 }
  0x73   : > { %900 = vmatpush.bf16.msrb.mxu0 %v2020_v42  ;;  %880 = vmatmul.bf16.vlgmr.msra.gmra.mxu2 %v3129_v55  ;;  %v1957_v28 = vld [vmem:[%s3000_s8 + $0x78] sm:$0xf0]  ;;  %v2476_v29 = vld [vmem:[%s3000_s8 + $0x16c] sm:$0xf]  ;;  %v2084_v32 = vor.u32 %v2478_v26, %v2083_v24  ;;  %v1939_v34 = vld [vmem:[%s3000_s8 + $0x48] sm:$0xf] }
  0x74   : > { %914 = vmatpush.bf16.msrb.mxu1 %v2148_v46  ;;  %928 = vmatpush.bf16.msrb.mxu2 %v2024_v47  ;;  %v2085_v30 = vld [vmem:[%s3000_s8 + $0x178] sm:$0xf0]  ;;  %v1960_v33 = vor.u32 %v2444_v27, %v1957_v28  ;;  %v2442_v35 = vld [vmem:[%s3000_s8 + $0x54] sm:$0xf0]  ;;  %v2067_v36 = vld [vmem:[%s3000_s8 + $0x148] sm:$0xf] }
  0x75   : > { %942 = vmatpush.bf16.msrb.mxu3 %v2152_v51  ;;  %866 = vmatmul.bf16.vlgmr.msra.gmra.mxu1 %v3133_v58  ;;  %v2088_v37 = vor.u32 %v2476_v29, %v2085_v30  ;;  %v2474_v38 = vld [vmem:[%s3000_s8 + $0x154] sm:$0xf0]  ;;  %v2440_v39 = vld [vmem:[%s3000_s8 + $0x4c] sm:$0xf]  ;;  %v1941_v40 = vld [vmem:[%s3000_s8 + $0x58] sm:$0xf0]  ;;  %v1940_v43 = vor.u32 %v2442_v35, %v1939_v34 }
  0x76   : > { %894 = vmatmul.bf16.vlgmr.msra.gmra.mxu3 %v3133_v58  ;;  %v2472_v41 = vld [vmem:[%s3000_s8 + $0x14c] sm:$0xf]  ;;  %v2069_v42 = vld [vmem:[%s3000_s8 + $0x158] sm:$0xf0]  ;;  %v2068_v44 = vor.u32 %v2474_v38, %v2067_v36  ;;  %v1944_v45 = vor.u32 %v2440_v39, %v1941_v40  ;;  %v1923_v46 = vld [vmem:[%s3000_s8 + $0x28] sm:$0xf] }
  0x77   : > { %901 = vmatpush.bf16.msrb.mxu0 %v2004_v59  ;;  %v2438_v47 = vld [vmem:[%s3000_s8 + $0x34] sm:$0xf0]  ;;  %v2051_v48 = vld [vmem:[%s3000_s8 + $0x128] sm:$0xf]  ;;  %v2072_v49 = vor.u32 %v2472_v41, %v2069_v42  ;;  %v2436_v51 = vld [vmem:[%s3000_s8 + $0x2c] sm:$0xf] }
  0x78   : > { %915 = vmatpush.bf16.msrb.mxu1 %v2132_v60  ;;  %929 = vmatpush.bf16.msrb.mxu2 %v2008_v61  ;;  %v2470_v50 = vld [vmem:[%s3000_s8 + $0x134] sm:$0xf0]  ;;  %v1925_v52 = vld [vmem:[%s3000_s8 + $0x38] sm:$0xf0]  ;;  %v2468_v53 = vld [vmem:[%s3000_s8 + $0x12c] sm:$0xf]  ;;  %v1924_v56 = vor.u32 %v2438_v47, %v1923_v46 }
  0x79   : > { %943 = vmatpush.bf16.msrb.mxu3 %v2136_v1  ;;  %v2053_v54 = vld [vmem:[%s3000_s8 + $0x138] sm:$0xf0]  ;;  %v1907_v57 = vld [vmem:[%s3000_s8 + $0x8] sm:$0xf]  ;;  %v2434_v59 = vld [vmem:[%s3000_s8 + $0x14] sm:$0xf0]  ;;  %v2052_v60 = vor.u32 %v2470_v50, %v2051_v48  ;;  %v1928_v61 = vor.u32 %v2436_v51, %v1925_v52 }
  0x7a   : > { %v2035_v62 = vld [vmem:[%s3000_s8 + $0x108] sm:$0xf]  ;;  %v2466_v63 = vld [vmem:[%s3000_s8 + $0x114] sm:$0xf0]  ;;  %v2432_v0 = vld [vmem:[%s3000_s8 + $0xc] sm:$0xf]  ;;  %v2056_v1 = vor.u32 %v2468_v53, %v2053_v54 }
  0x7b   : > { %902 = vmatpush.bf16.msrb.mxu0 %v1988_v7  ;;  %v1909_v2 = vld [vmem:[%s3000_s8 + $0x18] sm:$0xf0]  ;;  %v2464_v3 = vld [vmem:[%s3000_s8 + $0x10c] sm:$0xf]  ;;  %v2270_v5 = vld [vmem:[%s3006_s5 + $0xe0] sm:$0xf]  ;;  %v2036_v12 = vor.u32 %v2466_v63, %v2035_v62 }
  0x7c   : > { %916 = vmatpush.bf16.msrb.mxu1 %v2116_v8  ;;  %930 = vmatpush.bf16.msrb.mxu2 %v1992_v9  ;;  %v2037_v4 = vld [vmem:[%s3000_s8 + $0x118] sm:$0xf0]  ;;  %v2526_v6 = vld [vmem:[%s3006_s5 + $0xec] sm:$0xf0]  ;;  %v2524_v7 = vld [vmem:[%s3006_s5 + $0xe4] sm:$0xf]  ;;  %v1908_v8 = vor.u32 %v2434_v59, %v1907_v57 }
  0x7d   : > { %944 = vmatpush.bf16.msrb.mxu3 %v2120_v13  ;;  %v2272_v9 = vld [vmem:[%s3006_s5 + $0xf0] sm:$0xf0]  ;;  %v2278_v10 = vld [vmem:[%s3006_s5 + $0xe8] sm:$0xf]  ;;  %v2527_v11 = vld [vmem:[%s3006_s5 + $0xf4] sm:$0xf0]  ;;  %v1912_v13 = vor.u32 %v2432_v0, %v1909_v2  ;;  %v2040_v16 = vor.u32 %v2464_v3, %v2037_v4  ;;  %v2271_v17 = vor.u32 %v2526_v6, %v2270_v5 }
  0x7e   : > { %v2525_v14 = vld [vmem:[%s3006_s5 + $0xec] sm:$0xf]  ;;  %v2280_v15 = vld [vmem:[%s3006_s5 + $0xf8] sm:$0xf0]  ;;  %v2275_v18 = vor.u32 %v2524_v7, %v2272_v9  ;;  %v2520_v22 = vld [vmem:[%s3006_s5 + $0xc4] sm:$0xf] }
  0x7f   : > { %903 = vmatpush.bf16.msrb.mxu0 %v1972_v19  ;;  %v2279_v19 = vor.u32 %v2527_v11, %v2278_v10  ;;  %v2283_v23 = vor.u32 %v2525_v14, %v2280_v15  ;;  %v2256_v24 = vld [vmem:[%s3006_s5 + $0xd0] sm:$0xf0]  ;;  %v2523_v26 = vld [vmem:[%s3006_s5 + $0xd4] sm:$0xf0]  ;;  %v2521_v27 = vld [vmem:[%s3006_s5 + $0xcc] sm:$0xf] }
  0x80   : > { %917 = vmatpush.bf16.msrb.mxu1 %v2100_v20  ;;  %931 = vmatpush.bf16.msrb.mxu2 %v1976_v21  ;;  %v2254_v20 = vld [vmem:[%s3006_s5 + $0xc0] sm:$0xf]  ;;  %v2522_v21 = vld [vmem:[%s3006_s5 + $0xcc] sm:$0xf0]  ;;  %v2264_v28 = vld [vmem:[%s3006_s5 + $0xd8] sm:$0xf0]  ;;  %v2259_v30 = vor.u32 %v2520_v22, %v2256_v24 }
  0x81   : > { %945 = vmatpush.bf16.msrb.mxu3 %v2104_v25  ;;  %v2262_v25 = vld [vmem:[%s3006_s5 + $0xc8] sm:$0xf]  ;;  %v2255_v29 = vor.u32 %v2522_v21, %v2254_v20  ;;  %v2516_v34 = vld [vmem:[%s3006_s5 + $0xa4] sm:$0xf]  ;;  %v2267_v35 = vor.u32 %v2521_v27, %v2264_v28  ;;  %v2240_v36 = vld [vmem:[%s3006_s5 + $0xb0] sm:$0xf0] }
  0x82   : > { %v2519_v38 = vld [vmem:[%s3006_s5 + $0xb4] sm:$0xf0]  ;;  %v2517_v39 = vld [vmem:[%s3006_s5 + $0xac] sm:$0xf]  ;;  %v2248_v40 = vld [vmem:[%s3006_s5 + $0xb8] sm:$0xf0]  ;;  %v2243_v42 = vor.u32 %v2516_v34, %v2240_v36 }
  0x83   : > { %904 = vmatpush.bf16.msrb.mxu0 %v1956_v31  ;;  %v2263_v31 = vor.u32 %v2523_v26, %v2262_v25  ;;  %v2512_v46 = vld [vmem:[%s3006_s5 + $0x84] sm:$0xf]  ;;  %v2224_v47 = vld [vmem:[%s3006_s5 + $0x90] sm:$0xf0]  ;;  %v2230_v48 = vld [vmem:[%s3006_s5 + $0x88] sm:$0xf] }
  0x84   : > { %918 = vmatpush.bf16.msrb.mxu1 %v2084_v32  ;;  %932 = vmatpush.bf16.msrb.mxu2 %v1960_v33  ;;  %v2238_v32 = vld [vmem:[%s3006_s5 + $0xa0] sm:$0xf]  ;;  %v2518_v33 = vld [vmem:[%s3006_s5 + $0xac] sm:$0xf0]  ;;  %v2232_v50 = vld [vmem:[%s3006_s5 + $0x98] sm:$0xf0]  ;;  %v2227_v52 = vor.u32 %v2512_v46, %v2224_v47 }
  0x85   : > { %946 = vmatpush.bf16.msrb.mxu3 %v2088_v37  ;;  %v2246_v37 = vld [vmem:[%s3006_s5 + $0xa8] sm:$0xf]  ;;  %v2239_v41 = vor.u32 %v2518_v33, %v2238_v32  ;;  %v2206_v54 = vld [vmem:[%s3006_s5 + $0x60] sm:$0xf]  ;;  %v2508_v57 = vld [vmem:[%s3006_s5 + $0x64] sm:$0xf] }
  0x86   : > { %v2511_v62 = vld [vmem:[%s3006_s5 + $0x74] sm:$0xf0]  ;;  %v2509_v63 = vld [vmem:[%s3006_s5 + $0x6c] sm:$0xf]  ;;  %v2216_v0 = vld [vmem:[%s3006_s5 + $0x78] sm:$0xf0] }
  0x87   : > { %905 = vmatpush.bf16.msrb.mxu0 %v1940_v43  ;;  %v2247_v43 = vor.u32 %v2519_v38, %v2246_v37  ;;  %v2190_v4 = vld [vmem:[%s3006_s5 + $0x40] sm:$0xf]  ;;  %v2506_v5 = vld [vmem:[%s3006_s5 + $0x4c] sm:$0xf0]  ;;  %v2504_v6 = vld [vmem:[%s3006_s5 + $0x44] sm:$0xf]  ;;  %v2219_v7 = vor.u32 %v2509_v63, %v2216_v0 }
  0x88   : > { %919 = vmatpush.bf16.msrb.mxu1 %v2068_v44  ;;  %933 = vmatpush.bf16.msrb.mxu2 %v1944_v45  ;;  %v2222_v44 = vld [vmem:[%s3006_s5 + $0x80] sm:$0xf]  ;;  %v2514_v45 = vld [vmem:[%s3006_s5 + $0x8c] sm:$0xf0]  ;;  %v2198_v9 = vld [vmem:[%s3006_s5 + $0x48] sm:$0xf] }
  0x89   : > { %947 = vmatpush.bf16.msrb.mxu3 %v2072_v49  ;;  %v2515_v49 = vld [vmem:[%s3006_s5 + $0x94] sm:$0xf0]  ;;  %v2223_v51 = vor.u32 %v2514_v45, %v2222_v44  ;;  %v2505_v11 = vld [vmem:[%s3006_s5 + $0x4c] sm:$0xf]  ;;  %v2176_v20 = vld [vmem:[%s3006_s5 + $0x30] sm:$0xf0] }
  0x8a   : > { %v2231_v53 = vor.u32 %v2515_v49, %v2230_v48  ;;  %v2507_v10 = vld [vmem:[%s3006_s5 + $0x54] sm:$0xf0]  ;;  %v2182_v21 = vld [vmem:[%s3006_s5 + $0x28] sm:$0xf]  ;;  %v2184_v24 = vld [vmem:[%s3006_s5 + $0x38] sm:$0xf0] }
  0x8b   : > { %906 = vmatpush.bf16.msrb.mxu0 %v1924_v56  ;;  %v2510_v56 = vld [vmem:[%s3006_s5 + $0x6c] sm:$0xf0]  ;;  %v2199_v15 = vor.u32 %v2507_v10, %v2198_v9  ;;  %v2503_v22 = vld [vmem:[%s3006_s5 + $0x34] sm:$0xf0]  ;;  %v2158_v28 = vld [vmem:[%s3006_s5] sm:$0xf] }
  0x8c   : > { %920 = vmatpush.bf16.msrb.mxu1 %v2052_v60  ;;  %934 = vmatpush.bf16.msrb.mxu2 %v1928_v61  ;;  %v2208_v60 = vld [vmem:[%s3006_s5 + $0x70] sm:$0xf0]  ;;  %v2214_v61 = vld [vmem:[%s3006_s5 + $0x68] sm:$0xf]  ;;  %v2183_v27 = vor.u32 %v2503_v22, %v2182_v21  ;;  %v2499_v34 = vld [vmem:[%s3006_s5 + $0x14] sm:$0xf0] }
  0x8d   : > { %948 = vmatpush.bf16.msrb.mxu3 %v2056_v1  ;;  %v2207_v1 = vor.u32 %v2510_v56, %v2206_v54  ;;  %v2211_v2 = vor.u32 %v2508_v57, %v2208_v60  ;;  %v2215_v3 = vor.u32 %v2511_v62, %v2214_v61  ;;  %v2160_v32 = vld [vmem:[%s3006_s5 + $0x10] sm:$0xf0]  ;;  %v2166_v33 = vld [vmem:[%s3006_s5 + $0x8] sm:$0xf]  ;;  %v2168_v36 = vld [vmem:[%s3006_s5 + $0x18] sm:$0xf0] }
  0x8e   : > { %v974_v38 = vld [vmem:[#allocation3] sm:$0xff]  ;;  %v2558_v22 = vld [vmem:[%s3006_s5 + $0xec] sm:$0xf]  ;;  %s2495_s8 = sshll.u32 %s3267_s29, 5  ;;  %s1294_s18 = sshra.s32 %s3342_s10, 3 }
  0x8f   : > { %907 = vmatpush.bf16.msrb.mxu0 %v1908_v8  ;;  %v2192_v8 = vld [vmem:[%s3006_s5 + $0x50] sm:$0xf0]  ;;  %s3294_s20 = scalar_lea.vmem [#allocation2], %s2495_s8  ;;  %s2528_s19 = sshll.u32 %s1294_s18, 5 }
  0x90   : > { %921 = vmatpush.bf16.msrb.mxu1 %v2036_v12  ;;  %935 = vmatpush.bf16.msrb.mxu2 %v1912_v13  ;;  %v2200_v12 = vld [vmem:[%s3006_s5 + $0x58] sm:$0xf0]  ;;  %v2191_v13 = vor.u32 %v2506_v5, %v2190_v4  ;;  %v2195_v14 = vor.u32 %v2504_v6, %v2192_v8  ;;  %s1298_s23 = scalar_lea.vmem [#allocation2], %s2528_s19  ;;  %p2421_p7 = scmp.ne.s32.totalorder %s2819_s26, 3 }
  0x91   : > { %949 = vmatpush.bf16.msrb.mxu3 %v2040_v16  ;;  %v2174_v16 = vld [vmem:[%s3006_s5 + $0x20] sm:$0xf] }
  0x92   : > { %908 = vmatmul.bf16.vlgmr.msrb.gmra.mxu0 %v3129_v55 }
  0x93   : > { %1168 = vmatpush.bf16.msra.mxu0 %v2271_v17  ;;  %936 = vmatmul.bf16.vlgmr.msrb.gmra.mxu2 %v3129_v55  ;;  %v2251_v55 = vor.u32 %v2517_v39, %v2248_v40  ;;  %v2502_v17 = vld [vmem:[%s3006_s5 + $0x2c] sm:$0xf0]  ;;  %v2167_v40 = vor.u32 %v2499_v34, %v2166_v33  ;;  %v2396_v33 = vld [vmem:[%s3006_s5 + $0xc8] sm:$0xf]  ;;  %v2556_v34 = vld [vmem:[%s3006_s5 + $0xd4] sm:$0xf0] }
  0x94   : > { %1181 = vmatpush.bf16.msra.mxu1 %v2275_v18  ;;  %1194 = vmatpush.bf16.msra.mxu2 %v2279_v19  ;;  %v2500_v18 = vld [vmem:[%s3006_s5 + $0x24] sm:$0xf]  ;;  %v2203_v19 = vor.u32 %v2505_v11, %v2200_v12  ;;  %v2175_v25 = vor.u32 %v2502_v17, %v2174_v16  ;;  %v2404_v12 = vld [vmem:[%s3006_s5 + $0xe0] sm:$0xf]  ;;  %v2406_v16 = vld [vmem:[%s3006_s5 + $0xf0] sm:$0xf0] }
  0x95   : > { %1207 = vmatpush.bf16.msra.mxu3 %v2283_v23  ;;  %922 = vmatmul.bf16.vlgmr.msrb.gmra.mxu1 %v3133_v58  ;;  %v2501_v23 = vld [vmem:[%s3006_s5 + $0x2c] sm:$0xf]  ;;  %v2179_v26 = vor.u32 %v2500_v18, %v2176_v20  ;;  %v2412_v17 = vld [vmem:[%s3006_s5 + $0xe8] sm:$0xf]  ;;  %v2560_v18 = vld [vmem:[%s3006_s5 + $0xf4] sm:$0xf0] }
  0x96   : > { %950 = vmatmul.bf16.vlgmr.msrb.gmra.mxu3 %v3133_v58  ;;  %v2513_v58 = vld [vmem:[%s3006_s5 + $0x8c] sm:$0xf]  ;;  %v2413_v21 = vor.u32 %v2560_v18, %v2412_v17 }
  0x97   : > { %1169 = vmatpush.bf16.msra.mxu0 %v2255_v29  ;;  %v2235_v59 = vor.u32 %v2513_v58, %v2232_v50  ;;  %v2498_v29 = vld [vmem:[%s3006_s5 + $0xc] sm:$0xf0] }
  0x98   : > { %1182 = vmatpush.bf16.msra.mxu1 %v2259_v30  ;;  %1195 = vmatpush.bf16.msra.mxu2 %v2263_v31  ;;  %v2496_v30 = vld [vmem:[%s3006_s5 + $0x4] sm:$0xf]  ;;  %v2187_v31 = vor.u32 %v2501_v23, %v2184_v24  ;;  %v2159_v37 = vor.u32 %v2498_v29, %v2158_v28  ;;  %v2414_v23 = vld [vmem:[%s3006_s5 + $0xf8] sm:$0xf0]  ;;  %v2555_v28 = vld [vmem:[%s3006_s5 + $0xcc] sm:$0xf0] }
  0x99   : > { %1208 = vmatpush.bf16.msra.mxu3 %v2267_v35  ;;  %v2497_v35 = vld [vmem:[%s3006_s5 + $0xc] sm:$0xf]  ;;  %v2163_v39 = vor.u32 %v2496_v30, %v2160_v32  ;;  %v2553_v29 = vld [vmem:[%s3006_s5 + $0xc4] sm:$0xf]  ;;  %v2390_v32 = vld [vmem:[%s3006_s5 + $0xd0] sm:$0xf0] }
  0x9b   : > { %1170 = vmatpush.bf16.msra.mxu0 %v2239_v41  ;;  %v2171_v41 = vor.u32 %v2497_v35, %v2168_v36  ;;  %v2393_v35 = vor.u32 %v2553_v29, %v2390_v32  ;;  %v2397_v36 = vor.u32 %v2556_v34, %v2396_v33  ;;  %v2308_v34 = vld [vmem:[%s3006_s5 + $0x20] sm:$0xf] }
  0x9c   : > { %1183 = vmatpush.bf16.msra.mxu1 %v2243_v42  ;;  %1196 = vmatpush.bf16.msra.mxu2 %v2247_v43  ;;  %v975_v42 = vpack.c.bf16 %v974_v38, %v974_v38  ;;  %v514_v43 = vld [vmem:[%s3027_s21] sm:$0xf]  ;;  %v2398_v38 = vld [vmem:[%s3006_s5 + $0xd8] sm:$0xf0] }
  0x9d   : > { %1209 = vmatpush.bf16.msra.mxu3 %v2251_v55  ;;  %v516_v44 = vperm.slane %v514_v43, 0  ;;  %v517_v47 = vperm.slane %v514_v43, 1  ;;  %v518_v62 = vperm.slane %v514_v43, 2 }
  0x9f   : > { %1171 = vmatpush.bf16.msra.mxu0 %v2223_v51 }
  0xa0   : > { %1184 = vmatpush.bf16.msra.mxu1 %v2227_v52  ;;  %1197 = vmatpush.bf16.msra.mxu2 %v2231_v53 }
  0xa1   : > { %1210 = vmatpush.bf16.msra.mxu3 %v2235_v59 }
  0xa3   : > { %1172 = vmatpush.bf16.msra.mxu0 %v2207_v1 }
  0xa4   : > { %1185 = vmatpush.bf16.msra.mxu1 %v2211_v2  ;;  %1198 = vmatpush.bf16.msra.mxu2 %v2215_v3  ;;  %v519_v2 = vperm.slane %v514_v43, 3 }
  0xa5   : > { %1211 = vmatpush.bf16.msra.mxu3 %v2219_v7 }
  0xa7   : > { %1173 = vmatpush.bf16.msra.mxu0 %v2191_v13  ;;  %v2559_v13 = vld [vmem:[%s3006_s5 + $0xec] sm:$0xf0] }
  0xa8   : > { %1186 = vmatpush.bf16.msra.mxu1 %v2195_v14  ;;  %1199 = vmatpush.bf16.msra.mxu2 %v2199_v15  ;;  %v2557_v14 = vld [vmem:[%s3006_s5 + $0xe4] sm:$0xf]  ;;  %v2405_v15 = vor.u32 %v2559_v13, %v2404_v12  ;;  %v2544_v12 = vld [vmem:[%s3006_s5 + $0x74] sm:$0xf0]  ;;  %v2542_v13 = vld [vmem:[%s3006_s5 + $0x6c] sm:$0xf] }
  0xa9   : > { %1212 = vmatpush.bf16.msra.mxu3 %v2203_v19  ;;  %v2409_v20 = vor.u32 %v2557_v14, %v2406_v16  ;;  %v2350_v14 = vld [vmem:[%s3006_s5 + $0x78] sm:$0xf0] }
  0xaa   : > { %v2353_v17 = vor.u32 %v2542_v13, %v2350_v14 }
  0xab   : > { %1174 = vmatpush.bf16.msra.mxu0 %v2175_v25  ;;  %v2417_v25 = vor.u32 %v2558_v22, %v2414_v23  ;;  %v2537_v23 = vld [vmem:[%s3006_s5 + $0x44] sm:$0xf] }
  0xac   : > { %1187 = vmatpush.bf16.msra.mxu1 %v2179_v26  ;;  %1200 = vmatpush.bf16.msra.mxu2 %v2183_v27  ;;  %v2388_v27 = vld [vmem:[%s3006_s5 + $0xc0] sm:$0xf] }
  0xad   : > { %1213 = vmatpush.bf16.msra.mxu3 %v2187_v31  ;;  %v2389_v31 = vor.u32 %v2555_v28, %v2388_v27  ;;  %v2540_v27 = vld [vmem:[%s3006_s5 + $0x54] sm:$0xf0]  ;;  %v2538_v28 = vld [vmem:[%s3006_s5 + $0x4c] sm:$0xf] }
  0xaf   : > { %1175 = vmatpush.bf16.msra.mxu0 %v2159_v37  ;;  %v2554_v37 = vld [vmem:[%s3006_s5 + $0xcc] sm:$0xf] }
  0xb0   : > { %1188 = vmatpush.bf16.msra.mxu1 %v2163_v39  ;;  %1201 = vmatpush.bf16.msra.mxu2 %v2167_v40  ;;  %v2401_v39 = vor.u32 %v2554_v37, %v2398_v38  ;;  %v2372_v40 = vld [vmem:[%s3006_s5 + $0xa0] sm:$0xf] }
  0xb1   : > { %1214 = vmatpush.bf16.msra.mxu3 %v2171_v41  ;;  %v2551_v41 = vld [vmem:[%s3006_s5 + $0xac] sm:$0xf0] }
  0xb2   : > { %1176 = vmatmul.bf16.vlgmr.msra.gmra.mxu0 %v975_v42  ;;  %v2373_v43 = vor.u32 %v2551_v41, %v2372_v40  ;;  %v2310_v40 = vld [vmem:[%s3006_s5 + $0x30] sm:$0xf0]  ;;  %v2316_v41 = vld [vmem:[%s3006_s5 + $0x28] sm:$0xf] }
  0xb3   : > { %1189 = vmatmul.bf16.vlgmr.msra.gmra.mxu1 %v975_v42  ;;  %1202 = vmatmul.bf16.vlgmr.msra.gmra.mxu2 %v975_v42 }
  0xb4   : > { %1215 = vmatmul.bf16.vlgmr.msra.gmra.mxu3 %v975_v42  ;;  %1497 = vmatpush.bf16.msrb.mxu0 %v2405_v15  ;;  %v2549_v42 = vld [vmem:[%s3006_s5 + $0xa4] sm:$0xf] }
  0xb5   : > { %1510 = vmatpush.bf16.msrb.mxu1 %v2409_v20  ;;  %1523 = vmatpush.bf16.msrb.mxu2 %v2413_v21  ;;  %v2539_v20 = vld [vmem:[%s3006_s5 + $0x4c] sm:$0xf0] }
  0xb6   : > { %1536 = vmatpush.bf16.msrb.mxu3 %v2417_v25 }
  0xb8   : > { %1498 = vmatpush.bf16.msrb.mxu0 %v2389_v31  ;;  %v2334_v31 = vld [vmem:[%s3006_s5 + $0x58] sm:$0xf0] }
  0xb9   : > { %1511 = vmatpush.bf16.msrb.mxu1 %v2393_v35  ;;  %1524 = vmatpush.bf16.msrb.mxu2 %v2397_v36  ;;  %v2337_v33 = vor.u32 %v2538_v28, %v2334_v31  ;;  %v2535_v35 = vld [vmem:[%s3006_s5 + $0x2c] sm:$0xf0]  ;;  %v2533_v36 = vld [vmem:[%s3006_s5 + $0x24] sm:$0xf] }
  0xba   : > { %1537 = vmatpush.bf16.msrb.mxu3 %v2401_v39  ;;  %v2309_v39 = vor.u32 %v2535_v35, %v2308_v34 }
  0xbc   : > { %1499 = vmatpush.bf16.msrb.mxu0 %v2373_v43 }
  0xef   : > { %v853_v45 = vpop.f32.mrf.mxu0 }
  0xf0   : > { %v854_v46 = vadd.f32 %v853_v45, %v516_v44  ;;  %v2380_v45 = vld [vmem:[%s3006_s5 + $0xa8] sm:$0xf] }
  0xf2   : > { %v867_v55 = vpop.f32.mrf.mxu1 }
  0xf3   : > { %v868_v48 = vadd.f32 %v867_v55, %v854_v46  ;;  %v2552_v46 = vld [vmem:[%s3006_s5 + $0xb4] sm:$0xf0] }
  0xf5   : > { %956 = vst [vmem:[#allocation2] sm:$0xff] %v868_v48  ;;  %v2550_v48 = vld [vmem:[%s3006_s5 + $0xac] sm:$0xf] }
  0xf6   : > { %v881_v49 = vpop.f32.mrf.mxu2 }
  0xf7   : > { %v882_v58 = vadd.f32 %v881_v49, %v517_v47  ;;  %v855_v52 = vpop.f32.mrf.mxu0  ;;  %v2382_v49 = vld [vmem:[%s3006_s5 + $0xb8] sm:$0xf0] }
  0xf8   : > { %v856_v53 = vadd.f32 %v855_v52, %v516_v44  ;;  %v2374_v44 = vld [vmem:[%s3006_s5 + $0xb0] sm:$0xf0]  ;;  %v2545_v52 = vld [vmem:[%s3006_s5 + $0x84] sm:$0xf] }
  0xf9   : > { %v895_v50 = vpop.f32.mrf.mxu3  ;;  %v2377_v55 = vor.u32 %v2549_v42, %v2374_v44  ;;  %v2536_v42 = vld [vmem:[%s3006_s5 + $0x34] sm:$0xf0] }
  0xfa   : > { %v896_v51 = vadd.f32 %v895_v50, %v882_v58  ;;  %v869_v54 = vpop.f32.mrf.mxu1  ;;  %v2385_v58 = vor.u32 %v2550_v48, %v2382_v49  ;;  %v2356_v50 = vld [vmem:[%s3006_s5 + $0x80] sm:$0xf] }
  0xfb   : > { %v870_v56 = vadd.f32 %v869_v54, %v856_v53  ;;  %1512 = vmatpush.bf16.msrb.mxu1 %v2377_v55  ;;  %v2358_v54 = vld [vmem:[%s3006_s5 + $0x90] sm:$0xf0]  ;;  %v2534_v55 = vld [vmem:[%s3006_s5 + $0x2c] sm:$0xf] }
  0xfc   : > { %957 = vst [vmem:[#allocation2 + $0x8] sm:$0xff] %v896_v51  ;;  %v2547_v51 = vld [vmem:[%s3006_s5 + $0x8c] sm:$0xf0]  ;;  %1538 = vmatpush.bf16.msrb.mxu3 %v2385_v58 }
  0xfd   : > { %960 = vst [vmem:[#allocation2 + $0x20] sm:$0xff] %v870_v56  ;;  %v2357_v53 = vor.u32 %v2547_v51, %v2356_v50  ;;  %v2364_v56 = vld [vmem:[%s3006_s5 + $0x88] sm:$0xf]  ;;  %v2292_v50 = vld [vmem:[%s3006_s5] sm:$0xf] }
  0xfe   : > { %v883_v57 = vpop.f32.mrf.mxu2  ;;  %v2531_v51 = vld [vmem:[%s3006_s5 + $0xc] sm:$0xf0] }
  0xff   : > { %v884_v59 = vadd.f32 %v883_v57, %v517_v47  ;;  %v2381_v47 = vor.u32 %v2552_v46, %v2380_v45  ;;  %v2548_v57 = vld [vmem:[%s3006_s5 + $0x94] sm:$0xf0]  ;;  %1500 = vmatpush.bf16.msrb.mxu0 %v2357_v53  ;;  %v2313_v45 = vor.u32 %v2533_v36, %v2310_v40  ;;  %v2317_v46 = vor.u32 %v2536_v42, %v2316_v41 }
 0x101   : > { %v897_v60 = vpop.f32.mrf.mxu3  ;;  %1525 = vmatpush.bf16.msrb.mxu2 %v2381_v47  ;;  %v2318_v47 = vld [vmem:[%s3006_s5 + $0x38] sm:$0xf0] }
 0x102   : > { %v898_v61 = vadd.f32 %v897_v60, %v884_v59  ;;  %v2361_v59 = vor.u32 %v2545_v52, %v2358_v54  ;;  %v2365_v60 = vor.u32 %v2548_v57, %v2364_v56  ;;  %v2321_v48 = vor.u32 %v2534_v55, %v2318_v47  ;;  %v2529_v56 = vld [vmem:[%s3006_s5 + $0x4] sm:$0xf]  ;;  %v2294_v57 = vld [vmem:[%s3006_s5 + $0x10] sm:$0xf0] }
 0x103   : > { %v2293_v54 = vor.u32 %v2531_v51, %v2292_v50 }
 0x104   : > { %961 = vst [vmem:[#allocation2 + $0x28] sm:$0xff] %v898_v61  ;;  %1513 = vmatpush.bf16.msrb.mxu1 %v2361_v59 }
 0x105   : > { %1526 = vmatpush.bf16.msrb.mxu2 %v2365_v60  ;;  %v2297_v60 = vor.u32 %v2529_v56, %v2294_v57 }
 0x10f   : > { %v909_v63 = vpop.f32.mrf.mxu0 }
 0x110   : > { %v910_v0 = vadd.f32 %v909_v63, %v518_v62  ;;  %v2366_v63 = vld [vmem:[%s3006_s5 + $0x98] sm:$0xf0] }
 0x112   : > { %v923_v1 = vpop.f32.mrf.mxu1 }
 0x113   : > { %v924_v3 = vadd.f32 %v923_v1, %v910_v0 }
 0x115   : > { %958 = vst [vmem:[#allocation2 + $0x10] sm:$0xff] %v924_v3  ;;  %v2543_v3 = vld [vmem:[%s3006_s5 + $0x6c] sm:$0xf0] }
 0x116   : > { %v937_v4 = vpop.f32.mrf.mxu2 }
 0x117   : > { %v938_v5 = vadd.f32 %v937_v4, %v519_v2  ;;  %v911_v8 = vpop.f32.mrf.mxu0 }
 0x118   : > { %v912_v9 = vadd.f32 %v911_v8, %v518_v62  ;;  %v2546_v62 = vld [vmem:[%s3006_s5 + $0x8c] sm:$0xf]  ;;  %v2348_v8 = vld [vmem:[%s3006_s5 + $0x68] sm:$0xf] }
 0x119   : > { %v951_v6 = vpop.f32.mrf.mxu3  ;;  %v2369_v1 = vor.u32 %v2546_v62, %v2366_v63  ;;  %v2349_v16 = vor.u32 %v2544_v12, %v2348_v8  ;;  %v2532_v62 = vld [vmem:[%s3006_s5 + $0x14] sm:$0xf0]  ;;  %v2530_v63 = vld [vmem:[%s3006_s5 + $0xc] sm:$0xf] }
 0x11a   : > { %v952_v7 = vadd.f32 %v951_v6, %v938_v5  ;;  %v925_v10 = vpop.f32.mrf.mxu1  ;;  %v2541_v6 = vld [vmem:[%s3006_s5 + $0x64] sm:$0xf] }
 0x11b   : > { %v926_v11 = vadd.f32 %v925_v10, %v912_v9  ;;  %1539 = vmatpush.bf16.msrb.mxu3 %v2369_v1  ;;  %1527 = vmatpush.bf16.msrb.mxu2 %v2349_v16  ;;  %v2302_v1 = vld [vmem:[%s3006_s5 + $0x18] sm:$0xf0] }
 0x11c   : > { %959 = vst [vmem:[#allocation2 + $0x18] sm:$0xff] %v952_v7  ;;  %v2342_v7 = vld [vmem:[%s3006_s5 + $0x70] sm:$0xf0] }
 0x11d   : > { %962 = vst [vmem:[#allocation2 + $0x30] sm:$0xff] %v926_v11  ;;  %v2345_v11 = vor.u32 %v2541_v6, %v2342_v7 }
 0x11e   : > { %v939_v19 = vpop.f32.mrf.mxu2 }
 0x11f   : > { %v940_v24 = vadd.f32 %v939_v19, %v519_v2  ;;  %v2340_v2 = vld [vmem:[%s3006_s5 + $0x60] sm:$0xf]  ;;  %1514 = vmatpush.bf16.msrb.mxu1 %v2345_v11  ;;  %1540 = vmatpush.bf16.msrb.mxu3 %v2353_v17 }
 0x120   : > { %v2341_v5 = vor.u32 %v2543_v3, %v2340_v2  ;;  %v2324_v19 = vld [vmem:[%s3006_s5 + $0x40] sm:$0xf] }
 0x121   : > { %v953_v26 = vpop.f32.mrf.mxu3  ;;  %v2325_v22 = vor.u32 %v2539_v20, %v2324_v19 }
 0x122   : > { %v954_v30 = vadd.f32 %v953_v26, %v940_v24  ;;  %1501 = vmatpush.bf16.msrb.mxu0 %v2341_v5  ;;  %v2326_v24 = vld [vmem:[%s3006_s5 + $0x50] sm:$0xf0]  ;;  %v2332_v26 = vld [vmem:[%s3006_s5 + $0x48] sm:$0xf] }
 0x123   : > { %v2329_v25 = vor.u32 %v2537_v23, %v2326_v24  ;;  %1541 = vmatpush.bf16.msrb.mxu3 %v2337_v33 }
 0x124   : > { %963 = vst [vmem:[#allocation2 + $0x38] sm:$0xff] %v954_v30  ;;  %v2333_v30 = vor.u32 %v2540_v27, %v2332_v26  ;;  %v1282_v27 = vld [vmem:[#allocation4] sm:$0xff] }
 0x125   : > { %1515 = vmatpush.bf16.msrb.mxu1 %v2329_v25 }
 0x126   : > { %1502 = vmatpush.bf16.msrb.mxu0 %v2325_v22  ;;  %1528 = vmatpush.bf16.msrb.mxu2 %v2333_v30 }
 0x127   : > { %1542 = vmatpush.bf16.msrb.mxu3 %v2321_v48 }
 0x129   : > { %1516 = vmatpush.bf16.msrb.mxu1 %v2313_v45 }
 0x12a   : > { %1503 = vmatpush.bf16.msrb.mxu0 %v2309_v39  ;;  %1529 = vmatpush.bf16.msrb.mxu2 %v2317_v46 }
 0x12b   : > { %v970_v61 = vld [vmem:[%s3294_s20] sm:$0xff]  ;;  %v971_v0 = vld [vmem:[%s3294_s20 + $0x8] sm:$0xff]  ;;  %v973_v29 = vld [vmem:[%s3294_s20 + $0x18] sm:$0xff] }
 0x12c   : > { %v972_v6 = vld [vmem:[%s3294_s20 + $0x10] sm:$0xff]  ;;  %v1299_v55 = vld [vmem:[%s1298_s23] sm:$0xff]  ;;  %v1300_v48 = vld [vmem:[%s1298_s23 + $0x8] sm:$0xff] }
 0x12d   : > { %1517 = vmatpush.bf16.msrb.mxu1 %v2297_v60 }
 0x12e   : > { %1504 = vmatpush.bf16.msrb.mxu0 %v2293_v54  ;;  %v1302_v54 = vld [vmem:[%s1298_s23 + $0x18] sm:$0xff] }
 0x12f   : > { %v1177_v4 = vpop.f32.mrf.mxu0 }
 0x130   : > { %v1220_v9 = vadd.f32 %v1177_v4, %v970_v61  ;;  %v1190_v10 = vpop.f32.mrf.mxu1  ;;  %v2300_v61 = vld [vmem:[%s3006_s5 + $0x8] sm:$0xf]  ;;  %v2305_v4 = vor.u32 %v2530_v63, %v2302_v1  ;;  %s1290_s5 = scalar_lea.vmem %s3044_s13, %s2153_s25 [#allocation9] }
 0x131   : > { %v1221_v15 = vadd.f32 %v1190_v10, %v971_v0  ;;  %v2301_v3 = vor.u32 %v2532_v62, %v2300_v61 }
 0x132   : > { %v2284_v18 = vmul.f32 -1.442695, %v1220_v9  ;;  %1543 = vmatpush.bf16.msrb.mxu3 %v2305_v4 }
 0x133   : > { %v2285_v21 = vmul.f32 -1.442695, %v1221_v15  ;;  %1530 = vmatpush.bf16.msrb.mxu2 %v2301_v3 }
 0x134   : > { %2657 = vpow2.f32 %v2284_v18 }
 0x135   : > { %2659 = vpow2.f32 %v2285_v21 }
 0x136   : > { %v1203_v32 = vpop.f32.mrf.mxu2 }
 0x137   : > { %v1216_v37 = vpop.f32.mrf.mxu3  ;;  %v1179_v38 = vpop.f32.mrf.mxu0  ;;  %v1222_v8 = vadd.f32 %v1203_v32, %v972_v6 }
 0x138   : > { %v1223_v43 = vadd.f32 %v1216_v37, %v973_v29  ;;  %v1192_v44 = vpop.f32.mrf.mxu1 }
 0x13a   : > { %v2658_v49 = vpop.eup %2657  ;;  %v2286_v58 = vmul.f32 -1.442695, %v1223_v43 }
 0x13b   : > { %v2660_v52 = vpop.eup %2659  ;;  %v1227_v53 = vadd.f32 1.0, %v2658_v49 }
 0x13c   : > { %v1246_v59 = vadd.f32 1.0, %v2660_v52  ;;  %2661 = vpow2.f32 %v2286_v58 }
 0x13d   : > { %2663 = vrcp.f32 %v1227_v53  ;;  %v1239_v15 = vand.u32 2147483648, %v1227_v53  ;;  %v1237_v18 = vand.u32 2147483647, %v1227_v53  ;;  %vm1233_vm2 = vweird.f32 %v1227_v53 }
 0x13e   : > { %2665 = vrcp.f32 %v1246_v59  ;;  %v1205_v0 = vpop.f32.mrf.mxu2  ;;  %v1258_v16 = vand.u32 2147483648, %v1246_v59  ;;  %v1256_v20 = vand.u32 2147483647, %v1246_v59  ;;  %vm1252_vm3 = vweird.f32 %v1246_v59 }
 0x13f   : > { %v1218_v2 = vpop.f32.mrf.mxu3  ;;  %v1240_v23 = vor.u32 1.1754944e-38, %v1239_v15  ;;  %vm1238_vm6 = vcmp.eq.f32.partialorder %v1237_v18, 8.507059e+37 }
 0x140   : > { %v1259_v25 = vor.u32 1.1754944e-38, %v1258_v16  ;;  %vm1257_vm7 = vcmp.eq.f32.partialorder %v1256_v20, 8.507059e+37 }
 0x142   : > { %v2662_v5 = vpop.eup %2661 }
 0x143   : > { %v2664_v7 = vpop.eup %2663  ;;  %v1266_v9 = vadd.f32 1.0, %v2662_v5  ;;  %v1301_v5 = vld [vmem:[%s1298_s23 + $0x10] sm:$0xff] }
 0x144   : > { %v2666_v10 = vpop.eup %2665  ;;  %v1229_v11 = vmul.f32 %v2664_v7, %v1227_v53  ;;  %vm1234_vm0 = vweird.f32 %v2664_v7 }
 0x145   : > { %v1248_v12 = vmul.f32 %v2666_v10, %v1246_v59  ;;  %2667 = vrcp.f32 %v1266_v9  ;;  %vm1253_vm1 = vweird.f32 %v2666_v10  ;;  %vm1235_vm4 = vmor %vm1233_vm2, %vm1234_vm0  ;;  %v1278_v39 = vand.u32 2147483648, %v1266_v9 }
 0x146   : > { %v1230_v13 = vsub.f32 1.0, %v1229_v11  ;;  %2669 = vtanh.f32 %v1222_v8  ;;  %vm1254_vm5 = vmor %vm1252_vm3, %vm1253_vm1  ;;  %vm1272_vm9 = vweird.f32 %v1266_v9  ;;  %v1276_v40 = vand.u32 2147483647, %v1266_v9 }
 0x147   : > { %v1249_v14 = vsub.f32 1.0, %v1248_v12  ;;  %v1279_v42 = vor.u32 1.1754944e-38, %v1278_v39 }
 0x148   : > { %v1231_v17 = vmul.f32 %v2664_v7, %v1230_v13  ;;  %vm1277_vm11 = vcmp.eq.f32.partialorder %v1276_v40, 8.507059e+37 }
 0x149   : > { %v1250_v19 = vmul.f32 %v2666_v10, %v1249_v14 }
 0x14a   : > { %v1232_v21 = vadd.f32 %v2664_v7, %v1231_v17 }
 0x14b   : > { %v2668_v22 = vpop.eup %2667  ;;  %v1251_v24 = vadd.f32 %v2666_v10, %v1250_v19 }
 0x14c   : > { %v1236_v26 = vsel %vm1235_vm4, %v2664_v7, %v1232_v21  ;;  %v1268_v28 = vmul.f32 %v2668_v22, %v1266_v9  ;;  %v2670_v29 = vpop.eup %2669  ;;  %vm1273_vm8 = vweird.f32 %v2668_v22 }
 0x14d   : > { %v1241_v30 = vsel %vm1238_vm6, %v1240_v23, %v1236_v26  ;;  %v1255_v31 = vsel %vm1254_vm5, %v2666_v10, %v1251_v24  ;;  %vm1274_vm10 = vmor %vm1272_vm9, %vm1273_vm8 }
 0x14e   : > { %v1260_v32 = vsel %vm1257_vm7, %v1259_v25, %v1255_v31  ;;  %v1284_v33 = vmul.f32 %v2670_v29, %v1241_v30  ;;  %v1269_v34 = vsub.f32 1.0, %v1268_v28 }
 0x14f   : > { %v1283_v35 = vmul.f32 %v1282_v27, %v1260_v32 }
 0x150   : > { %v1270_v36 = vmul.f32 %v2668_v22, %v1269_v34 }
 0x151   : > { %v3334_v37 = vadd.f32 %v1284_v33, %v1283_v35 }
 0x152   : > { %v1271_v38 = vadd.f32 %v2668_v22, %v1270_v36 }
 0x153   : > { %2671 = vtanh.f32 %v3334_v37 }
 0x154   : > { %v1275_v41 = vsel %vm1274_vm10, %v2668_v22, %v1271_v38 }
 0x155   : > { %v1280_v44 = vsel %vm1277_vm11, %v1279_v42, %v1275_v41 }
 0x159   : > { %v2672_v43 = vpop.eup %2671 }
 0x15a   : > { %v1287_v45 = vmul.f32 %v2672_v43, %v1280_v44 }
 0x15c   : > { %1291 = vst [vmem:[%s1290_s5] sm:$0xff] %v1287_v45  ;;  %v1304_v46 = vpack.c.bf16 %v1287_v45, %v1287_v45 }
 0x15e   : > { %1505 = vmatmul.bf16.vlgmr.msrb.gmra.mxu0 %v1304_v46  ;;  %1518 = vmatmul.bf16.vlgmr.msrb.gmra.mxu1 %v1304_v46 }
 0x15f   : > { %1531 = vmatmul.bf16.vlgmr.msrb.gmra.mxu2 %v1304_v46  ;;  %1544 = vmatmul.bf16.vlgmr.msrb.gmra.mxu3 %v1304_v46 }
 0x1db   : > { %v1506_v47 = vpop.f32.mrf.mxu0  ;;  %v1519_v49 = vpop.f32.mrf.mxu1 }
 0x1dc   : > { %v1549_v58 = vadd.f32 %v1506_v47, %v1299_v55  ;;  %v1550_v50 = vadd.f32 %v1519_v49, %v1300_v48 }
 0x1de   : > { %v2418_v51 = vmul.f32 -1.442695, %v1549_v58  ;;  %v2419_v52 = vmul.f32 -1.442695, %v1550_v50 }
 0x1e0   : > { %2673 = vpow2.f32 %v2418_v51 }
 0x1e1   : > { %2675 = vpow2.f32 %v2419_v52 }
 0x1e2   : > { %v1532_v53 = vpop.f32.mrf.mxu2  ;;  %v1545_v56 = vpop.f32.mrf.mxu3 }
 0x1e3   : > { %v1552_v57 = vadd.f32 %v1545_v56, %v1302_v54  ;;  %v1508_v59 = vpop.f32.mrf.mxu0  ;;  %v1521_v60 = vpop.f32.mrf.mxu1  ;;  %v1551_v8 = vadd.f32 %v1532_v53, %v1301_v5 }
 0x1e5   : > { %v2420_v61 = vmul.f32 -1.442695, %v1552_v57 }
 0x1e6   : > { %v2674_v62 = vpop.eup %2673 }
 0x1e7   : > { %v2676_v63 = vpop.eup %2675  ;;  %v1556_v0 = vadd.f32 1.0, %v2674_v62  ;;  %2677 = vpow2.f32 %v2420_v61 }
 0x1e8   : > { %v1575_v1 = vadd.f32 1.0, %v2676_v63 }
 0x1e9   : > { %2679 = vrcp.f32 %v1556_v0  ;;  %v1568_v14 = vand.u32 2147483648, %v1556_v0  ;;  %v1566_v17 = vand.u32 2147483647, %v1556_v0  ;;  %vm1562_vm14 = vweird.f32 %v1556_v0 }
 0x1ea   : > { %2681 = vrcp.f32 %v1575_v1  ;;  %v1534_v2 = vpop.f32.mrf.mxu2  ;;  %v1547_v3 = vpop.f32.mrf.mxu3  ;;  %v1587_v15 = vand.u32 2147483648, %v1575_v1  ;;  %v1585_v19 = vand.u32 2147483647, %v1575_v1  ;;  %vm1581_vm15 = vweird.f32 %v1575_v1 }
 0x1eb   : > { %v1569_v22 = vor.u32 1.1754944e-38, %v1568_v14  ;;  %vm1567_vm2 = vcmp.eq.f32.partialorder %v1566_v17, 8.507059e+37 }
 0x1ec   : > { %v1588_v25 = vor.u32 1.1754944e-38, %v1587_v15  ;;  %vm1586_vm3 = vcmp.eq.f32.partialorder %v1585_v19, 8.507059e+37 }
 0x1ed   : > { %v2678_v4 = vpop.eup %2677 }
 0x1ee   : > { %v1595_v6 = vadd.f32 1.0, %v2678_v4 }
 0x1ef   : > { %v2680_v7 = vpop.eup %2679 }
 0x1f0   : > { %v2682_v9 = vpop.eup %2681  ;;  %v1558_v10 = vmul.f32 %v2680_v7, %v1556_v0  ;;  %2683 = vrcp.f32 %v1595_v6  ;;  %vm1563_vm12 = vweird.f32 %v2680_v7  ;;  %v1607_v38 = vand.u32 2147483648, %v1595_v6 }
 0x1f1   : > { %v1577_v11 = vmul.f32 %v2682_v9, %v1575_v1  ;;  %2685 = vtanh.f32 %v1551_v8  ;;  %vm1582_vm13 = vweird.f32 %v2682_v9  ;;  %vm1564_vm0 = vmor %vm1562_vm14, %vm1563_vm12  ;;  %vm1601_vm5 = vweird.f32 %v1595_v6 }
 0x1f2   : > { %v1559_v12 = vsub.f32 1.0, %v1558_v10  ;;  %vm1583_vm1 = vmor %vm1581_vm15, %vm1582_vm13  ;;  %v1605_v39 = vand.u32 2147483647, %v1595_v6  ;;  %v1608_v41 = vor.u32 1.1754944e-38, %v1607_v38 }
 0x1f3   : > { %v1578_v13 = vsub.f32 1.0, %v1577_v11 }
 0x1f4   : > { %v1560_v16 = vmul.f32 %v2680_v7, %v1559_v12  ;;  %vm1606_vm7 = vcmp.eq.f32.partialorder %v1605_v39, 8.507059e+37 }
 0x1f5   : > { %v1579_v18 = vmul.f32 %v2682_v9, %v1578_v13 }
 0x1f6   : > { %v2684_v20 = vpop.eup %2683  ;;  %v1561_v21 = vadd.f32 %v2680_v7, %v1560_v16 }
 0x1f7   : > { %v1580_v23 = vadd.f32 %v2682_v9, %v1579_v18  ;;  %v1597_v24 = vmul.f32 %v2684_v20, %v1595_v6  ;;  %v2686_v27 = vpop.eup %2685  ;;  %vm1602_vm4 = vweird.f32 %v2684_v20 }
 0x1f8   : > { %v1565_v26 = vsel %vm1564_vm0, %v2680_v7, %v1561_v21  ;;  %vm1603_vm6 = vmor %vm1601_vm5, %vm1602_vm4 }
 0x1f9   : > { %v1570_v28 = vsel %vm1567_vm2, %v1569_v22, %v1565_v26  ;;  %v1584_v29 = vsel %vm1583_vm1, %v2682_v9, %v1580_v23  ;;  %v1598_v30 = vsub.f32 1.0, %v1597_v24 }
 0x1fa   : > { %v1589_v31 = vsel %vm1586_vm3, %v1588_v25, %v1584_v29  ;;  %v1613_v32 = vmul.f32 %v2686_v27, %v1570_v28 }
 0x1fb   : > { %v1612_v33 = vmul.f32 %v1589_v31, %v3334_v37  ;;  %v1599_v34 = vmul.f32 %v2684_v20, %v1598_v30 }
 0x1fd   : > { %v1614_v35 = vadd.f32 %v1613_v32, %v1612_v33  ;;  %v1600_v36 = vadd.f32 %v2684_v20, %v1599_v34 }
 0x1ff   : > { %2687 = vtanh.f32 %v1614_v35  ;;  %1618 = vst [vmem:[#allocation4] sm:$0xff] %v1614_v35  ;;  %v1604_v40 = vsel %vm1603_vm6, %v2684_v20, %v1600_v36 }
 0x200   : > { %v1609_v43 = vsel %vm1606_vm7, %v1608_v41, %v1604_v40 }
 0x205   : > { %v2688_v42 = vpop.eup %2687  ;;  %1624 = sbr.rel (%p2421_p7) target bundleno = 529 (0x211), region = 52 }
 0x206   : > { %v1616_v44 = vmul.f32 %v2688_v42, %v1609_v43 }
 0x208   : > { %1617 = vst [vmem:[#allocation3] sm:$0xff] %v1616_v44 }
 0x209   : > { %1620 = vst [vmem:[%s1619_s28] sm:$0xff] %v1616_v44 }
 0x20a   : > { %v1627_v45 = vld [vmem:[#allocation4] sm:$0xff] }
 0x20b   : > { %1628 = vst [vmem:[%s3042_s11] sm:$0xff] %v1627_v45 }
 0x20f   : > { %v1625_v37 = vld [vmem:[#allocation3] sm:$0xff] }
 0x210   : > { %1626 = vst [vmem:[%s3037_s2] sm:$0xff] %v1625_v37 }
 0x211 PF: > { %1643 = sbr.rel (!%p2964_p11) target bundleno = 539 (0x21b), region = 56  ;;  %s2561_s6 = sshll.u32 (%p2964_p11), %s3020_s7, 2 }
 0x212   : > { %s1651_s21 = sadd.s32 (%p2964_p11), %s2823_s27, %s2561_s6  ;;  %s3427_s1 = sld [smem:[#allocation21_spill]] (%p2964_p11) }
 0x213   : > { %s2425_s14 = sshll.u32 (%p2964_p11), %s1651_s21, 3 }
 0x217   : > { %v1684_v46 = vld [vmem:[%s3044_s13] sm:$0xff]  ;;  %v1686_v55 = vld [vmem:[%s3044_s13 + $0x8] sm:$0xff] }
 0x218   : > { %s1653_s15 = scalar_lea.vmem %s3427_s1, %s2425_s14 }
 0x219   : > { %1685 = vst [vmem:[%s1653_s15] sm:$0xff] %v1684_v46 }
 0x21a   : > { %1687 = vst [vmem:[%s1653_s15 + $0x10] sm:$0xff] %v1686_v55 }
 0x21b PF: > { %s23_s30 = sadd.s32 1, %s2835_s30   ;;  %s3428_s2 = sld [smem:[#allocation12_spill]] }
 0x21c   : > { %p20_p8 = scmp.ge.s32.totalorder %s23_s30, 10   ;;  %s3429_s25 = sld [smem:[#allocation17_spill]] }
 0x21d   : > { %s3430_s26 = sld [smem:[#allocation13_spill]]  ;;  %s3434_s21 = smov %s2803_s22 }
 0x21e   : > { %s3431_s27 = sld [smem:[#allocation14_spill]]  ;;  %s3435_s22 = smov %s2974_s17 }
 0x21f   : > { %s3432_s28 = sld [smem:[#allocation15_spill]]  ;;  %s3436_s23 = smov %s2811_s24 }
 0x220   : > { %s3433_s29 = sld [smem:[#allocation16_spill]]  ;;  %22 = sbr.rel (!%p20_p8) target bundleno = 15 (0xf), region = 169 }
 0x221   : > { %s3437_s24 = smov %s3428_s2 }
 0x225   :  { %1723 = vsyncpa [#allocation6], 1 }
 0x226   :  { %1725 = vsyncpa [#allocation6 + $0x1], 1 }
 0x227   :  { %1726 = vsyncpa [#allocation8], 1 }
 0x228   :  { %1728 = vsyncpa [#allocation8 + $0x1], 1 }

</bundles_post_ra>
